<compile_context>
chip_gen: v5e
topology: v5e:2x2
jax: 0.10.0
libtpu: 0.0.40
codegen_flags: <defaults>
</compile_context>

<pallas_src>
import functools
import math

import jax
import jax.numpy as jnp
from jax import lax
from jax.experimental import pallas as pl
from jax.experimental.pallas import tpu as pltpu


def _apply_act(y, act):
    if act == "relu":
        return jnp.maximum(y, 0.0)
    if act == "relu6":
        return jnp.clip(y, 0.0, 6.0)
    if act == "leakyrelu":
        # torch.nn.LeakyReLU default negative_slope=0.01
        return jnp.where(y >= 0.0, y, 0.01 * y)
    if act == "hardswish":
        return y * jnp.clip(y + 3.0, 0.0, 6.0) * (1.0 / 6.0)
    raise NotImplementedError(f"conv with activation={act} not implemented yet")


def _round_up(v, m):
    return (v + m - 1) // m * m


def conv_bn_act_kernel(x_ref, w_ref, scale_ref, shift_ref, o_ref, *scratch,
                       K, stride, tile_h, W_out, C_in, cout_tile, act,
                       row_step, halo, use_im2col, strided_ds):
    """One grid step: (tile_h*W_out, cout_tile) output rows of one image.

    x_ref:     (rows_in | H_in_p, W_pad, C_in)   VMEM bf16 (halo rows / image)
    w_ref:     (K*K*C_in, cout_tile)             VMEM bf16 (im2col weights)
    scale_ref: (1, cout_tile)                    VMEM f32  (gamma / sqrt(var+eps))
    shift_ref: (1, cout_tile)                    VMEM f32  (beta - mean*scale)
    o_ref:     (rows, cout_tile)                 VMEM (lane-dense, rows % 8 == 0)
    scratch:   optional (tile_h, W_out, K*K*C_in) bf16 im2col patch
    """
    rows = tile_h * W_out
    if halo:
        row_base = 0                              # window already starts at tile
    else:
        row_base = pl.multiple_of(pl.program_id(1) * row_step, row_step)

    def tap(kh, kw):
        """(tile_h, W_out, C_in) bf16 input window for kernel tap (kh, kw)."""
        if stride == 1:
            return x_ref[pl.ds(row_base + kh, tile_h), pl.ds(kw, W_out), :]
        if strided_ds:
            return x_ref[pl.ds(row_base + kh, tile_h, stride=stride),
                         pl.ds(kw, W_out, stride=stride), :]
        blk = x_ref[pl.ds(row_base + kh, (tile_h - 1) * stride + 1),
                    pl.ds(kw, (W_out - 1) * stride + 1), :]
        return blk[::stride, ::stride, :]

    if use_im2col:
        # C_in % 128 == 0: every tap store below is a full-lane unmasked vst,
        # and the conv is ONE MXU matmul contracting over K*K*C_in.
        patch_ref, = scratch
        for kh in range(K):
            for kw in range(K):
                col = (kh * K + kw) * C_in
                patch_ref[:, :, col:col + C_in] = tap(kh, kw)
        patch = patch_ref[...].reshape(rows, K * K * C_in)
        acc = jnp.dot(patch, w_ref[...], preferred_element_type=jnp.float32)
    else:
        # Small C_in: K*K direct MXU dots (the MXU pads the narrow contraction
        # anyway); avoids a masked lane-offset scatter into a patch scratch.
        acc = jnp.zeros((rows, cout_tile), jnp.float32)
        for kh in range(K):
            for kw in range(K):
                lhs = tap(kh, kw).reshape(rows, C_in)
                r0 = (kh * K + kw) * C_in
                acc = acc + jnp.dot(lhs, w_ref[r0:r0 + C_in, :],
                                    preferred_element_type=jnp.float32)

    # Folded BatchNorm (running stats) + activation epilogue in f32.
    y = acc * scale_ref[...] + shift_ref[...]
    o_ref[...] = _apply_act(y, act).astype(o_ref.dtype)


def conv_module_forward(x_nchw, weight_oihw, bn_gamma, bn_beta, bn_mean, bn_var,
                        *, stride, padding, act, groups=1, eps=1e-5,
                        max_rows=512, cout_tile=None, out_dtype=None):
    """Forward of ConvModule: conv (bias=False, groups=1) -> BN -> act.

    x_nchw:      (N, C_in, H, W)
    weight_oihw: (C_out, C_in, K, K)   (PyTorch Conv2d layout)
    returns      (N, C_out, H_out, W_out)
    """
    if groups != 1:
        raise NotImplementedError("groups > 1 not implemented")

    N, C_in, H, W = x_nchw.shape
    C_out, _, K, K2 = weight_oihw.shape
    assert K == K2, "only square kernels supported"
    s, p = stride, padding
    H_out = (H + 2 * p - K) // s + 1
    W_out = (W + 2 * p - K) // s + 1
    W_pad = W + 2 * p
    out_dtype = x_nchw.dtype if out_dtype is None else out_dtype

    # ---- channel / spatial tiling ------------------------------------------
    C_out_pad = _round_up(C_out, 128)            # lane-dense output stores
    if cout_tile is None:
        cout_tile = 256 if C_out_pad % 256 == 0 else 128
    cout_tile = min(cout_tile, C_out_pad)
    assert C_out_pad % cout_tile == 0
    n_c_tiles = C_out_pad // cout_tile

    use_im2col = (C_in % 128 == 0)
    sub = 16 if use_im2col else 8                # bf16 / f32 sublane count
    g = sub // math.gcd(W_out, sub)              # granule so rows % sub == 0
    tile_h = max(1, min(H_out, max(1, max_rows // W_out)))
    tile_h = _round_up(tile_h, g)
    n_h_tiles = -(-H_out // tile_h)              # cdiv (no divisibility needed)
    H_out_p = n_h_tiles * tile_h
    rows = tile_h * W_out
    row_step = tile_h * s
    rows_in = (tile_h - 1) * s + K               # halo window height per step
    H_in_p = max(H + 2 * p, (H_out_p - 1) * s + K)
    HWp = H_out_p * W_out

    # ---- operand prep (wrapper layout glue; see TODOs at top) ---------------
    x_nhwc = jnp.transpose(x_nchw, (0, 2, 3, 1))
    x_pad = jnp.pad(x_nhwc, ((0, 0), (p, H_in_p - H - p), (p, p), (0, 0)))
    x_pad = x_pad.astype(jnp.bfloat16)           # bf16 MXU operands

    # OIHW -> HWIO -> (K*K*C_in, C_out_pad), zero-padded output channels.
    w2d = jnp.transpose(weight_oihw, (2, 3, 1, 0)).reshape(K * K * C_in, C_out)
    w2d = jnp.pad(w2d, ((0, 0), (0, C_out_pad - C_out))).astype(jnp.bfloat16)

    # Fold BN running stats into a per-channel affine (f32).
    inv_std = 1.0 / jnp.sqrt(bn_var.astype(jnp.float32) + eps)
    scale = bn_gamma.astype(jnp.float32) * inv_std
    shift = bn_beta.astype(jnp.float32) - bn_mean.astype(jnp.float32) * scale
    scale = jnp.pad(scale, (0, C_out_pad - C_out)).reshape(1, C_out_pad)
    shift = jnp.pad(shift, (0, C_out_pad - C_out)).reshape(1, C_out_pad)

    out_isz = jnp.dtype(out_dtype).itemsize
    flops = 2 * N * H_out_p * W_out * K * K * C_in * C_out_pad
    bytes_accessed = x_pad.size * 2 + w2d.size * 2 + N * HWp * C_out_pad * out_isz

    # ---- pallas_call builder -------------------------------------------------
    def build(halo, single_buf, strided_ds):
        if halo:
            # Halo row tile: only rows_in input rows VMEM-resident per step.
            in_x = pl.BlockSpec((None, pl.Element(rows_in), W_pad, C_in),
                                lambda n, t, c: (n, t * row_step, 0, 0))
        else:
            # Conservative fallback: whole padded image per batch element.
            in_x = pl.BlockSpec((None, H_in_p, W_pad, C_in),
                                lambda n, t, c: (n, 0, 0, 0))
        cmode = {}
        if single_buf and n_c_tiles == 1:
            # Constant-index operands are fetched once -> no double buffer.
            cmode = dict(pipeline_mode=pl.Buffered(1))
        in_w = pl.BlockSpec((K * K * C_in, cout_tile),
                            lambda n, t, c: (0, c), **cmode)
        in_sc = pl.BlockSpec((1, cout_tile), lambda n, t, c: (0, c), **cmode)
        in_sh = pl.BlockSpec((1, cout_tile), lambda n, t, c: (0, c), **cmode)
        out_spec = pl.BlockSpec((None, rows, cout_tile),
                                lambda n, t, c: (n, t, c))
        scratch = ([pltpu.VMEM((tile_h, W_out, K * K * C_in), jnp.bfloat16)]
                   if use_im2col else [])

        cp_kwargs = dict(dimension_semantics=("parallel", "parallel", "arbitrary"))
        if halo:
            x_blk = rows_in * W_pad * C_in * 2
            w_blk = K * K * C_in * cout_tile * 2
            o_blk = rows * cout_tile * out_isz
            patch = rows * K * K * C_in * 2 if use_im2col else 0
            w_bufs = 1 if (single_buf and n_c_tiles == 1) else 2
            need = 2 * x_blk + w_bufs * w_blk + 2 * o_blk + patch + 4 * cout_tile * 8
            cp_kwargs["vmem_limit_bytes"] = int(
                min(max(1.5 * need + (4 << 20), 16 << 20), 48 << 20))

        kern = functools.partial(
            conv_bn_act_kernel, K=K, stride=s, tile_h=tile_h, W_out=W_out,
            C_in=C_in, cout_tile=cout_tile, act=act, row_step=row_step,
            halo=halo, use_im2col=use_im2col, strided_ds=strided_ds)

        return pl.pallas_call(
            kern,
            out_shape=jax.ShapeDtypeStruct((N, HWp, C_out_pad), out_dtype),
            grid=(N, n_h_tiles, n_c_tiles),
            in_specs=[in_x, in_w, in_sc, in_sh],
            out_specs=out_spec,
            scratch_shapes=scratch,
            compiler_params=pltpu.CompilerParams(**cp_kwargs),
            cost_estimate=pl.CostEstimate(flops=flops, transcendentals=0,
                                          bytes_accessed=bytes_accessed),
        )

    # Attempt ladder: prefer halo input + single-buffered constants + strided
    # reads; gracefully degrade to the previously validated conservative spec
    # if a newer Pallas feature does not lower on the installed jax version.
    attempts = [
        dict(halo=True, single_buf=True, strided_ds=True),
        dict(halo=True, single_buf=False, strided_ds=True),
        dict(halo=True, single_buf=True, strided_ds=False),
        dict(halo=False, single_buf=False, strided_ds=True),
        dict(halo=False, single_buf=False, strided_ds=False),
    ]
    if s == 1:                                   # strided_ds flag is a no-op
        seen, uniq = set(), []
        for a in attempts:
            k2_ = (a["halo"], a["single_buf"])
            if k2_ not in seen:
                seen.add(k2_)
                uniq.append(a)
        attempts = uniq

    out2d = None
    for i, opt in enumerate(attempts):
        try:
            out2d = build(**opt)(x_pad, w2d, scale, shift)
            break
        except Exception:
            if i == len(attempts) - 1:
                raise

    out = out2d.reshape(N, H_out_p, W_out, C_out_pad)[:, :H_out, :, :C_out]
    return jnp.transpose(out, (0, 3, 1, 2))


def _reference_forward(x_nchw, weight_oihw, bn_gamma, bn_beta, bn_mean, bn_var,
                       *, stride, padding, act, eps=1e-5):
    """Pure-JAX reference matching the kernel numerics (bf16 operands, f32 acc)."""
    xr = x_nchw.astype(jnp.bfloat16).astype(jnp.float32)
    wr = weight_oihw.astype(jnp.bfloat16).astype(jnp.float32)
    y = lax.conv_general_dilated(
        xr, wr, window_strides=(stride, stride),
        padding=[(padding, padding), (padding, padding)],
        dimension_numbers=("NCHW", "OIHW", "NCHW"),
        preferred_element_type=jnp.float32,
        precision=lax.Precision.HIGHEST)
    inv_std = 1.0 / jnp.sqrt(bn_var + eps)
    scale = (bn_gamma * inv_std).reshape(1, -1, 1, 1)
    shift = (bn_beta - bn_mean * bn_gamma * inv_std).reshape(1, -1, 1, 1)
    return _apply_act(y * scale + shift, act).astype(x_nchw.dtype)


if __name__ == "__main__":
    key = jax.random.PRNGKey(0)

    def run_case(case_key, *, N, H, W, c_in, c_out, k, s, p, act,
                 max_rows=512, atol=5e-3):
        kx, kw_, kg, kb, km, kv = jax.random.split(case_key, 6)
        x = jax.random.normal(kx, (N, c_in, H, W), dtype=jnp.float32)
        fan_in = c_in * k * k
        bound = 1.0 / math.sqrt(fan_in)
        weight = jax.random.uniform(kw_, (c_out, c_in, k, k),
                                    minval=-bound, maxval=bound,
                                    dtype=jnp.float32)
        gamma = 1.0 + 0.1 * jax.random.normal(kg, (c_out,), dtype=jnp.float32)
        beta = 0.1 * jax.random.normal(kb, (c_out,), dtype=jnp.float32)
        mean = 0.1 * jax.random.normal(km, (c_out,), dtype=jnp.float32)
        var = jax.random.uniform(kv, (c_out,), minval=0.5, maxval=1.5,
                                 dtype=jnp.float32)

        out = conv_module_forward(x, weight, gamma, beta, mean, var,
                                  stride=s, padding=p, act=act,
                                  max_rows=max_rows)
        out = jax.block_until_ready(out)
        ref = _reference_forward(x, weight, gamma, beta, mean, var,
                                 stride=s, padding=p, act=act)
        h_out = (H + 2 * p - k) // s + 1
        w_out = (W + 2 * p - k) // s + 1
        assert out.shape == (N, c_out, h_out, w_out), out.shape
        err = float(jnp.max(jnp.abs(out - ref)))
        assert err < atol, (act, s, err)

    k1, k2, k3 = jax.random.split(key, 3)
    # ConvModule(4, 8, 3, 1, 1, 'relu6')  -- small-C_in direct-dot path.
    run_case(k1, N=2, H=16, W=16, c_in=4, c_out=8, k=3, s=1, p=1, act="relu6")
    # im2col path (C_in % 128 == 0), stride 2, hardswish, non-divisible H_out.
    run_case(k2, N=2, H=9, W=9, c_in=128, c_out=32, k=3, s=2, p=1,
             act="hardswish")
    # small C_in, padding 0, odd spatial size -> multiple halo row tiles.
    run_case(k3, N=2, H=13, W=13, c_in=3, c_out=24, k=3, s=1, p=0,
             act="leakyrelu", max_rows=64)

    print("KERNEL_OK")
</pallas_src>

<mosaic_0001>
module attributes {stable_mosaic.version = 11 : i64} {
  func.func @conv_bn_act_kernel(%arg0: i32, %arg1: i32, %arg2: i32, %arg3: memref<1x18x18x4xbf16, #tpu.memory_space<vmem>>, %arg4: memref<36x128xbf16, #tpu.memory_space<vmem>>, %arg5: memref<1x128xf32, #tpu.memory_space<vmem>>, %arg6: memref<1x128xf32, #tpu.memory_space<vmem>>, %arg7: memref<1x256x128xf32, #tpu.memory_space<vmem>>) attributes {dimension_semantics = [#tpu.dimension_semantics<parallel>, #tpu.dimension_semantics<parallel>, #tpu.dimension_semantics<arbitrary>], iteration_bounds = array<i64: 2, 1, 1>, scalar_prefetch = 0 : i64, scratch_operands = 0 : i64, tpu.core_type = #tpu.core_type<tc>, window_params = [{transform_indices = @transform_0, window_bounds = array<i64: 1, 18, 18, 4>}, {transform_indices = @transform_1, window_bounds = array<i64: 36, 128>}, {transform_indices = @transform_2, window_bounds = array<i64: 1, 128>}, {transform_indices = @transform_3, window_bounds = array<i64: 1, 128>}, {transform_indices = @transform_4, window_bounds = array<i64: 1, 256, 128>}]} {
    %c16_i32 = arith.constant 16 : i32
    %0 = arith.muli %arg1, %c16_i32 : i32
    %1 = tpu.assume_multiple %0, 16 : i32
    %cst = arith.constant 0.000000e+00 : f32
    %2 = vector.broadcast %cst : f32 to vector<256x128xf32>
    %c0_i32 = arith.constant 0 : i32
    %3 = arith.addi %1, %c0_i32 : i32
    %c0 = arith.constant 0 : index
    %4 = arith.index_cast %3 : i32 to index
    %c0_0 = arith.constant 0 : index
    %c0_1 = arith.constant 0 : index
    %5 = vector.load %arg3[%c0, %4, %c0_0, %c0_1] : memref<1x18x18x4xbf16, #tpu.memory_space<vmem>>, vector<1x16x16x4xbf16>
    %6 = vector.shape_cast %5 : vector<1x16x16x4xbf16> to vector<16x16x4xbf16>
    %7 = vector.shape_cast %6 : vector<16x16x4xbf16> to vector<256x4xbf16>
    %c0_2 = arith.constant 0 : index
    %c0_3 = arith.constant 0 : index
    %8 = vector.load %arg4[%c0_2, %c0_3] : memref<36x128xbf16, #tpu.memory_space<vmem>>, vector<4x128xbf16>
    %cst_4 = arith.constant dense<0.000000e+00> : vector<256x128xf32>
    %9 = tpu.matmul %7, %8, %cst_4 {dimension_numbers = #tpu.dot_dimension_numbers<[1], [0], [0], [1], [0, 0, 1, 1], [], []>} : vector<256x4xbf16>, vector<4x128xbf16>, vector<256x128xf32> -> vector<256x128xf32>
    %10 = arith.addf %2, %9 : vector<256x128xf32>
    %c0_i32_5 = arith.constant 0 : i32
    %11 = arith.addi %1, %c0_i32_5 : i32
    %c0_6 = arith.constant 0 : index
    %12 = arith.index_cast %11 : i32 to index
    %c1 = arith.constant 1 : index
    %c0_7 = arith.constant 0 : index
    %13 = vector.load %arg3[%c0_6, %12, %c1, %c0_7] : memref<1x18x18x4xbf16, #tpu.memory_space<vmem>>, vector<1x16x16x4xbf16>
    %14 = vector.shape_cast %13 : vector<1x16x16x4xbf16> to vector<16x16x4xbf16>
    %15 = vector.shape_cast %14 : vector<16x16x4xbf16> to vector<256x4xbf16>
    %c4 = arith.constant 4 : index
    %c0_8 = arith.constant 0 : index
    %16 = vector.load %arg4[%c4, %c0_8] : memref<36x128xbf16, #tpu.memory_space<vmem>>, vector<4x128xbf16>
    %cst_9 = arith.constant dense<0.000000e+00> : vector<256x128xf32>
    %17 = tpu.matmul %15, %16, %cst_9 {dimension_numbers = #tpu.dot_dimension_numbers<[1], [0], [0], [1], [0, 0, 1, 1], [], []>} : vector<256x4xbf16>, vector<4x128xbf16>, vector<256x128xf32> -> vector<256x128xf32>
    %18 = arith.addf %10, %17 : vector<256x128xf32>
    %c0_i32_10 = arith.constant 0 : i32
    %19 = arith.addi %1, %c0_i32_10 : i32
    %c0_11 = arith.constant 0 : index
    %20 = arith.index_cast %19 : i32 to index
    %c2 = arith.constant 2 : index
    %c0_12 = arith.constant 0 : index
    %21 = vector.load %arg3[%c0_11, %20, %c2, %c0_12] : memref<1x18x18x4xbf16, #tpu.memory_space<vmem>>, vector<1x16x16x4xbf16>
    %22 = vector.shape_cast %21 : vector<1x16x16x4xbf16> to vector<16x16x4xbf16>
    %23 = vector.shape_cast %22 : vector<16x16x4xbf16> to vector<256x4xbf16>
    %c8 = arith.constant 8 : index
    %c0_13 = arith.constant 0 : index
    %24 = vector.load %arg4[%c8, %c0_13] : memref<36x128xbf16, #tpu.memory_space<vmem>>, vector<4x128xbf16>
    %cst_14 = arith.constant dense<0.000000e+00> : vector<256x128xf32>
    %25 = tpu.matmul %23, %24, %cst_14 {dimension_numbers = #tpu.dot_dimension_numbers<[1], [0], [0], [1], [0, 0, 1, 1], [], []>} : vector<256x4xbf16>, vector<4x128xbf16>, vector<256x128xf32> -> vector<256x128xf32>
    %26 = arith.addf %18, %25 : vector<256x128xf32>
    %c1_i32 = arith.constant 1 : i32
    %27 = arith.addi %1, %c1_i32 : i32
    %c0_15 = arith.constant 0 : index
    %28 = arith.index_cast %27 : i32 to index
    %c0_16 = arith.constant 0 : index
    %c0_17 = arith.constant 0 : index
    %29 = vector.load %arg3[%c0_15, %28, %c0_16, %c0_17] : memref<1x18x18x4xbf16, #tpu.memory_space<vmem>>, vector<1x16x16x4xbf16>
    %30 = vector.shape_cast %29 : vector<1x16x16x4xbf16> to vector<16x16x4xbf16>
    %31 = vector.shape_cast %30 : vector<16x16x4xbf16> to vector<256x4xbf16>
    %c12 = arith.constant 12 : index
    %c0_18 = arith.constant 0 : index
    %32 = vector.load %arg4[%c12, %c0_18] : memref<36x128xbf16, #tpu.memory_space<vmem>>, vector<4x128xbf16>
    %cst_19 = arith.constant dense<0.000000e+00> : vector<256x128xf32>
    %33 = tpu.matmul %31, %32, %cst_19 {dimension_numbers = #tpu.dot_dimension_numbers<[1], [0], [0], [1], [0, 0, 1, 1], [], []>} : vector<256x4xbf16>, vector<4x128xbf16>, vector<256x128xf32> -> vector<256x128xf32>
    %34 = arith.addf %26, %33 : vector<256x128xf32>
    %c1_i32_20 = arith.constant 1 : i32
    %35 = arith.addi %1, %c1_i32_20 : i32
    %c0_21 = arith.constant 0 : index
    %36 = arith.index_cast %35 : i32 to index
    %c1_22 = arith.constant 1 : index
    %c0_23 = arith.constant 0 : index
    %37 = vector.load %arg3[%c0_21, %36, %c1_22, %c0_23] : memref<1x18x18x4xbf16, #tpu.memory_space<vmem>>, vector<1x16x16x4xbf16>
    %38 = vector.shape_cast %37 : vector<1x16x16x4xbf16> to vector<16x16x4xbf16>
    %39 = vector.shape_cast %38 : vector<16x16x4xbf16> to vector<256x4xbf16>
    %c16 = arith.constant 16 : index
    %c0_24 = arith.constant 0 : index
    %40 = vector.load %arg4[%c16, %c0_24] : memref<36x128xbf16, #tpu.memory_space<vmem>>, vector<4x128xbf16>
    %cst_25 = arith.constant dense<0.000000e+00> : vector<256x128xf32>
    %41 = tpu.matmul %39, %40, %cst_25 {dimension_numbers = #tpu.dot_dimension_numbers<[1], [0], [0], [1], [0, 0, 1, 1], [], []>} : vector<256x4xbf16>, vector<4x128xbf16>, vector<256x128xf32> -> vector<256x128xf32>
    %42 = arith.addf %34, %41 : vector<256x128xf32>
    %c1_i32_26 = arith.constant 1 : i32
    %43 = arith.addi %1, %c1_i32_26 : i32
    %c0_27 = arith.constant 0 : index
    %44 = arith.index_cast %43 : i32 to index
    %c2_28 = arith.constant 2 : index
    %c0_29 = arith.constant 0 : index
    %45 = vector.load %arg3[%c0_27, %44, %c2_28, %c0_29] : memref<1x18x18x4xbf16, #tpu.memory_space<vmem>>, vector<1x16x16x4xbf16>
    %46 = vector.shape_cast %45 : vector<1x16x16x4xbf16> to vector<16x16x4xbf16>
    %47 = vector.shape_cast %46 : vector<16x16x4xbf16> to vector<256x4xbf16>
    %c20 = arith.constant 20 : index
    %c0_30 = arith.constant 0 : index
    %48 = vector.load %arg4[%c20, %c0_30] : memref<36x128xbf16, #tpu.memory_space<vmem>>, vector<4x128xbf16>
    %cst_31 = arith.constant dense<0.000000e+00> : vector<256x128xf32>
    %49 = tpu.matmul %47, %48, %cst_31 {dimension_numbers = #tpu.dot_dimension_numbers<[1], [0], [0], [1], [0, 0, 1, 1], [], []>} : vector<256x4xbf16>, vector<4x128xbf16>, vector<256x128xf32> -> vector<256x128xf32>
    %50 = arith.addf %42, %49 : vector<256x128xf32>
    %c2_i32 = arith.constant 2 : i32
    %51 = arith.addi %1, %c2_i32 : i32
    %c0_32 = arith.constant 0 : index
    %52 = arith.index_cast %51 : i32 to index
    %c0_33 = arith.constant 0 : index
    %c0_34 = arith.constant 0 : index
    %53 = vector.load %arg3[%c0_32, %52, %c0_33, %c0_34] : memref<1x18x18x4xbf16, #tpu.memory_space<vmem>>, vector<1x16x16x4xbf16>
    %54 = vector.shape_cast %53 : vector<1x16x16x4xbf16> to vector<16x16x4xbf16>
    %55 = vector.shape_cast %54 : vector<16x16x4xbf16> to vector<256x4xbf16>
    %c24 = arith.constant 24 : index
    %c0_35 = arith.constant 0 : index
    %56 = vector.load %arg4[%c24, %c0_35] : memref<36x128xbf16, #tpu.memory_space<vmem>>, vector<4x128xbf16>
    %cst_36 = arith.constant dense<0.000000e+00> : vector<256x128xf32>
    %57 = tpu.matmul %55, %56, %cst_36 {dimension_numbers = #tpu.dot_dimension_numbers<[1], [0], [0], [1], [0, 0, 1, 1], [], []>} : vector<256x4xbf16>, vector<4x128xbf16>, vector<256x128xf32> -> vector<256x128xf32>
    %58 = arith.addf %50, %57 : vector<256x128xf32>
    %c2_i32_37 = arith.constant 2 : i32
    %59 = arith.addi %1, %c2_i32_37 : i32
    %c0_38 = arith.constant 0 : index
    %60 = arith.index_cast %59 : i32 to index
    %c1_39 = arith.constant 1 : index
    %c0_40 = arith.constant 0 : index
    %61 = vector.load %arg3[%c0_38, %60, %c1_39, %c0_40] : memref<1x18x18x4xbf16, #tpu.memory_space<vmem>>, vector<1x16x16x4xbf16>
    %62 = vector.shape_cast %61 : vector<1x16x16x4xbf16> to vector<16x16x4xbf16>
    %63 = vector.shape_cast %62 : vector<16x16x4xbf16> to vector<256x4xbf16>
    %c28 = arith.constant 28 : index
    %c0_41 = arith.constant 0 : index
    %64 = vector.load %arg4[%c28, %c0_41] : memref<36x128xbf16, #tpu.memory_space<vmem>>, vector<4x128xbf16>
    %cst_42 = arith.constant dense<0.000000e+00> : vector<256x128xf32>
    %65 = tpu.matmul %63, %64, %cst_42 {dimension_numbers = #tpu.dot_dimension_numbers<[1], [0], [0], [1], [0, 0, 1, 1], [], []>} : vector<256x4xbf16>, vector<4x128xbf16>, vector<256x128xf32> -> vector<256x128xf32>
    %66 = arith.addf %58, %65 : vector<256x128xf32>
    %c2_i32_43 = arith.constant 2 : i32
    %67 = arith.addi %1, %c2_i32_43 : i32
    %c0_44 = arith.constant 0 : index
    %68 = arith.index_cast %67 : i32 to index
    %c2_45 = arith.constant 2 : index
    %c0_46 = arith.constant 0 : index
    %69 = vector.load %arg3[%c0_44, %68, %c2_45, %c0_46] : memref<1x18x18x4xbf16, #tpu.memory_space<vmem>>, vector<1x16x16x4xbf16>
    %70 = vector.shape_cast %69 : vector<1x16x16x4xbf16> to vector<16x16x4xbf16>
    %71 = vector.shape_cast %70 : vector<16x16x4xbf16> to vector<256x4xbf16>
    %c32 = arith.constant 32 : index
    %c0_47 = arith.constant 0 : index
    %72 = vector.load %arg4[%c32, %c0_47] : memref<36x128xbf16, #tpu.memory_space<vmem>>, vector<4x128xbf16>
    %cst_48 = arith.constant dense<0.000000e+00> : vector<256x128xf32>
    %73 = tpu.matmul %71, %72, %cst_48 {dimension_numbers = #tpu.dot_dimension_numbers<[1], [0], [0], [1], [0, 0, 1, 1], [], []>} : vector<256x4xbf16>, vector<4x128xbf16>, vector<256x128xf32> -> vector<256x128xf32>
    %74 = arith.addf %66, %73 : vector<256x128xf32>
    %c0_49 = arith.constant 0 : index
    %c0_50 = arith.constant 0 : index
    %75 = vector.load %arg5[%c0_49, %c0_50] : memref<1x128xf32, #tpu.memory_space<vmem>>, vector<1x128xf32>
    %76 = vector.broadcast %75 : vector<1x128xf32> to vector<256x128xf32>
    %77 = arith.mulf %74, %76 : vector<256x128xf32>
    %c0_51 = arith.constant 0 : index
    %c0_52 = arith.constant 0 : index
    %78 = vector.load %arg6[%c0_51, %c0_52] : memref<1x128xf32, #tpu.memory_space<vmem>>, vector<1x128xf32>
    %79 = vector.broadcast %78 : vector<1x128xf32> to vector<256x128xf32>
    %80 = arith.addf %77, %79 : vector<256x128xf32>
    %cst_53 = arith.constant 0.000000e+00 : f32
    %cst_54 = arith.constant 6.000000e+00 : f32
    %81 = vector.broadcast %cst_53 : f32 to vector<256x128xf32>
    %82 = arith.maximumf %81, %80 : vector<256x128xf32>
    %83 = vector.broadcast %cst_54 : f32 to vector<256x128xf32>
    %84 = arith.minimumf %83, %82 : vector<256x128xf32>
    %c0_55 = arith.constant 0 : index
    %c0_56 = arith.constant 0 : index
    %c0_57 = arith.constant 0 : index
    %85 = vector.load %arg7[%c0_55, %c0_56, %c0_57] : memref<1x256x128xf32, #tpu.memory_space<vmem>>, vector<1x256x128xf32>
    %86 = vector.shape_cast %85 : vector<1x256x128xf32> to vector<256x128xf32>
    %87 = vector.shape_cast %84 : vector<256x128xf32> to vector<1x256x128xf32>
    tpu.vector_store %arg7[%c0_55, %c0_56, %c0_57], %87 {strides = array<i32>} : memref<1x256x128xf32, #tpu.memory_space<vmem>>, vector<1x256x128xf32>,
    return
  }
  func.func @transform_0(%arg0: i32, %arg1: i32, %arg2: i32) -> (i32, i32, i32, i32) {
    %c0_i32 = arith.constant 0 : i32
    %c0_i32_0 = arith.constant 0 : i32
    %c0_i32_1 = arith.constant 0 : i32
    %c0_i32_2 = arith.constant 0 : i32
    return %arg0, %c0_i32, %c0_i32_0, %c0_i32_1 : i32, i32, i32, i32
  }
  func.func @transform_1(%arg0: i32, %arg1: i32, %arg2: i32) -> (i32, i32) {
    %c0_i32 = arith.constant 0 : i32
    %c0_i32_0 = arith.constant 0 : i32
    return %c0_i32, %arg2 : i32, i32
  }
  func.func @transform_2(%arg0: i32, %arg1: i32, %arg2: i32) -> (i32, i32) {
    %c0_i32 = arith.constant 0 : i32
    %c0_i32_0 = arith.constant 0 : i32
    return %c0_i32, %arg2 : i32, i32
  }
  func.func @transform_3(%arg0: i32, %arg1: i32, %arg2: i32) -> (i32, i32) {
    %c0_i32 = arith.constant 0 : i32
    %c0_i32_0 = arith.constant 0 : i32
    return %c0_i32, %arg2 : i32, i32
  }
  func.func @transform_4(%arg0: i32, %arg1: i32, %arg2: i32) -> (i32, i32, i32) {
    %c0_i32 = arith.constant 0 : i32
    return %arg0, %arg1, %arg2 : i32, i32, i32
  }
}

</mosaic_0001>

<bundles_post_ra>
// kernel: tpu_custom_call.1
= control target key start
LH: loop header
LB: loop body
LE: loop exit
PB: predicated region body
PF: predicated region fallthrough
CT: control target
= control target key end

     0   :  { %9 = vsyncpa [#allocation3], 0  ;;  %s6902_s0 = inlined_call_operand.vmem [shape: bf16[2,18,18,4], index: 0, kind: input, shape index: {}]   ;;  %s6903_s1 = inlined_call_operand.vmem [shape: bf16[36,128], index: 1, kind: input, shape index: {}]   ;;  %s6904_s2 = inlined_call_operand.vmem [shape: f32[1,128], index: 2, kind: input, shape index: {}]   ;;  %s6905_s3 = inlined_call_operand.vmem [shape: f32[1,128], index: 3, kind: input, shape index: {}]   ;;  %s6906_s4 = inlined_call_operand.hbm [shape: f32[2,256,128], index: 4, kind: output, shape index: {}]  }
   0x1   :  { %11 = vsyncpa [#allocation3 + $0x1], 0  ;;  %s5370_s15 = smov 0   ;;  %s5372_s16 = smov 0  }
   0x2   :  { %s5374_s17 = smov 0   ;;  %s5376_s18 = smov 0  }
   0x3   :  { %s5378_s19 = smov 0   ;;  %s5380_s20 = smov 0  }
   0x4 LB: > { %s4508_s21 = sadd.s32 4294967295, %s5341_s20   ;;  %s4509_s22 = sadd.s32 4294967294, %s5341_s20   ;;  %s5341_s20 = sphi %s5380_s20, %s17_s20   ;;  %s5337_s19 = sphi %s5378_s19, %s6923_s19   ;;  %s5333_s18 = sphi %s5376_s18, %s6922_s18   ;;  %s5329_s17 = sphi %s5374_s17, %s6921_s17   ;;  %s5325_s16 = sphi %s5372_s16, %s6920_s16   ;;  %s5321_s15 = sphi %s5370_s15, %s6919_s15  }
   0x5   : > { %s36_s23 = sadd.s32 1, %s5337_s19  ;;  %s151_s24 = sadd.s32 1, %s5329_s17 }
   0x6   : > { %p38_p0 = scmp.ge.s32.totalorder %s36_s23, 2  ;;  %p161_p1 = scmp.ne.s32.totalorder %s5329_s17, %s5325_s16 }
   0x7   : > { %p162_p2 = scmp.eq.s32.totalorder %s4508_s21, 1  ;;  %p167_p3 = scmp.ne.s32.totalorder %s5325_s16, %s5321_s15 }
   0x8   : > { %s6925_s23 = smov (%p38_p0, %s36_s23), 0  ;;  %p168_p5 = scmp.eq.s32.totalorder %s4509_s22, 1 }
   0x9   : > { %p5410_p4 = por %p162_p2, %p161_p1  ;;  %s144_s26 = ssub.s32 %s5337_s19, %s6925_s23 }
   0xa   : > { %p4515_p6 = scmp.ge.s32.totalorder %s5341_s20, 1  ;;  %p149_p7 = scmp.eq.s32.totalorder %s144_s26, 0 }
   0xb   : > { %p5417_p8 = por %p168_p5, %p167_p3  ;;  %p213_p9 = scmp.lt.s32.totalorder %s5341_s20, 3 }
   0xc   : > { %s5423_s28 = scalar_select %p149_p7, %s5329_s17, %s151_s24  }
   0xd   : > { %p214_p10 = pnand %p4515_p6, %p213_p9 }
   0xf   : > { %217 = sbr.rel (%p214_p10) target bundleno = 775 (0x307), region = 36 }
  0x14   : > { %v706_v0 = vld [vmem:[%s6903_s1] sm:$0xc]  ;;  %p249_p11 = scmp.lt.s32.totalorder %s5333_s18, 1  ;;  %v1284_v3 = vld [vmem:[%s6903_s1 + $0x4] sm:$0x3]  ;;  %vm808_vm0 = vcmask 1041408  }
  0x15   : > { %v756_v1 = vunpack.c.l.b16 %v706_v0  ;;  %v302_v4 = vld [vmem:[%s6903_s1] sm:$0x3]  ;;  %v2230_v5 = vld [vmem:[%s6903_s1 + $0x8] sm:$0x3]  ;;  %vm319_vm1 = vsmask.f32 3328 }
  0x16   : > { %s250_s5 = scalar_select %p249_p11, %s5333_s18, 1  ;;  %vm320_vm2 = vsmask.f32 7440  ;;  %v1382_v7 = vsel %vm808_vm0, %v1284_v3, 0  ;;  %v1541_v8 = vld [vmem:[%s6903_s1 + $0x4] sm:$0xc] }
  0x17   : > { %v757_v2 = vpack.c.b16 %v756_v1, %v756_v1  ;;  %v1030_v9 = vsel %vm808_vm0, %v302_v4, 0  ;;  %v2328_v13 = vsel %vm808_vm0, %v2230_v5, 0  ;;  %v1623_v22 = vunpack.c.l.b16 %v1541_v8  ;;  %vm5461_vm4 = vmor %vm319_vm1, %vm320_vm2  ;;  %s246_s14 = sand.u32 1, %s5325_s16  }
  0x18   : > { %s5151_s10 = smul.u32 216, %s250_s5  ;;  %vm759_vm3 = vcmask 31744   ;;  %vm1169_vm5 = vcmask 1042432   ;;  %vm1170_vm6 = vcmask 1046532   ;;  %s4516_s22 = sshll.u32 %s246_s14, 8 }
  0x19   : > { %v758_v6 = vrot.slane %v757_v2, 2  ;;  %v1624_v42 = vpack.c.b16 %v1623_v22, %v1623_v22  ;;  %vm5636_vm7 = vmor %vm1169_vm5, %vm1170_vm6  ;;  %s6537_s24 = scalar_lea.vmem [#allocation2], %s4516_s22  ;;  %s5147_s5 = sshll.u32 %s5333_s18, 8 }
  0x1a   : > { %s5442_s21 = scalar_lea.vmem %s6902_s0, %s5151_s10  ;;  %s4378_s8 = scalar_lea.hbm %s6906_s4, %s5147_s5 }
  0x1b   : > { %v810_v10 = vsel %vm808_vm0, %v758_v6, 0  ;;  %v278_v11 = vld [vmem:[%s5442_s21 + $0x30] sm:$0xf]  ;;  %v279_v12 = vld [vmem:[%s5442_s21 + $0x34] sm:$0xf]  ;;  %v1625_v5 = vrot.slane %v1624_v42, 2 }
  0x1c   : > { %5148 = vmatpush.bf16.msra.mxu1 %v810_v10  ;;  %5149 = vmatpush.bf16.msra.mxu2 %v810_v10  ;;  %v307_v14 = vld [vmem:[%s5442_s21 + $0x38] sm:$0x1]  ;;  %v419_v15 = vshrl.u32 %v278_v11, 16  ;;  %v422_v16 = vshll.u32 %v278_v11, 16  ;;  %v428_v17 = vshll.u32 %v279_v12, 16  ;;  %v432_v18 = vshrl.u32 %v279_v12, 16 }
  0x1d   : > { %5150 = vmatpush.bf16.msra.mxu3 %v810_v10  ;;  %819 = vmatpush.bf16.msra.mxu0 %v810_v10  ;;  %v438_v19 = vshll.u32 %v307_v14, 16  ;;  %v286_v20 = vld [vmem:[%s5442_s21 + $0x60] sm:$0xf]  ;;  %v287_v21 = vld [vmem:[%s5442_s21 + $0x64] sm:$0xf]  ;;  %s4379_s9 = sshll.u32 %s6537_s24, 4  ;;  %s4380_s9 = int_to_ptr.vmem [resolvable:$true] %s4379_s9 }
  0x1e   : > { %v421_v23 = vrot.slane %v419_v15, 4  ;;  %v424_v24 = vrot.slane %v422_v16, 5  ;;  %v430_v25 = vrot.slane %v428_v17, 5  ;;  %v434_v26 = vrot.slane %v432_v18, 4  ;;  %v311_v27 = vld [vmem:[%s5442_s21 + $0x68] sm:$0x1] }
  0x1f   : > { %v440_v28 = vrot.slane %v438_v19, 5  ;;  %v515_v29 = vshrl.u32 %v286_v20, 16  ;;  %v518_v30 = vshll.u32 %v286_v20, 16  ;;  %v524_v31 = vshll.u32 %v287_v21, 16  ;;  %v294_v36 = vld [vmem:[%s5442_s21 + $0x90] sm:$0xf] }
  0x20   : > { %1391 = vmatpush.bf16.msrb.mxu2 %v1382_v7  ;;  %1039 = vmatpush.bf16.msrb.mxu1 %v1030_v9  ;;  %v425_v32 = vor.u32 %v424_v24, %v421_v23  ;;  %v435_v33 = vor.u32 %v434_v26, %v430_v25  ;;  %v528_v34 = vshrl.u32 %v287_v21, 16  ;;  %v534_v35 = vshll.u32 %v311_v27, 16  ;;  %v295_v37 = vld [vmem:[%s5442_s21 + $0x94] sm:$0xf]  ;;  %v315_v54 = vld [vmem:[%s5442_s21 + $0x98] sm:$0x1] }
  0x21   : > { %2337 = vmatpush.bf16.msrb.mxu0 %v2328_v13  ;;  %v517_v39 = vrot.slane %v515_v29, 4  ;;  %v520_v40 = vrot.slane %v518_v30, 5  ;;  %v526_v41 = vrot.slane %v524_v31, 5  ;;  %v611_v48 = vshrl.u32 %v294_v36, 16  ;;  %v270_v0 = vld [vmem:[%s5442_s21] sm:$0xf] }
  0x22   : > { %v426_v43 = vrot.slane %v425_v32, 4  ;;  %v436_v44 = vrot.slane %v435_v33, 4  ;;  %v530_v45 = vrot.slane %v528_v34, 4  ;;  %v536_v46 = vrot.slane %v534_v35, 5  ;;  %v5474_v4 = vld [vmem:[%s5442_s21 + $0x4] sm:$0xf] }
  0x23   : > { %v521_v47 = vor.u32 %v520_v40, %v517_v39  ;;  %v614_v49 = vshll.u32 %v294_v36, 16  ;;  %v620_v50 = vshll.u32 %v295_v37, 16  ;;  %v624_v55 = vshrl.u32 %v295_v37, 16  ;;  %v5479_v10 = vld [vmem:[%s5442_s21 + $0x8] sm:$0x1]  ;;  %s4381_s10 = sshll.u32 %s4378_s8, 4  ;;  %s4382_s10 = int_to_ptr.hbm [resolvable:$true] %s4381_s10 }
  0x24   : > { %v431_v51 = vsel %vm5461_vm4, %v426_v43, %v430_v25  ;;  %v441_v52 = vsel %vm5461_vm4, %v436_v44, %v440_v28  ;;  %v531_v53 = vor.u32 %v530_v45, %v526_v41  ;;  %v613_v59 = vrot.slane %v611_v48, 4  ;;  %v280_v23 = vld [vmem:[%s5442_s21 + $0x3c] sm:$0xf]  ;;  %v5491_v28 = vld [vmem:[%s5442_s21 + $0x40] sm:$0xf]  ;;  %s4364_s18 = scalar_lea.sflag [#allocation3], %s246_s14 }
  0x25   : > { %v715_v56 = vunpack.c.l.b16 %v431_v51  ;;  %v716_v57 = vunpack.c.l.b16 %v441_v52  ;;  %v522_v58 = vrot.slane %v521_v47, 4  ;;  %v616_v61 = vrot.slane %v614_v49, 5  ;;  %v5495_v32 = vld [vmem:[%s5442_s21 + $0x44] sm:$0x1]  ;;  %v288_v37 = vld [vmem:[%s5442_s21 + $0x6c] sm:$0xf] }
  0x26   : > { %v532_v60 = vrot.slane %v531_v53, 4  ;;  %v622_v62 = vrot.slane %v620_v50, 5  ;;  %v626_v63 = vrot.slane %v624_v55, 4  ;;  %v630_v3 = vshll.u32 %v315_v54, 16  ;;  %v289_v47 = vld [vmem:[%s5442_s21 + $0x70] sm:$0xf] }
  0x27   : > { %v743_v1 = vpack.c.b16 %v716_v57, %v715_v56  ;;  %v527_v2 = vsel %vm5461_vm4, %v522_v58, %v526_v41  ;;  %v617_v8 = vor.u32 %v616_v61, %v613_v59  ;;  %v323_v13 = vshrl.u32 %v270_v0, 16  ;;  %v312_v51 = vld [vmem:[%s5442_s21 + $0x74] sm:$0x1]  ;;  %s5277_s11 = sshra.s32 %s4382_s10, 4  ;;  %s5278_s11 = int_to_ptr.hbm [resolvable:$true] %s5277_s11 }
  0x28   : > { %v537_v6 = vsel %vm5461_vm4, %v532_v60, %v536_v46  ;;  %v723_v7 = vunpack.c.l.b16 %v527_v2  ;;  %v627_v9 = vor.u32 %v626_v63, %v622_v62  ;;  %v632_v12 = vrot.slane %v630_v3, 5  ;;  %s5279_s12 = scalar_lea.hbm %s5278_s11, 256  ;;  %p5284_p1 = scmp.lt.s32.totalorder %s5278_s11, %s6906_s4 }
  0x29   : > { %4522 = vmatmul.msk.bf16.vlgmr.msra.gmra.mxu1 %vm759_vm3, %v743_v1  ;;  %v724_v11 = vunpack.c.l.b16 %v537_v6  ;;  %v326_v14 = vshll.u32 %v270_v0, 16  ;;  %v618_v15 = vrot.slane %v617_v8, 4  ;;  %v332_v17 = vshll.u32 %v5474_v4, 16  ;;  %v296_v1 = vld [vmem:[%s5442_s21 + $0x9c] sm:$0xf]  ;;  %p5280_p12 = scmp.ne.s32.totalorder %s5278_s11, %s5279_s12 }
  0x2a   : > { %v628_v16 = vrot.slane %v627_v9, 4  ;;  %v336_v18 = vshrl.u32 %v5474_v4, 16  ;;  %v325_v20 = vrot.slane %v323_v13, 4  ;;  %v342_v22 = vshll.u32 %v5479_v10, 16  ;;  %v297_v6 = vld [vmem:[%s5442_s21 + $0xa0] sm:$0xf] }
  0x2b   : > { %v747_v19 = vpack.c.b16 %v724_v11, %v723_v7  ;;  %v328_v21 = vrot.slane %v326_v14, 5  ;;  %v623_v24 = vsel %vm5461_vm4, %v618_v15, %v622_v62  ;;  %v334_v26 = vrot.slane %v332_v17, 5  ;;  %v316_v14 = vld [vmem:[%s5442_s21 + $0xa4] sm:$0x1]  ;;  %p5281_p13 = pnand %p5280_p12, %p5410_p4 }
  0x2c   : > { %v633_v25 = vsel %vm5461_vm4, %v628_v16, %v632_v12  ;;  %v338_v27 = vrot.slane %v336_v18, 4  ;;  %v731_v29 = vunpack.c.l.b16 %v623_v24  ;;  %v344_v34 = vrot.slane %v342_v22, 5 }
  0x2d   : > { %4526 = vmatmul.msk.bf16.vlgmr.msra.gmra.mxu2 %vm759_vm3, %v747_v19  ;;  %v732_v30 = vunpack.c.l.b16 %v633_v25  ;;  %v329_v31 = vor.u32 %v328_v21, %v325_v20  ;;  %v1675_v35 = vsel %vm808_vm0, %v1625_v5, 0  ;;  %v443_v36 = vshrl.u32 %v280_v23, 16  ;;  %p5282_p0 = pneg %p5281_p13 }
  0x2e   : > { %v339_v33 = vor.u32 %v338_v27, %v334_v26  ;;  %1684 = vmatpush.bf16.msrb.mxu3 %v1675_v35  ;;  %v446_v41 = vshll.u32 %v280_v23, 16  ;;  %v452_v42 = vshll.u32 %v5491_v28, 16  ;;  %v456_v45 = vshrl.u32 %v5491_v28, 16  ;;  %v5521_v35 = vld [vmem:[%s5442_s21 + $0x10] sm:$0xf] }
  0x2f   : > { %v751_v39 = vpack.c.b16 %v732_v30, %v731_v29  ;;  %v330_v40 = vrot.slane %v329_v31, 4  ;;  %v445_v44 = vrot.slane %v443_v36, 4  ;;  %v462_v46 = vshll.u32 %v5495_v32, 16  ;;  %v272_v30 = vld [vmem:[%s5442_s21 + $0xc] sm:$0xf] }
  0x30   : > { %v340_v43 = vrot.slane %v339_v33, 4  ;;  %v448_v49 = vrot.slane %v446_v41, 5  ;;  %v454_v50 = vrot.slane %v452_v42, 5  ;;  %v539_v52 = vshrl.u32 %v288_v37, 16  ;;  %v5524_v36 = vld [vmem:[%s5442_s21 + $0x14] sm:$0x1] }
  0x31   : > { %4530 = vmatmul.msk.bf16.vlgmr.msra.gmra.mxu3 %vm759_vm3, %v751_v39  ;;  %v335_v48 = vsel %vm5461_vm4, %v330_v40, %v334_v26  ;;  %v458_v55 = vrot.slane %v456_v45, 4  ;;  %v464_v56 = vrot.slane %v462_v46, 5  ;;  %v542_v60 = vshll.u32 %v288_v37, 16 }
  0x32   : > { %v345_v53 = vsel %vm5461_vm4, %v340_v43, %v344_v34  ;;  %v707_v54 = vunpack.c.l.b16 %v335_v48  ;;  %v449_v58 = vor.u32 %v448_v49, %v445_v44  ;;  %v541_v59 = vrot.slane %v539_v52, 4 }
  0x33   : > { %v708_v57 = vunpack.c.l.b16 %v345_v53  ;;  %v459_v61 = vor.u32 %v458_v55, %v454_v50  ;;  %v548_v62 = vshll.u32 %v289_v47, 16  ;;  %v552_v63 = vshrl.u32 %v289_v47, 16  ;;  %v5536_v55 = vld [vmem:[%s5442_s21 + $0x4c] sm:$0xf] }
  0x34   : > { %v558_v0 = vshll.u32 %v312_v51, 16  ;;  %v450_v3 = vrot.slane %v449_v58, 4  ;;  %v544_v5 = vrot.slane %v542_v60, 5  ;;  %v635_v15 = vshrl.u32 %v296_v1, 16 }
  0x35   : > { %v739_v2 = vpack.c.b16 %v708_v57, %v707_v54  ;;  %v460_v7 = vrot.slane %v459_v61, 4  ;;  %v550_v8 = vrot.slane %v548_v62, 5  ;;  %v554_v9 = vrot.slane %v552_v63, 4  ;;  %v5540_v62 = vld [vmem:[%s5442_s21 + $0x50] sm:$0x1] }
  0x36   : > { %v560_v11 = vrot.slane %v558_v0, 5  ;;  %v455_v12 = vsel %vm5461_vm4, %v450_v3, %v454_v50  ;;  %v545_v13 = vor.u32 %v544_v5, %v541_v59  ;;  %v638_v16 = vshll.u32 %v296_v1, 16  ;;  %v282_v50 = vld [vmem:[%s5442_s21 + $0x48] sm:$0xf] }
  0x37   : > { %4518 = vmatmul.msk.bf16.vlgmr.msra.gmra.mxu0 %vm759_vm3, %v739_v2  ;;  %v465_v17 = vsel %vm5461_vm4, %v460_v7, %v464_v56  ;;  %v717_v18 = vunpack.c.l.b16 %v455_v12  ;;  %v555_v19 = vor.u32 %v554_v9, %v550_v8  ;;  %v644_v20 = vshll.u32 %v297_v6, 16 }
  0x38   : > { %v718_v21 = vunpack.c.l.b16 %v465_v17  ;;  %v546_v22 = vrot.slane %v545_v13, 4  ;;  %v637_v23 = vrot.slane %v635_v15, 4  ;;  %v640_v24 = vrot.slane %v638_v16, 5 }
  0x39   : > { %v556_v25 = vrot.slane %v555_v19, 4  ;;  %v646_v26 = vrot.slane %v644_v20, 5  ;;  %v648_v27 = vshrl.u32 %v297_v6, 16  ;;  %v654_v29 = vshll.u32 %v316_v14, 16  ;;  %v290_v6 = vld [vmem:[%s5442_s21 + $0x78] sm:$0xf] }
  0x3a   : > { %v744_v31 = vpack.c.b16 %v718_v21, %v717_v18  ;;  %v551_v33 = vsel %vm5461_vm4, %v546_v22, %v550_v8  ;;  %v641_v34 = vor.u32 %v640_v24, %v637_v23  ;;  %v347_v44 = vshrl.u32 %v272_v30, 16  ;;  %v291_v19 = vld [vmem:[%s5442_s21 + $0x7c] sm:$0xf]  ;;  %v313_v20 = vld [vmem:[%s5442_s21 + $0x80] sm:$0x1] }
  0x3b   : > { %v561_v37 = vsel %vm5461_vm4, %v556_v25, %v560_v11  ;;  %v725_v39 = vunpack.c.l.b16 %v551_v33  ;;  %v650_v40 = vrot.slane %v648_v27, 4  ;;  %v656_v41 = vrot.slane %v654_v29, 5 }
  0x3c   : > { %4523 = vmatmul.msk.bf16.gmra.mxu1 %vm759_vm3, %v744_v31  ;;  %v726_v42 = vunpack.c.l.b16 %v561_v37  ;;  %v642_v43 = vrot.slane %v641_v34, 4  ;;  %v350_v45 = vshll.u32 %v272_v30, 16  ;;  %v356_v47 = vshll.u32 %v5521_v35, 16 }
  0x3d   : > { %v651_v46 = vor.u32 %v650_v40, %v646_v26  ;;  %v360_v48 = vshrl.u32 %v5521_v35, 16  ;;  %v366_v49 = vshll.u32 %v5524_v36, 16  ;;  %v349_v53 = vrot.slane %v347_v44, 4 }
  0x3e   : > { %v748_v51 = vpack.c.b16 %v726_v42, %v725_v39  ;;  %v647_v52 = vsel %vm5461_vm4, %v642_v43, %v646_v26  ;;  %v352_v54 = vrot.slane %v350_v45, 5  ;;  %v358_v58 = vrot.slane %v356_v47, 5  ;;  %v298_v39 = vld [vmem:[%s5442_s21 + $0xa8] sm:$0xf]  ;;  %v299_v43 = vld [vmem:[%s5442_s21 + $0xac] sm:$0xf] }
  0x3f   : > { %v652_v56 = vrot.slane %v651_v46, 4  ;;  %v733_v57 = vunpack.c.l.b16 %v647_v52  ;;  %v362_v59 = vrot.slane %v360_v48, 4  ;;  %v368_v61 = vrot.slane %v366_v49, 5  ;;  %v317_v48 = vld [vmem:[%s5442_s21 + $0xb0] sm:$0x1] }
  0x40   : > { %4527 = vmatmul.msk.bf16.gmra.mxu2 %vm759_vm3, %v748_v51  ;;  %v353_v60 = vor.u32 %v352_v54, %v349_v53  ;;  %v467_v63 = vshrl.u32 %v282_v50, 16  ;;  %v470_v0 = vshll.u32 %v282_v50, 16  ;;  %v476_v3 = vshll.u32 %v5536_v55, 16 }
  0x41   : > { %v657_v1 = vsel %vm5461_vm4, %v652_v56, %v656_v41  ;;  %v363_v2 = vor.u32 %v362_v59, %v358_v58  ;;  %v480_v5 = vshrl.u32 %v5536_v55, 16  ;;  %v486_v15 = vshll.u32 %v5540_v62, 16 }
  0x42   : > { %v734_v7 = vunpack.c.l.b16 %v657_v1  ;;  %v354_v8 = vrot.slane %v353_v60, 4  ;;  %v469_v9 = vrot.slane %v467_v63, 4  ;;  %v472_v11 = vrot.slane %v470_v0, 5 }
  0x43   : > { %v364_v12 = vrot.slane %v363_v2, 4  ;;  %v478_v13 = vrot.slane %v476_v3, 5  ;;  %v482_v14 = vrot.slane %v480_v5, 4  ;;  %v563_v21 = vshrl.u32 %v290_v6, 16  ;;  %v5565_v5 = vld [vmem:[%s5442_s21 + $0x1c] sm:$0xf] }
  0x44   : > { %v752_v16 = vpack.c.b16 %v734_v7, %v733_v57  ;;  %v359_v17 = vsel %vm5461_vm4, %v354_v8, %v358_v58  ;;  %v473_v18 = vor.u32 %v472_v11, %v469_v9  ;;  %v488_v25 = vrot.slane %v486_v15, 5  ;;  %v274_v58 = vld [vmem:[%s5442_s21 + $0x18] sm:$0xf]  ;;  %v5571_v8 = vld [vmem:[%s5442_s21 + $0x20] sm:$0x1] }
  0x45   : > { %v369_v22 = vsel %vm5461_vm4, %v364_v12, %v368_v61  ;;  %v709_v23 = vunpack.c.l.b16 %v359_v17  ;;  %v483_v24 = vor.u32 %v482_v14, %v478_v13  ;;  %v565_v29 = vrot.slane %v563_v21, 4  ;;  %v284_v15 = vld [vmem:[%s5442_s21 + $0x54] sm:$0xf] }
  0x46   : > { %4531 = vmatmul.msk.bf16.gmra.mxu3 %vm759_vm3, %v752_v16  ;;  %v710_v26 = vunpack.c.l.b16 %v369_v22  ;;  %v474_v27 = vrot.slane %v473_v18, 4  ;;  %v566_v30 = vshll.u32 %v290_v6, 16  ;;  %v572_v33 = vshll.u32 %v291_v19, 16 }
  0x47   : > { %v484_v31 = vrot.slane %v483_v24, 4  ;;  %v576_v34 = vshrl.u32 %v291_v19, 16  ;;  %v582_v37 = vshll.u32 %v313_v20, 16  ;;  %v659_v52 = vshrl.u32 %v298_v39, 16 }
  0x48   : > { %v740_v40 = vpack.c.b16 %v710_v26, %v709_v23  ;;  %v479_v41 = vsel %vm5461_vm4, %v474_v27, %v478_v13  ;;  %v568_v42 = vrot.slane %v566_v30, 5  ;;  %v574_v46 = vrot.slane %v572_v33, 5  ;;  %v5580_v27 = vld [vmem:[%s5442_s21 + $0x58] sm:$0xf] }
  0x49   : > { %v489_v44 = vsel %vm5461_vm4, %v484_v31, %v488_v25  ;;  %v719_v45 = vunpack.c.l.b16 %v479_v41  ;;  %v578_v47 = vrot.slane %v576_v34, 4  ;;  %v584_v51 = vrot.slane %v582_v37, 5  ;;  %v5587_v37 = vld [vmem:[%s5442_s21 + $0x5c] sm:$0x1] }
  0x4a   : > { %4519 = vmatmul.msk.bf16.gmra.mxu0 %vm759_vm3, %v740_v40  ;;  %v720_v49 = vunpack.c.l.b16 %v489_v44  ;;  %v569_v50 = vor.u32 %v568_v42, %v565_v29  ;;  %v662_v54 = vshll.u32 %v298_v39, 16  ;;  %v668_v56 = vshll.u32 %v299_v43, 16  ;;  %v292_v39 = vld [vmem:[%s5442_s21 + $0x84] sm:$0xf] }
  0x4b   : > { %v579_v53 = vor.u32 %v578_v47, %v574_v46  ;;  %v672_v57 = vshrl.u32 %v299_v43, 16  ;;  %v661_v61 = vrot.slane %v659_v52, 4  ;;  %v678_v63 = vshll.u32 %v317_v48, 16 }
  0x4c   : > { %v745_v59 = vpack.c.b16 %v720_v49, %v719_v45  ;;  %v570_v60 = vrot.slane %v569_v50, 4  ;;  %v664_v1 = vrot.slane %v662_v54, 5  ;;  %v670_v2 = vrot.slane %v668_v56, 5 }
  0x4d   : > { %v580_v0 = vrot.slane %v579_v53, 4  ;;  %v674_v3 = vrot.slane %v672_v57, 4  ;;  %v680_v7 = vrot.slane %v678_v63, 5  ;;  %v371_v9 = vshrl.u32 %v274_v58, 16  ;;  %v293_v57 = vld [vmem:[%s5442_s21 + $0x88] sm:$0xf] }
  0x4e   : > { %4524 = vmatmul.msk.bf16.gmra.mxu1 %vm759_vm3, %v745_v59  ;;  %v575_v6 = vsel %vm5461_vm4, %v570_v60, %v574_v46  ;;  %v665_v13 = vor.u32 %v664_v1, %v661_v61  ;;  %v374_v18 = vshll.u32 %v274_v58, 16  ;;  %v380_v19 = vshll.u32 %v5565_v5, 16  ;;  %v314_v60 = vld [vmem:[%s5442_s21 + $0x8c] sm:$0x1] }
  0x4f   : > { %v585_v11 = vsel %vm5461_vm4, %v580_v0, %v584_v51  ;;  %v727_v12 = vunpack.c.l.b16 %v575_v6  ;;  %v675_v14 = vor.u32 %v674_v3, %v670_v2  ;;  %v373_v17 = vrot.slane %v371_v9, 4 }
  0x50   : > { %v728_v16 = vunpack.c.l.b16 %v585_v11  ;;  %v666_v20 = vrot.slane %v665_v13, 4  ;;  %v384_v22 = vshrl.u32 %v5565_v5, 16  ;;  %v390_v23 = vshll.u32 %v5571_v8, 16 }
  0x51   : > { %v676_v21 = vrot.slane %v675_v14, 4  ;;  %v376_v25 = vrot.slane %v374_v18, 5  ;;  %v382_v26 = vrot.slane %v380_v19, 5  ;;  %v491_v29 = vshrl.u32 %v284_v15, 16 }
  0x52   : > { %v749_v24 = vpack.c.b16 %v728_v16, %v727_v12  ;;  %v671_v30 = vsel %vm5461_vm4, %v666_v20, %v670_v2  ;;  %v386_v33 = vrot.slane %v384_v22, 4  ;;  %v392_v34 = vrot.slane %v390_v23, 5  ;;  %v300_v12 = vld [vmem:[%s5442_s21 + $0xb4] sm:$0xf]  ;;  %v301_v20 = vld [vmem:[%s5442_s21 + $0xb8] sm:$0xf] }
  0x53   : > { %v681_v31 = vsel %vm5461_vm4, %v676_v21, %v680_v7  ;;  %v735_v40 = vunpack.c.l.b16 %v671_v30  ;;  %v377_v42 = vor.u32 %v376_v25, %v373_v17  ;;  %v493_v43 = vrot.slane %v491_v29, 4 }
  0x54   : > { %4528 = vmatmul.msk.bf16.gmra.mxu2 %vm759_vm3, %v749_v24  ;;  %v736_v41 = vunpack.c.l.b16 %v681_v31  ;;  %v387_v44 = vor.u32 %v386_v33, %v382_v26  ;;  %v494_v45 = vshll.u32 %v284_v15, 16  ;;  %v500_v46 = vshll.u32 %v5580_v27, 16  ;;  %v318_v24 = vld [vmem:[%s5442_s21 + $0xbc] sm:$0x1] }
  0x55   : > { %v504_v47 = vshrl.u32 %v5580_v27, 16  ;;  %v378_v49 = vrot.slane %v377_v42, 4  ;;  %v510_v50 = vshll.u32 %v5587_v37, 16  ;;  %v587_v51 = vshrl.u32 %v292_v39, 16 }
  0x56   : > { %v753_v48 = vpack.c.b16 %v736_v41, %v735_v40  ;;  %v388_v52 = vrot.slane %v387_v44, 4  ;;  %v496_v53 = vrot.slane %v494_v45, 5  ;;  %v502_v54 = vrot.slane %v500_v46, 5  ;;  %v276_v41 = vld [vmem:[%s5442_s21 + $0x24] sm:$0xf] }
  0x57   : > { %v506_v56 = vrot.slane %v504_v47, 4  ;;  %v383_v58 = vsel %vm5461_vm4, %v378_v49, %v382_v26  ;;  %v512_v59 = vrot.slane %v510_v50, 5  ;;  %v589_v61 = vrot.slane %v587_v51, 4  ;;  %v5613_v46 = vld [vmem:[%s5442_s21 + $0x28] sm:$0xf] }
  0x58   : > { %4532 = vmatmul.msk.bf16.gmra.mxu3 %vm759_vm3, %v753_v48  ;;  %v590_v63 = vshll.u32 %v292_v39, 16  ;;  %v393_v0 = vsel %vm5461_vm4, %v388_v52, %v392_v34  ;;  %v711_v1 = vunpack.c.l.b16 %v383_v58  ;;  %v497_v2 = vor.u32 %v496_v53, %v493_v43  ;;  %v5616_v51 = vld [vmem:[%s5442_s21 + $0x2c] sm:$0x1] }
  0x59   : > { %v507_v3 = vor.u32 %v506_v56, %v502_v54  ;;  %v712_v6 = vunpack.c.l.b16 %v393_v0  ;;  %v596_v9 = vshll.u32 %v293_v57, 16  ;;  %v600_v11 = vshrl.u32 %v293_v57, 16 }
  0x5a   : > { %v592_v7 = vrot.slane %v590_v63, 5  ;;  %v498_v13 = vrot.slane %v497_v2, 4  ;;  %v606_v15 = vshll.u32 %v314_v60, 16  ;;  %v683_v25 = vshrl.u32 %v300_v12, 16 }
  0x5b   : > { %v508_v14 = vrot.slane %v507_v3, 4  ;;  %v741_v16 = vpack.c.b16 %v712_v6, %v711_v1  ;;  %v598_v18 = vrot.slane %v596_v9, 5  ;;  %v602_v19 = vrot.slane %v600_v11, 4  ;;  %v4758_v9 = vld [vmem:[%s5442_s21 + $0xc] sm:$0xf] }
  0x5c   : > { %v593_v17 = vor.u32 %v592_v7, %v589_v61  ;;  %v503_v21 = vsel %vm5461_vm4, %v498_v13, %v502_v54  ;;  %v608_v23 = vrot.slane %v606_v15, 5  ;;  %v685_v33 = vrot.slane %v683_v25, 4 }
  0x5d   : > { %v513_v22 = vsel %vm5461_vm4, %v508_v14, %v512_v59  ;;  %4520 = vmatmul.msk.bf16.gmra.mxu0 %vm759_vm3, %v741_v16  ;;  %v721_v26 = vunpack.c.l.b16 %v503_v21  ;;  %v603_v31 = vor.u32 %v602_v19, %v598_v18  ;;  %v686_v34 = vshll.u32 %v300_v12, 16  ;;  %v2888_v14 = vld [vmem:[%s6903_s1 + $0xc] sm:$0x3] }
  0x5e   : > { %v722_v29 = vunpack.c.l.b16 %v513_v22  ;;  %v594_v30 = vrot.slane %v593_v17, 4  ;;  %v692_v39 = vshll.u32 %v301_v20, 16  ;;  %v696_v40 = vshrl.u32 %v301_v20, 16 }
  0x5f   : > { %v604_v44 = vrot.slane %v603_v31, 4  ;;  %v702_v45 = vshll.u32 %v318_v24, 16  ;;  %v688_v48 = vrot.slane %v686_v34, 5  ;;  %v1177_v52 = vrot.slane %v5479_v10, 5  ;;  %v1121_v10 = vld [vmem:[%s5442_s21] sm:$0xe] }
  0x60   : > { %v746_v42 = vpack.c.b16 %v722_v29, %v721_v26  ;;  %v599_v43 = vsel %vm5461_vm4, %v594_v30, %v598_v18  ;;  %v694_v49 = vrot.slane %v692_v39, 5  ;;  %v698_v50 = vrot.slane %v696_v40, 4  ;;  %v4759_v18 = vld [vmem:[%s5442_s21 + $0x10] sm:$0xf] }
  0x61   : > { %v729_v47 = vunpack.c.l.b16 %v599_v43  ;;  %v609_v53 = vsel %vm5461_vm4, %v604_v44, %v608_v23  ;;  %v704_v54 = vrot.slane %v702_v45, 5  ;;  %v395_v56 = vshrl.u32 %v276_v41, 16 }
  0x62   : > { %4525 = vmatmul.msk.bf16.gmra.mxu1 %vm759_vm3, %v746_v42  ;;  %v730_v57 = vunpack.c.l.b16 %v609_v53  ;;  %v689_v58 = vor.u32 %v688_v48, %v685_v33  ;;  %v699_v59 = vor.u32 %v698_v50, %v694_v49  ;;  %v398_v60 = vshll.u32 %v276_v41, 16  ;;  %v4760_v42 = vld [vmem:[%s5442_s21 + $0x14] sm:$0x1]  ;;  %v3573_v48 = vld [vmem:[%s6903_s1 + $0xc] sm:$0xc] }
  0x63   : > { %v397_v61 = vrot.slane %v395_v56, 4  ;;  %v404_v63 = vshll.u32 %v5613_v46, 16  ;;  %v408_v0 = vshrl.u32 %v5613_v46, 16  ;;  %v414_v1 = vshll.u32 %v5616_v51, 16  ;;  %v5099_v56 = vld [vmem:[%s5442_s21] sm:$0xff] }
  0x64   : > { %v750_v2 = vpack.c.b16 %v730_v57, %v729_v47  ;;  %v690_v3 = vrot.slane %v689_v58, 4  ;;  %v700_v6 = vrot.slane %v699_v59, 4  ;;  %v400_v7 = vrot.slane %v398_v60, 5  ;;  %v2627_v60 = vld [vmem:[%s6903_s1 + $0x8] sm:$0xc] }
  0x65   : > { %v406_v11 = vrot.slane %v404_v63, 5  ;;  %v410_v12 = vrot.slane %v408_v0, 4  ;;  %v416_v13 = vrot.slane %v414_v1, 5  ;;  %v4614_v23 = vrot.slane %v1121_v10, 9 }
  0x66   : > { %4529 = vmatmul.msk.bf16.gmra.mxu2 %vm759_vm3, %v750_v2  ;;  %v695_v15 = vsel %vm5461_vm4, %v690_v3, %v694_v49  ;;  %v705_v16 = vsel %vm5461_vm4, %v700_v6, %v704_v54  ;;  %v401_v17 = vor.u32 %v400_v7, %v397_v61  ;;  %v1174_v25 = vrot.slane %v5474_v4, 5  ;;  %v3974_v61 = vld [vmem:[%s6903_s1 + $0x10] sm:$0x3] }
  0x67   : > { %v737_v19 = vunpack.c.l.b16 %v695_v15  ;;  %v738_v20 = vunpack.c.l.b16 %v705_v16  ;;  %v411_v21 = vor.u32 %v410_v12, %v406_v11  ;;  %v3018_v26 = vsel %vm808_vm0, %v2888_v14, 0  ;;  %v4762_v16 = vld [vmem:[%s5442_s21 + $0x1c] sm:$0xf] }
  0x68   : > { %v402_v24 = vrot.slane %v401_v17, 4  ;;  %v1847_v29 = vshrl.u32 %v4758_v9, 16  ;;  %3027 = vmatpush.bf16.msra.mxu2 %v3018_v26  ;;  %v1850_v33 = vshll.u32 %v4758_v9, 16  ;;  %v1856_v34 = vshll.u32 %v4759_v18, 16 }
  0x69   : > { %v754_v30 = vpack.c.b16 %v738_v20, %v737_v19  ;;  %v412_v31 = vrot.slane %v411_v21, 4  ;;  %v1175_v40 = vsel %vm5636_vm7, %v4614_v23, %v1174_v25  ;;  %v1176_v41 = vrot.slane %v1174_v25, 4  ;;  %v1122_v19 = vld [vmem:[%s5442_s21 + $0xc] sm:$0xe] }
  0x6a   : > { %v407_v39 = vsel %vm5461_vm4, %v402_v24, %v406_v11  ;;  %v1849_v43 = vrot.slane %v1847_v29, 4  ;;  %v1285_v45 = vunpack.c.l.b16 %v1175_v40  ;;  %v1852_v47 = vrot.slane %v1850_v33, 5  ;;  %v4761_v11 = vld [vmem:[%s5442_s21 + $0x18] sm:$0xf]  ;;  %v5115_v29 = vld [vmem:[%s5442_s21 + $0xc] sm:$0xff] }
  0x6b   : > { %4533 = vmatmul.msk.bf16.gmra.mxu3 %vm759_vm3, %v754_v30  ;;  %v417_v4 = vsel %vm5461_vm4, %v412_v31, %v416_v13  ;;  %v713_v44 = vunpack.c.l.b16 %v407_v39  ;;  %v1178_v50 = vsel %vm5636_vm7, %v1176_v41, %v1177_v52  ;;  %v1858_v53 = vrot.slane %v1856_v34, 5 }
  0x6c   : > { %v714_v49 = vunpack.c.l.b16 %v417_v4  ;;  %v1860_v54 = vshrl.u32 %v4759_v18, 16  ;;  %v1286_v57 = vunpack.c.l.b16 %v1178_v50  ;;  %v1853_v58 = vor.u32 %v1852_v47, %v1849_v43  ;;  %v4763_v4 = vld [vmem:[%s5442_s21 + $0x20] sm:$0x1] }
  0x6d   : > { %v1866_v59 = vshll.u32 %v4760_v42, 16  ;;  %v3623_v1 = vunpack.c.l.b16 %v3573_v48  ;;  %v2677_v3 = vunpack.c.l.b16 %v2627_v60  ;;  %v4072_v6 = vsel %vm808_vm0, %v3974_v61, 0  ;;  %v5100_v48 = vld [vmem:[%s5442_s21 + $0xc] sm:$0xff]  ;;  %v4765_v60 = vld [vmem:[%s5442_s21 + $0x28] sm:$0xf] }
  0x6e   : > { %v742_v63 = vpack.c.b16 %v714_v49, %v713_v44  ;;  %v1862_v0 = vrot.slane %v1860_v54, 4  ;;  %v1317_v52 = vpack.c.b16 %v1286_v57, %v1285_v45  ;;  %v1854_v7 = vrot.slane %v1853_v58, 4  ;;  %4081 = vmatpush.bf16.msra.mxu0 %v4072_v6  ;;  %v4764_v57 = vld [vmem:[%s5442_s21 + $0x24] sm:$0xf] }
  0x6f   : > { %v3624_v2 = vpack.c.b16 %v3623_v1, %v3623_v1  ;;  %v1868_v9 = vrot.slane %v1866_v59, 5  ;;  %v2678_v14 = vpack.c.b16 %v2677_v3, %v2677_v3  ;;  %v1181_v15 = vrot.slane %v5521_v35, 5 }
  0x70   : > { %4521 = vmatmul.msk.bf16.gmra.mxu0 %vm759_vm3, %v742_v63  ;;  %v1863_v10 = vor.u32 %v1862_v0, %v1858_v53  ;;  %v1871_v20 = vshrl.u32 %v4761_v11, 16  ;;  %v1874_v21 = vshll.u32 %v4761_v11, 16  ;;  %v1859_v23 = vsel %vm5461_vm4, %v1854_v7, %v1858_v53  ;;  %v1123_v63 = vld [vmem:[%s5442_s21 + $0x18] sm:$0xe] }
  0x71   : > { %v3625_v13 = vrot.slane %v3624_v2, 2  ;;  %v2679_v18 = vrot.slane %v2678_v14, 2  ;;  %v1880_v35 = vshll.u32 %v4762_v16, 16  ;;  %v1884_v26 = vshrl.u32 %v4762_v16, 16 }
  0x72   : > { %4598 = vmatmul.msk.bf16.vlgmr.msrb.gmra.mxu1 %vm759_vm3, %v5099_v56  ;;  %v1864_v12 = vrot.slane %v1863_v10, 4  ;;  %v4615_v30 = vrot.slane %v1122_v19, 9  ;;  %v1183_v31 = vrot.slane %v1181_v15, 4  ;;  %v1184_v33 = vrot.slane %v5524_v36, 5 }
  0x73   : > { %v3675_v17 = vsel %vm808_vm0, %v3625_v13, 0  ;;  %v2729_v25 = vsel %vm808_vm0, %v2679_v18, 0  ;;  %v2231_v34 = vunpack.c.l.b16 %v1859_v23  ;;  %v1873_v40 = vrot.slane %v1871_v20, 4  ;;  %v4766_v18 = vld [vmem:[%s5442_s21 + $0x2c] sm:$0x1] }
  0x74   : > { %v1869_v24 = vsel %vm5461_vm4, %v1864_v12, %v1868_v9  ;;  %3684 = vmatpush.bf16.msra.mxu3 %v3675_v17  ;;  %2738 = vmatpush.bf16.msra.mxu1 %v2729_v25  ;;  %v1876_v41 = vrot.slane %v1874_v21, 5  ;;  %v1882_v42 = vrot.slane %v1880_v35, 5  ;;  %v1886_v43 = vrot.slane %v1884_v26, 4  ;;  %v5116_v9 = vld [vmem:[%s5442_s21 + $0x18] sm:$0xff] }
  0x75   : > { %v2232_v39 = vunpack.c.l.b16 %v1869_v24  ;;  %v1182_v44 = vsel %vm5636_vm7, %v4615_v30, %v1181_v15  ;;  %v1185_v45 = vsel %vm5636_vm7, %v1183_v31, %v1184_v33  ;;  %v1890_v50 = vshll.u32 %v4763_v4, 16  ;;  %v5101_v25 = vld [vmem:[%s5442_s21 + $0x18] sm:$0xff] }
  0x76   : > { %4630 = vmatmul.msk.bf16.vlgmr.msrb.gmra.mxu2 %vm759_vm3, %v1317_v52  ;;  %v1877_v36 = vor.u32 %v1876_v41, %v1873_v40  ;;  %v1887_v49 = vor.u32 %v1886_v43, %v1882_v42  ;;  %v1287_v53 = vunpack.c.l.b16 %v1182_v44  ;;  %v1288_v54 = vunpack.c.l.b16 %v1185_v45  ;;  %v1124_v43 = vld [vmem:[%s5442_s21 + $0x24] sm:$0xe] }
  0x77   : > { %v2263_v47 = vpack.c.b16 %v2232_v39, %v2231_v34  ;;  %v1892_v59 = vrot.slane %v1890_v50, 5  ;;  %v1188_v0 = vrot.slane %v5565_v5, 5  ;;  %v1895_v1 = vshrl.u32 %v4764_v57, 16  ;;  %v4767_v34 = vld [vmem:[%s5442_s21 + $0x30] sm:$0xf] }
  0x78   : > { %v1878_v56 = vrot.slane %v1877_v36, 4  ;;  %v1888_v58 = vrot.slane %v1887_v49, 4  ;;  %v1318_v61 = vpack.c.b16 %v1288_v54, %v1287_v53  ;;  %v1898_v10 = vshll.u32 %v4764_v57, 16  ;;  %v4768_v39 = vld [vmem:[%s5442_s21 + $0x34] sm:$0xf]  ;;  %v5117_v36 = vld [vmem:[%s5442_s21 + $0x24] sm:$0xff] }
  0x79   : > { %v1904_v2 = vshll.u32 %v4765_v60, 16  ;;  %v1908_v3 = vshrl.u32 %v4765_v60, 16  ;;  %v4616_v7 = vrot.slane %v1123_v63, 9  ;;  %v1190_v12 = vrot.slane %v1188_v0, 4 }
  0x7a   : > { %v1883_v52 = vsel %vm5461_vm4, %v1878_v56, %v1882_v42  ;;  %v1893_v6 = vsel %vm5461_vm4, %v1888_v58, %v1892_v59  ;;  %v1191_v5 = vrot.slane %v5571_v8, 5  ;;  %v1897_v13 = vrot.slane %v1895_v1, 4  ;;  %v4769_v59 = vld [vmem:[%s5442_s21 + $0x38] sm:$0x1] }
  0x7b   : > { %4742 = vmatmul.msk.bf16.vlgmr.msrb.gmra.mxu3 %vm759_vm3, %v5115_v29  ;;  %v2233_v11 = vunpack.c.l.b16 %v1883_v52  ;;  %v2234_v14 = vunpack.c.l.b16 %v1893_v6  ;;  %v1900_v15 = vrot.slane %v1898_v10, 5  ;;  %v1906_v16 = vrot.slane %v1904_v2, 5  ;;  %v4771_v6 = vld [vmem:[%s5442_s21 + $0x40] sm:$0xf] }
  0x7c   : > { %v1910_v17 = vrot.slane %v1908_v3, 4  ;;  %v1189_v19 = vsel %vm5636_vm7, %v4616_v7, %v1188_v0  ;;  %v1192_v20 = vsel %vm5636_vm7, %v1190_v12, %v1191_v5  ;;  %v1914_v8 = vshll.u32 %v4766_v18, 16  ;;  %v4770_v3 = vld [vmem:[%s5442_s21 + $0x3c] sm:$0xf]  ;;  %v5211_v5 = vld [vmem:[%s5442_s21 + $0x34] sm:$0xf] }
  0x7d   : > { %v2264_v21 = vpack.c.b16 %v2234_v14, %v2233_v11  ;;  %v1901_v23 = vor.u32 %v1900_v15, %v1897_v13  ;;  %v1289_v35 = vunpack.c.l.b16 %v1189_v19  ;;  %v1290_v26 = vunpack.c.l.b16 %v1192_v20  ;;  %v1125_v14 = vld [vmem:[%s5442_s21 + $0x30] sm:$0xe] }
  0x7e   : > { %v1911_v24 = vor.u32 %v1910_v17, %v1906_v16  ;;  %v1916_v31 = vrot.slane %v1914_v8, 5  ;;  %v1195_v40 = vrot.slane %v5613_v46, 5  ;;  %v1919_v4 = vshrl.u32 %v4767_v34, 16  ;;  %v5212_v8 = vld [vmem:[%s5442_s21 + $0x38] sm:$0x1] }
  0x7f   : > { %v1902_v29 = vrot.slane %v1901_v23, 4  ;;  %v1319_v33 = vpack.c.b16 %v1290_v26, %v1289_v35  ;;  %v1922_v44 = vshll.u32 %v4767_v34, 16  ;;  %v1928_v45 = vshll.u32 %v4768_v39, 16  ;;  %v5118_v35 = vld [vmem:[%s5442_s21 + $0x30] sm:$0xff] }
  0x80   : > { %4806 = vmatmul.msk.bf16.vlgmr.msrb.gmra.mxu0 %vm759_vm3, %v2263_v47  ;;  %v1912_v30 = vrot.slane %v1911_v24, 4  ;;  %v1932_v47 = vshrl.u32 %v4768_v39, 16  ;;  %v1197_v49 = vrot.slane %v1195_v40, 4  ;;  %v1198_v46 = vrot.slane %v5616_v51, 5  ;;  %v5102_v51 = vld [vmem:[%s5442_s21 + $0x24] sm:$0xff] }
  0x81   : > { %v1907_v41 = vsel %vm5461_vm4, %v1902_v29, %v1906_v16  ;;  %v1921_v54 = vrot.slane %v1919_v4, 4  ;;  %v1924_v56 = vrot.slane %v1922_v44, 5  ;;  %v1930_v57 = vrot.slane %v1928_v45, 5  ;;  %v4772_v39 = vld [vmem:[%s5442_s21 + $0x44] sm:$0x1]  ;;  %v5103_v45 = vld [vmem:[%s5442_s21 + $0x30] sm:$0xff] }
  0x82   : > { %4599 = vmatmul.msk.bf16.gmra.mxu1 %vm759_vm3, %v5100_v48  ;;  %v1917_v42 = vsel %vm5461_vm4, %v1912_v30, %v1916_v31  ;;  %v4617_v48 = vrot.slane %v1124_v43, 9  ;;  %v2235_v50 = vunpack.c.l.b16 %v1907_v41  ;;  %v1934_v58 = vrot.slane %v1932_v47, 4 }
  0x83   : > { %v2236_v53 = vunpack.c.l.b16 %v1917_v42  ;;  %v1925_v0 = vor.u32 %v1924_v56, %v1921_v54  ;;  %v1938_v52 = vshll.u32 %v4769_v59, 16  ;;  %v1202_v13 = vrot.slane %v5211_v5, 5  ;;  %v4773_v54 = vld [vmem:[%s5442_s21 + $0x48] sm:$0xf]  ;;  %v4774_v56 = vld [vmem:[%s5442_s21 + $0x4c] sm:$0xf] }
  0x84   : > { %v1196_v60 = vsel %vm5636_vm7, %v4617_v48, %v1195_v40  ;;  %v1935_v1 = vor.u32 %v1934_v58, %v1930_v57  ;;  %v1943_v15 = vshrl.u32 %v4770_v3, 16  ;;  %v1946_v16 = vshll.u32 %v4770_v3, 16  ;;  %v5119_v3 = vld [vmem:[%s5442_s21 + $0x3c] sm:$0xff] }
  0x85   : > { %v2265_v63 = vpack.c.b16 %v2236_v53, %v2235_v50  ;;  %v1291_v10 = vunpack.c.l.b16 %v1196_v60  ;;  %v1926_v7 = vrot.slane %v1925_v0, 4  ;;  %v1940_v11 = vrot.slane %v1938_v52, 5 }
  0x86   : > { %4631 = vmatmul.msk.bf16.gmra.mxu2 %vm759_vm3, %v1318_v61  ;;  %v1199_v61 = vsel %vm5636_vm7, %v1197_v49, %v1198_v46  ;;  %v1952_v17 = vshll.u32 %v4771_v6, 16  ;;  %v1956_v18 = vshrl.u32 %v4771_v6, 16  ;;  %v4618_v23 = vrot.slane %v1125_v14, 9 }
  0x87   : > { %v1292_v2 = vunpack.c.l.b16 %v1199_v61  ;;  %v1931_v20 = vsel %vm5461_vm4, %v1926_v7, %v1930_v57  ;;  %v1204_v24 = vrot.slane %v1202_v13, 4  ;;  %v1945_v26 = vrot.slane %v1943_v15, 4 }
  0x88   : > { %v1948_v29 = vrot.slane %v1946_v16, 5  ;;  %v1954_v30 = vrot.slane %v1952_v17, 5  ;;  %v1958_v31 = vrot.slane %v1956_v18, 4  ;;  %v1203_v40 = vsel %vm5636_vm7, %v4618_v23, %v1202_v13  ;;  %v4775_v16 = vld [vmem:[%s5442_s21 + $0x50] sm:$0x1] }
  0x89   : > { %v1320_v12 = vpack.c.b16 %v1292_v2, %v1291_v10  ;;  %v1962_v4 = vshll.u32 %v4772_v39, 16  ;;  %v1293_v47 = vunpack.c.l.b16 %v1203_v40  ;;  %v1209_v61 = vrot.slane %v5491_v28, 5  ;;  %v4776_v40 = vld [vmem:[%s5442_s21 + $0x54] sm:$0xf] }
  0x8a   : > { %v1949_v42 = vor.u32 %v1948_v29, %v1945_v26  ;;  %v1959_v43 = vor.u32 %v1958_v31, %v1954_v30  ;;  %v1967_v0 = vshrl.u32 %v4773_v54, 16  ;;  %v1976_v52 = vshll.u32 %v4774_v56, 16 }
  0x8b   : > { %4743 = vmatmul.msk.bf16.gmra.mxu3 %vm759_vm3, %v5116_v9  ;;  %v1936_v9 = vrot.slane %v1935_v1, 4  ;;  %v1964_v53 = vrot.slane %v1962_v4, 5  ;;  %v1970_v1 = vshll.u32 %v4773_v54, 16  ;;  %v1980_v10 = vshrl.u32 %v4774_v56, 16 }
  0x8c   : > { %v1950_v46 = vrot.slane %v1949_v42, 4  ;;  %v1960_v50 = vrot.slane %v1959_v43, 4  ;;  %v1969_v5 = vrot.slane %v1967_v0, 4  ;;  %v1978_v14 = vrot.slane %v1976_v52, 5 }
  0x8d   : > { %v1972_v13 = vrot.slane %v1970_v1, 5  ;;  %v1982_v15 = vrot.slane %v1980_v10, 4  ;;  %v1216_v42 = vrot.slane %v5536_v55, 5  ;;  %v1219_v55 = vrot.slane %v5540_v62, 5  ;;  %v4778_v10 = vld [vmem:[%s5442_s21 + $0x5c] sm:$0x1] }
  0x8e   : > { %v1955_v59 = vsel %vm5461_vm4, %v1950_v46, %v1954_v30  ;;  %v1965_v60 = vsel %vm5461_vm4, %v1960_v50, %v1964_v53  ;;  %v5120_v53 = vld [vmem:[%s5442_s21 + $0x48] sm:$0xff] }
  0x8f   : > { %v2239_v2 = vunpack.c.l.b16 %v1955_v59  ;;  %v2240_v6 = vunpack.c.l.b16 %v1965_v60  ;;  %v1983_v23 = vor.u32 %v1982_v15, %v1978_v14  ;;  %v1218_v56 = vrot.slane %v1216_v42, 4  ;;  %v4779_v15 = vld [vmem:[%s5442_s21 + $0x60] sm:$0xf] }
  0x90   : > { %4807 = vmatmul.msk.bf16.gmra.mxu0 %vm759_vm3, %v2264_v21  ;;  %v1941_v21 = vsel %vm5461_vm4, %v1936_v9, %v1940_v11  ;;  %v1211_v9 = vrot.slane %v1209_v61, 4  ;;  %v1212_v11 = vrot.slane %v5495_v32, 5 }
  0x91   : > { %v2238_v34 = vunpack.c.l.b16 %v1941_v21  ;;  %v1973_v21 = vor.u32 %v1972_v13, %v1969_v5  ;;  %v1984_v30 = vrot.slane %v1983_v23, 4  ;;  %v1220_v62 = vsel %vm5636_vm7, %v1218_v56, %v1219_v55  ;;  %v4781_v56 = vld [vmem:[%s5442_s21 + $0x68] sm:$0x1] }
  0x92   : > { %4600 = vmatmul.msk.bf16.gmra.mxu1 %vm759_vm3, %v5101_v25  ;;  %v1205_v25 = vrot.slane %v5212_v8, 5  ;;  %v1213_v18 = vsel %vm5636_vm7, %v1211_v9, %v1212_v11  ;;  %v5104_v8 = vld [vmem:[%s5442_s21 + $0x3c] sm:$0xff]  ;;  %v2010_v5 = vshll.u32 %v4778_v10, 16  ;;  %v5106_v10 = vld [vmem:[%s5442_s21 + $0x54] sm:$0xff] }
  0x93   : > { %v1296_v26 = vunpack.c.l.b16 %v1213_v18  ;;  %v1974_v29 = vrot.slane %v1973_v21, 4 }
  0x94   : > { %v1206_v41 = vsel %vm5636_vm7, %v1204_v24, %v1205_v25  ;;  %v1986_v24 = vshll.u32 %v4775_v16, 16  ;;  %v4780_v16 = vld [vmem:[%s5442_s21 + $0x64] sm:$0xf]  ;;  %v2012_v23 = vrot.slane %v2010_v5, 5 }
  0x95   : > { %v1979_v43 = vsel %vm5461_vm4, %v1974_v29, %v1978_v14  ;;  %v1298_v14 = vunpack.c.l.b16 %v1220_v62  ;;  %v1223_v29 = vrot.slane %v5580_v27, 5 }
  0x96   : > { %4632 = vmatmul.msk.bf16.gmra.mxu2 %vm759_vm3, %v1319_v33  ;;  %v2237_v33 = vunpack.c.l.b16 %v1931_v20  ;;  %v2267_v20 = vpack.c.b16 %v2240_v6, %v2239_v2  ;;  %v1988_v31 = vrot.slane %v1986_v24, 5 }
  0x98   : > { %v2266_v44 = vpack.c.b16 %v2238_v34, %v2237_v33  ;;  %v1989_v4 = vsel %vm5461_vm4, %v1984_v30, %v1988_v31  ;;  %v2028_v30 = vshrl.u32 %v4780_v16, 16 }
  0x99   : > { %v2242_v59 = vunpack.c.l.b16 %v1989_v4 }
  0x9b   : > { %4744 = vmatmul.msk.bf16.gmra.mxu3 %vm759_vm3, %v5117_v36  ;;  %v1294_v36 = vunpack.c.l.b16 %v1206_v41  ;;  %v4777_v41 = vld [vmem:[%s5442_s21 + $0x58] sm:$0xf] }
  0x9c   : > { %v2004_v46 = vshrl.u32 %v4777_v41, 16 }
  0x9d   : > { %v1321_v58 = vpack.c.b16 %v1294_v36, %v1293_v47  ;;  %v1994_v47 = vshll.u32 %v4776_v40, 16  ;;  %v2000_v36 = vshll.u32 %v4777_v41, 16 }
  0x9e   : > { %v2006_v1 = vrot.slane %v2004_v46, 4  ;;  %v2030_v46 = vrot.slane %v2028_v30, 4 }
  0x9f   : > { %v2002_v0 = vrot.slane %v2000_v36, 5  ;;  %v1226_v36 = vrot.slane %v5587_v37, 5 }
  0xa0   : > { %4808 = vmatmul.msk.bf16.gmra.mxu0 %vm759_vm3, %v2265_v63 }
  0xa1   : > { %v2007_v11 = vor.u32 %v2006_v1, %v2002_v0 }
  0xa2   : > { %4601 = vmatmul.msk.bf16.gmra.mxu1 %vm759_vm3, %v5102_v51  ;;  %v1126_v51 = vld [vmem:[%s5442_s21 + $0x3c] sm:$0xe] }
  0xa3   : > { %v4619_v7 = vrot.slane %v1126_v51, 9  ;;  %v1996_v51 = vrot.slane %v1994_v47, 5  ;;  %v2008_v21 = vrot.slane %v2007_v11, 4  ;;  %v1225_v47 = vrot.slane %v1223_v29, 4 }
  0xa5   : > { %v1210_v17 = vsel %vm5636_vm7, %v4619_v7, %v1209_v61  ;;  %v5105_v7 = vld [vmem:[%s5442_s21 + $0x48] sm:$0xff]  ;;  %v2013_v41 = vsel %vm5461_vm4, %v2008_v21, %v2012_v23  ;;  %v5213_v23 = vld [vmem:[%s5442_s21 + $0x64] sm:$0xf] }
  0xa6   : > { %v5731_v19 = vpop.f32.mrf.mxu1  ;;  %4633 = vmatmul.msk.bf16.gmra.mxu2 %vm759_vm3, %v1320_v12 }
  0xab   : > { %4745 = vmatmul.msk.bf16.gmra.mxu3 %vm759_vm3, %v5118_v35  ;;  %v1295_v35 = vunpack.c.l.b16 %v1210_v17 }
  0xad   : > { %v1322_v34 = vpack.c.b16 %v1296_v26, %v1295_v35  ;;  %v2018_v35 = vshll.u32 %v4779_v15, 16  ;;  %v2024_v26 = vshll.u32 %v4780_v16, 16 }
  0xae   : > { %v5749_v49 = vpop.f32.mrf.mxu1 }
  0xaf   : > { %v2020_v4 = vrot.slane %v2018_v35, 5  ;;  %v1129_v35 = vld [vmem:[%s5442_s21 + $0x60] sm:$0xe] }
  0xb0   : > { %v5747_v48 = vpop.f32.mrf.mxu2  ;;  %4809 = vmatmul.msk.bf16.gmra.mxu0 %vm759_vm3, %v2266_v44  ;;  %v1127_v44 = vld [vmem:[%s5442_s21 + $0x48] sm:$0xe] }
  0xb1   : > { %v4620_v54 = vrot.slane %v1127_v44, 9  ;;  %v2026_v44 = vrot.slane %v2024_v26, 5 }
  0xb2   : > { %4602 = vmatmul.msk.bf16.gmra.mxu1 %vm759_vm3, %v5103_v45  ;;  %v1991_v45 = vshrl.u32 %v4776_v40, 16 }
  0xb3   : > { %v1217_v2 = vsel %vm5636_vm7, %v4620_v54, %v1216_v42  ;;  %v2244_v54 = vunpack.c.l.b16 %v2013_v41  ;;  %v2031_v37 = vor.u32 %v2030_v46, %v2026_v44 }
  0xb4   : > { %v5755_v57 = vpop.f32.mrf.mxu0  ;;  %v5762_v63 = vpop.f32.mrf.mxu3  ;;  %v1993_v61 = vrot.slane %v1991_v45, 4  ;;  %v1297_v13 = vunpack.c.l.b16 %v1217_v2  ;;  %v5121_v45 = vld [vmem:[%s5442_s21 + $0x54] sm:$0xff] }
  0xb5   : > { %v2032_v11 = vrot.slane %v2031_v37, 4 }
  0xb6   : > { %4634 = vmatmul.msk.bf16.gmra.mxu2 %vm759_vm3, %v1321_v58  ;;  %v2241_v58 = vunpack.c.l.b16 %v1979_v43  ;;  %v1997_v9 = vor.u32 %v1996_v51, %v1993_v61  ;;  %v1323_v24 = vpack.c.b16 %v1298_v14, %v1297_v13  ;;  %v1227_v51 = vsel %vm5636_vm7, %v1225_v47, %v1226_v36  ;;  %v4782_v13 = vld [vmem:[%s5442_s21 + $0x6c] sm:$0xf]  ;;  %v4783_v14 = vld [vmem:[%s5442_s21 + $0x70] sm:$0xf] }
  0xb7   : > { %v2039_v26 = vshrl.u32 %v4782_v13, 16  ;;  %v2048_v30 = vshll.u32 %v4783_v14, 16 }
  0xb8   : > { %v5768_v12 = vpop.f32.mrf.mxu2 }
  0xb9   : > { %v5770_v28 = vpop.f32.mrf.mxu1  ;;  %v2041_v36 = vrot.slane %v2039_v26, 4  ;;  %v4786_v26 = vld [vmem:[%s5442_s21 + $0x7c] sm:$0xf] }
  0xbb   : > { %4746 = vmatmul.msk.bf16.gmra.mxu3 %vm759_vm3, %v5119_v3  ;;  %v2268_v3 = vpack.c.b16 %v2242_v59, %v2241_v58 }
  0xbc   : > { %v5778_v32 = vpop.f32.mrf.mxu0  ;;  %v5781_v25 = vpop.f32.mrf.mxu3 }
  0xc0   : > { %4810 = vmatmul.msk.bf16.gmra.mxu0 %vm759_vm3, %v2267_v20  ;;  %v1998_v20 = vrot.slane %v1997_v9, 4 }
  0xc1   : > { %v5784_v33 = vpop.f32.mrf.mxu1 }
  0xc2   : > { %4603 = vmatmul.msk.bf16.gmra.mxu1 %vm759_vm3, %v5104_v8  ;;  %v2015_v8 = vshrl.u32 %v4779_v15, 16  ;;  %v2003_v40 = vsel %vm5461_vm4, %v1998_v20, %v2002_v0  ;;  %v2034_v0 = vshll.u32 %v4781_v56, 16 }
  0xc3   : > { %v5787_v39 = vpop.f32.mrf.mxu2 }
  0xc4   : > { %v2017_v43 = vrot.slane %v2015_v8, 4  ;;  %v2036_v5 = vrot.slane %v2034_v0, 5 }
  0xc6   : > { %4635 = vmatmul.msk.bf16.gmra.mxu2 %vm759_vm3, %v1322_v34  ;;  %v1128_v34 = vld [vmem:[%s5442_s21 + $0x54] sm:$0xe]  ;;  %v2021_v59 = vor.u32 %v2020_v4, %v2017_v43  ;;  %v2037_v21 = vsel %vm5461_vm4, %v2032_v11, %v2036_v5  ;;  %v5122_v4 = vld [vmem:[%s5442_s21 + $0x60] sm:$0xff] }
  0xc7   : > { %v5797_v50 = vpop.f32.mrf.mxu0  ;;  %v4621_v27 = vrot.slane %v1128_v34, 9  ;;  %v2052_v34 = vshrl.u32 %v4783_v14, 16 }
  0xc8   : > { %v2022_v9 = vrot.slane %v2021_v59, 4  ;;  %v4784_v59 = vld [vmem:[%s5442_s21 + $0x74] sm:$0x1] }
  0xc9   : > { %v5802_v60 = vpop.f32.mrf.mxu3  ;;  %v1224_v61 = vsel %vm5636_vm7, %v4621_v27, %v1223_v29  ;;  %v2042_v29 = vshll.u32 %v4782_v13, 16  ;;  %v4622_v27 = vrot.slane %v1129_v35, 9  ;;  %v4785_v35 = vld [vmem:[%s5442_s21 + $0x78] sm:$0xf] }
  0xca   : > { %v1299_v62 = vunpack.c.l.b16 %v1224_v61  ;;  %v2027_v20 = vsel %vm5461_vm4, %v2022_v9, %v2026_v44 }
  0xcb   : > { %v5804_v52 = vpop.f32.mrf.mxu1  ;;  %4747 = vmatmul.msk.bf16.gmra.mxu3 %vm759_vm3, %v5120_v53  ;;  %v5812_v6 = vpop.f32.mrf.mxu2  ;;  %v2243_v53 = vunpack.c.l.b16 %v2003_v40  ;;  %v5214_v40 = vld [vmem:[%s5442_s21 + $0x68] sm:$0x1]  ;;  %v2245_v44 = vunpack.c.l.b16 %v2027_v20  ;;  %v2044_v46 = vrot.slane %v2042_v29, 5  ;;  %v5215_v29 = vld [vmem:[%s5442_s21 + $0x70] sm:$0xf] }
  0xcc   : > { %v1233_v41 = vrot.slane %v5214_v40, 5  ;;  %v1130_v40 = vld [vmem:[%s5442_s21 + $0x6c] sm:$0xe] }
  0xcd   : > { %v2269_v1 = vpack.c.b16 %v2244_v54, %v2243_v53  ;;  %v2050_v53 = vrot.slane %v2048_v30, 5  ;;  %v2054_v54 = vrot.slane %v2052_v34, 4  ;;  %v2045_v0 = vor.u32 %v2044_v46, %v2041_v36  ;;  %v5216_v46 = vld [vmem:[%s5442_s21 + $0x74] sm:$0x1] }
  0xce   : > { %v1237_v30 = vrot.slane %v5215_v29, 5 }
  0xcf   : > { %v5818_v17 = vpop.f32.mrf.mxu0 }
  0xd0   : > { %4811 = vmatmul.msk.bf16.gmra.mxu0 %vm759_vm3, %v2268_v3  ;;  %v1300_v3 = vunpack.c.l.b16 %v1227_v51 }
  0xd1   : > { %v5820_v18 = vpop.f32.mrf.mxu3 }
  0xd2   : > { %4604 = vmatmul.msk.bf16.gmra.mxu1 %vm759_vm3, %v5105_v7  ;;  %v1324_v15 = vpack.c.b16 %v1300_v3, %v1299_v62  ;;  %v5107_v3 = vld [vmem:[%s5442_s21 + $0x60] sm:$0xff] }
  0xd3   : > { %v5824_v31 = vpop.f32.mrf.mxu1 }
  0xd6   : > { %4636 = vmatmul.msk.bf16.gmra.mxu2 %vm759_vm3, %v1323_v24  ;;  %v1230_v24 = vrot.slane %v5213_v23, 5 }
  0xd7   : > { %v5832_v42 = vpop.f32.mrf.mxu2 }
  0xd8   : > { %v1232_v47 = vrot.slane %v1230_v24, 4  ;;  %v1231_v61 = vsel %vm5636_vm7, %v4622_v27, %v1230_v24  ;;  %v2076_v27 = vshrl.u32 %v4786_v26, 16 }
  0xd9   : > { %v1301_v5 = vunpack.c.l.b16 %v1231_v61  ;;  %v4623_v61 = vrot.slane %v1130_v40, 9 }
  0xda   : > { %v5837_v55 = vpop.f32.mrf.mxu0  ;;  %v1234_v51 = vsel %vm5636_vm7, %v1232_v47, %v1233_v41 }
  0xdb   : > { %v5839_v58 = vpop.f32.mrf.mxu3  ;;  %4748 = vmatmul.msk.bf16.gmra.mxu3 %vm759_vm3, %v5121_v45  ;;  %v2246_v45 = vunpack.c.l.b16 %v2037_v21  ;;  %v1302_v13 = vunpack.c.l.b16 %v1234_v51  ;;  %v1239_v51 = vrot.slane %v1237_v30, 4 }
  0xdd   : > { %v2270_v37 = vpack.c.b16 %v2246_v45, %v2245_v44  ;;  %v1325_v24 = vpack.c.b16 %v1302_v13, %v1301_v5  ;;  %v2066_v44 = vshll.u32 %v4785_v35, 16  ;;  %v2072_v45 = vshll.u32 %v4786_v26, 16 }
  0xde   : > { %v2078_v5 = vrot.slane %v2076_v27, 4 }
  0xdf   : > { %v5847_v2 = vpop.f32.mrf.mxu1  ;;  %v5849_v7 = vpop.f32.mrf.mxu2 }
  0xe0   : > { %4812 = vmatmul.msk.bf16.gmra.mxu0 %vm759_vm3, %v2269_v1  ;;  %v2055_v1 = vor.u32 %v2054_v54, %v2050_v53  ;;  %v1240_v54 = vrot.slane %v5216_v46, 5 }
  0xe2   : > { %4605 = vmatmul.msk.bf16.gmra.mxu1 %vm759_vm3, %v5106_v10  ;;  %v5855_v16 = vpop.f32.mrf.mxu0  ;;  %v2058_v10 = vshll.u32 %v4784_v59, 16  ;;  %v2056_v20 = vrot.slane %v2055_v1, 4  ;;  %v5123_v59 = vld [vmem:[%s5442_s21 + $0x6c] sm:$0xff] }
  0xe3   : > { %v5862_v8 = vpop.f32.mrf.mxu3 }
  0xe4   : > { %v2060_v21 = vrot.slane %v2058_v10, 5 }
  0xe6   : > { %4637 = vmatmul.msk.bf16.gmra.mxu2 %vm759_vm3, %v1324_v15  ;;  %v2046_v15 = vrot.slane %v2045_v0, 4 }
  0xe7   : > { %v5867_v43 = vpop.f32.mrf.mxu1 }
  0xe8   : > { %v2051_v34 = vsel %vm5461_vm4, %v2046_v15, %v2050_v53  ;;  %v4787_v15 = vld [vmem:[%s5442_s21 + $0x80] sm:$0x1] }
  0xe9   : > { %v5870_v56 = vpop.f32.mrf.mxu2 }
  0xeb   : > { %4749 = vmatmul.msk.bf16.gmra.mxu3 %vm759_vm3, %v5122_v4  ;;  %v2063_v4 = vshrl.u32 %v4785_v35, 16  ;;  %v5108_v35 = vld [vmem:[%s5442_s21 + $0x6c] sm:$0xff] }
  0xed   : > { %v5878_v62 = vpop.f32.mrf.mxu0  ;;  %v2065_v10 = vrot.slane %v2063_v4, 4 }
  0xee   : > { %v5881_v9 = vpop.f32.mrf.mxu3 }
  0xef   : > { %v1041_v11 = vpop.f32.mrf.mxu1 }
  0xf0   : > { %v1042_v14 = vadd.f32 %v1041_v11, %v5755_v57  ;;  %4813 = vmatmul.msk.bf16.gmra.mxu0 %vm759_vm3, %v2270_v37  ;;  %v2061_v57 = vsel %vm5461_vm4, %v2056_v20, %v2060_v21  ;;  %v2247_v37 = vunpack.c.l.b16 %v2051_v34  ;;  %v2074_v11 = vrot.slane %v2072_v45, 5 }
  0xf1   : > { %v5885_v23 = vpop.f32.mrf.mxu2  ;;  %v2248_v0 = vunpack.c.l.b16 %v2061_v57  ;;  %v1238_v20 = vsel %vm5636_vm7, %v4623_v61, %v1237_v30  ;;  %v2082_v34 = vshll.u32 %v4787_v15, 16 }
  0xf2   : > { %4606 = vmatmul.msk.bf16.gmra.mxu1 %vm759_vm3, %v5107_v3  ;;  %v2068_v3 = vrot.slane %v2066_v44, 5  ;;  %v2079_v29 = vor.u32 %v2078_v5, %v2074_v11 }
  0xf3   : > { %v2271_v21 = vpack.c.b16 %v2248_v0, %v2247_v37  ;;  %v2084_v46 = vrot.slane %v2082_v34, 5  ;;  %v4789_v37 = vld [vmem:[%s5442_s21 + $0x88] sm:$0xf]  ;;  %v5217_v0 = vld [vmem:[%s5442_s21 + $0x7c] sm:$0xf] }
  0xf4   : > { %v2069_v26 = vor.u32 %v2068_v3, %v2065_v10  ;;  %v1131_v10 = vld [vmem:[%s5442_s21 + $0x78] sm:$0xe] }
  0xf5   : > { %v5896_v41 = vpop.f32.mrf.mxu0 }
  0xf6   : > { %v5898_v47 = vpop.f32.mrf.mxu3  ;;  %4638 = vmatmul.msk.bf16.gmra.mxu2 %vm759_vm3, %v1325_v24  ;;  %v2070_v27 = vrot.slane %v2069_v26, 4 }
  0xf7   : > { %v1043_v36 = vpop.f32.mrf.mxu1 }
  0xf8   : > { %v1044_v53 = vadd.f32 %v1043_v36, %v5778_v32  ;;  %v1241_v32 = vsel %vm5636_vm7, %v1239_v51, %v1240_v54  ;;  %v2080_v36 = vrot.slane %v2079_v29, 4  ;;  %v4788_v54 = vld [vmem:[%s5442_s21 + $0x84] sm:$0xf]  ;;  %v5124_v29 = vld [vmem:[%s5442_s21 + $0x78] sm:$0xff] }
  0xf9   : > { %v1393_v1 = vpop.f32.mrf.mxu2  ;;  %v1304_v4 = vunpack.c.l.b16 %v1241_v32  ;;  %v2090_v3 = vshll.u32 %v4788_v54, 16  ;;  %v2100_v32 = vshrl.u32 %v4789_v37, 16 }
  0xfa   : > { %v1473_v13 = vadd.f32 %v1393_v1, %v1042_v14  ;;  %v1303_v14 = vunpack.c.l.b16 %v1238_v20  ;;  %v1244_v1 = vrot.slane %v5217_v0, 5  ;;  %v2085_v15 = vsel %vm5461_vm4, %v2080_v36, %v2084_v46 }
  0xfb   : > { %4750 = vmatmul.msk.bf16.gmra.mxu3 %vm759_vm3, %v5123_v59  ;;  %v2096_v20 = vshll.u32 %v4789_v37, 16  ;;  %v2102_v36 = vrot.slane %v2100_v32, 4 }
  0xfc   : > { %v1326_v51 = vpack.c.b16 %v1304_v4, %v1303_v14 }
  0xfd   : > { %v2339_v24 = vpop.f32.mrf.mxu0 }
  0xfe   : > { %v1686_v57 = vpop.f32.mrf.mxu3 }
  0xff   : > { %v1046_v40 = vpop.f32.mrf.mxu1  ;;  %v1766_v44 = vadd.f32 %v1686_v57, %v1473_v13  ;;  %v2075_v13 = vsel %vm5461_vm4, %v2070_v27, %v2074_v11  ;;  %v4624_v57 = vrot.slane %v1131_v10, 9  ;;  %v2250_v11 = vunpack.c.l.b16 %v2085_v15 }
 0x100   : > { %v1047_v30 = vadd.f32 %v1046_v40, %v5797_v50  ;;  %4814 = vmatmul.msk.bf16.gmra.mxu0 %vm759_vm3, %v2271_v21  ;;  %v2087_v50 = vshrl.u32 %v4788_v54, 16  ;;  %v5218_v21 = vld [vmem:[%s5442_s21 + $0x80] sm:$0x1]  ;;  %v1246_v40 = vrot.slane %v1244_v1, 4  ;;  %v2249_v14 = vunpack.c.l.b16 %v2075_v13 }
 0x101   : > { %v1395_v45 = vpop.f32.mrf.mxu2  ;;  %v5915_v59 = vadd.f32 %v2339_v24, %v1766_v44  ;;  %v1247_v24 = vrot.slane %v5218_v21, 5  ;;  %v2092_v44 = vrot.slane %v2090_v3, 5  ;;  %v2098_v27 = vrot.slane %v2096_v20, 5 }
 0x102   : > { %4607 = vmatmul.msk.bf16.gmra.mxu1 %vm759_vm3, %v5108_v35  ;;  %v1474_v61 = vadd.f32 %v1395_v45, %v1044_v53  ;;  %v2089_v4 = vrot.slane %v2087_v50, 4  ;;  %v2272_v37 = vpack.c.b16 %v2250_v11, %v2249_v14  ;;  %v5109_v50 = vld [vmem:[%s5442_s21 + $0x78] sm:$0xff]  ;;  %v4792_v14 = vld [vmem:[%s5442_s21 + $0x94] sm:$0xf]  ;;  %v5219_v11 = vld [vmem:[%s5442_s21 + $0x88] sm:$0xf] }
 0x103   : > { %v2103_v3 = vor.u32 %v2102_v36, %v2098_v27 }
 0x104   : > { %v2093_v0 = vor.u32 %v2092_v44, %v2089_v4  ;;  %v1251_v4 = vrot.slane %v5219_v11, 5  ;;  %v1132_v44 = vld [vmem:[%s5442_s21 + $0x84] sm:$0xe] }
 0x105   : > { %v2341_v5 = vpop.f32.mrf.mxu0 }
 0x106   : > { %v1688_v53 = vpop.f32.mrf.mxu3  ;;  %4639 = vmatmul.msk.bf16.gmra.mxu2 %vm759_vm3, %v1326_v51  ;;  %v4790_v51 = vld [vmem:[%s5442_s21 + $0x8c] sm:$0x1]  ;;  %v2094_v21 = vrot.slane %v2093_v0, 4 }
 0x107   : > { %v1048_v35 = vpop.f32.mrf.mxu1  ;;  %v1767_v26 = vadd.f32 %v1688_v53, %v1474_v61  ;;  %v1245_v61 = vsel %vm5636_vm7, %v4624_v57, %v1244_v1  ;;  %v2106_v13 = vshll.u32 %v4790_v51, 16  ;;  %v2104_v53 = vrot.slane %v2103_v3, 4  ;;  %v5125_v3 = vld [vmem:[%s5442_s21 + $0x84] sm:$0xff] }
 0x108   : > { %v1049_v34 = vadd.f32 %v1048_v35, %v5818_v17  ;;  %v1248_v17 = vsel %vm5636_vm7, %v1246_v40, %v1247_v24 }
 0x109   : > { %v1398_v45 = vpop.f32.mrf.mxu2  ;;  %v5928_v46 = vadd.f32 %v2341_v5, %v1767_v26  ;;  %v1306_v20 = vunpack.c.l.b16 %v1248_v17  ;;  %v2108_v35 = vrot.slane %v2106_v13, 5  ;;  %v4791_v26 = vld [vmem:[%s5442_s21 + $0x90] sm:$0xf]  ;;  %v2124_v17 = vshrl.u32 %v4792_v14, 16 }
 0x10a   : > { %v1475_v54 = vadd.f32 %v1398_v45, %v1047_v30  ;;  %v1305_v30 = vunpack.c.l.b16 %v1245_v61  ;;  %v2111_v45 = vshrl.u32 %v4791_v26, 16  ;;  %v2114_v51 = vshll.u32 %v4791_v26, 16 }
 0x10b   : > { %4751 = vmatmul.msk.bf16.gmra.mxu3 %vm759_vm3, %v5124_v29  ;;  %v2120_v61 = vshll.u32 %v4792_v14, 16  ;;  %v4625_v13 = vrot.slane %v1132_v44, 9 }
 0x10c   : > { %v1327_v40 = vpack.c.b16 %v1306_v20, %v1305_v30  ;;  %v2113_v20 = vrot.slane %v2111_v45, 4 }
 0x10d   : > { %v2344_v10 = vpop.f32.mrf.mxu0 }
 0x10e   : > { %v1691_v15 = vpop.f32.mrf.mxu3 }
 0x10f   : > { %v1051_v5 = vpop.f32.mrf.mxu1  ;;  %v1768_v32 = vadd.f32 %v1691_v15, %v1475_v54  ;;  %v2109_v54 = vsel %vm5461_vm4, %v2104_v53, %v2108_v35  ;;  %v1253_v15 = vrot.slane %v1251_v4, 4  ;;  %v2126_v53 = vrot.slane %v2124_v17, 4 }
 0x110   : > { %v1052_v1 = vadd.f32 %v1051_v5, %v5837_v55  ;;  %4815 = vmatmul.msk.bf16.gmra.mxu0 %vm759_vm3, %v2272_v37  ;;  %v2099_v55 = vsel %vm5461_vm4, %v2094_v21, %v2098_v27  ;;  %v5220_v37 = vld [vmem:[%s5442_s21 + $0x8c] sm:$0x1]  ;;  %v2252_v30 = vunpack.c.l.b16 %v2109_v54  ;;  %v2116_v21 = vrot.slane %v2114_v51, 5 }
 0x111   : > { %v1400_v24 = vpop.f32.mrf.mxu2  ;;  %v5941_v29 = vadd.f32 %v2344_v10, %v1768_v32  ;;  %v1254_v0 = vrot.slane %v5220_v37, 5  ;;  %v2251_v5 = vunpack.c.l.b16 %v2099_v55  ;;  %v5110_v55 = vld [vmem:[%s5442_s21 + $0x84] sm:$0xff] }
 0x112   : > { %4608 = vmatmul.msk.bf16.gmra.mxu1 %vm759_vm3, %v5109_v50  ;;  %v1476_v57 = vadd.f32 %v1400_v24, %v1049_v34  ;;  %v2122_v24 = vrot.slane %v2120_v61, 5  ;;  %v2117_v44 = vor.u32 %v2116_v21, %v2113_v20  ;;  %v1133_v21 = vld [vmem:[%s5442_s21 + $0x90] sm:$0xe] }
 0x113   : > { %v2273_v14 = vpack.c.b16 %v2252_v30, %v2251_v5  ;;  %v4795_v5 = vld [vmem:[%s5442_s21 + $0xa0] sm:$0xf] }
 0x114   : > { %v2127_v45 = vor.u32 %v2126_v53, %v2122_v24 }
 0x115   : > { %v2346_v36 = vpop.f32.mrf.mxu0 }
 0x116   : > { %v1693_v34 = vpop.f32.mrf.mxu3  ;;  %4640 = vmatmul.msk.bf16.gmra.mxu2 %vm759_vm3, %v1327_v40  ;;  %v4793_v40 = vld [vmem:[%s5442_s21 + $0x98] sm:$0x1] }
 0x117   : > { %v1053_v10 = vpop.f32.mrf.mxu1  ;;  %v1769_v50 = vadd.f32 %v1693_v34, %v1476_v57  ;;  %v1255_v57 = vsel %vm5636_vm7, %v1253_v15, %v1254_v0  ;;  %v2130_v54 = vshll.u32 %v4793_v40, 16  ;;  %v2118_v34 = vrot.slane %v2117_v44, 4 }
 0x118   : > { %v1054_v27 = vadd.f32 %v1053_v10, %v5855_v16  ;;  %v1252_v16 = vsel %vm5636_vm7, %v4625_v13, %v1251_v4  ;;  %v1308_v61 = vunpack.c.l.b16 %v1255_v57  ;;  %v4794_v4 = vld [vmem:[%s5442_s21 + $0x9c] sm:$0xf]  ;;  %v2128_v10 = vrot.slane %v2127_v45, 4 }
 0x119   : > { %v1403_v32 = vpop.f32.mrf.mxu2  ;;  %v5954_v35 = vadd.f32 %v2346_v36, %v1769_v50  ;;  %v2132_v50 = vrot.slane %v2130_v54, 5  ;;  %v2135_v30 = vshrl.u32 %v4794_v4, 16  ;;  %v2138_v20 = vshll.u32 %v4794_v4, 16 }
 0x11a   : > { %v1477_v26 = vadd.f32 %v1403_v32, %v1052_v1  ;;  %v1307_v1 = vunpack.c.l.b16 %v1252_v16  ;;  %v5221_v32 = vld [vmem:[%s5442_s21 + $0x94] sm:$0xf]  ;;  %v2144_v16 = vshll.u32 %v4795_v5, 16  ;;  %v2148_v57 = vshrl.u32 %v4795_v5, 16 }
 0x11b   : > { %4752 = vmatmul.msk.bf16.gmra.mxu3 %vm759_vm3, %v5125_v3  ;;  %v2133_v40 = vsel %vm5461_vm4, %v2128_v10, %v2132_v50  ;;  %v2137_v44 = vrot.slane %v2135_v30, 4  ;;  %v2140_v45 = vrot.slane %v2138_v20, 5 }
 0x11c   : > { %v1328_v15 = vpack.c.b16 %v1308_v61, %v1307_v1  ;;  %v4626_v1 = vrot.slane %v1133_v21, 9 }
 0x11d   : > { %v2349_v11 = vpop.f32.mrf.mxu0  ;;  %v2141_v5 = vor.u32 %v2140_v45, %v2137_v44  ;;  %v4798_v44 = vld [vmem:[%s5442_s21 + $0xac] sm:$0xf] }
 0x11e   : > { %v1696_v51 = vpop.f32.mrf.mxu3 }
 0x11f   : > { %v1056_v36 = vpop.f32.mrf.mxu1  ;;  %v1770_v17 = vadd.f32 %v1696_v51, %v1477_v26  ;;  %v2123_v26 = vsel %vm5461_vm4, %v2118_v34, %v2122_v24  ;;  %v5126_v51 = vld [vmem:[%s5442_s21 + $0x90] sm:$0xff]  ;;  %v2150_v34 = vrot.slane %v2148_v57, 4 }
 0x120   : > { %v1057_v37 = vadd.f32 %v1056_v36, %v5878_v62  ;;  %4816 = vmatmul.msk.bf16.gmra.mxu0 %vm759_vm3, %v2273_v14  ;;  %v1258_v62 = vrot.slane %v5221_v32, 5  ;;  %v5222_v14 = vld [vmem:[%s5442_s21 + $0x98] sm:$0x1]  ;;  %v2253_v61 = vunpack.c.l.b16 %v2123_v26  ;;  %v5111_v32 = vld [vmem:[%s5442_s21 + $0x90] sm:$0xff] }
 0x121   : > { %v1405_v0 = vpop.f32.mrf.mxu2  ;;  %v5967_v3 = vadd.f32 %v2349_v11, %v1770_v17  ;;  %v1261_v11 = vrot.slane %v5222_v14, 5  ;;  %v2254_v17 = vunpack.c.l.b16 %v2133_v40  ;;  %v2142_v14 = vrot.slane %v2141_v5, 4  ;;  %v5224_v5 = vld [vmem:[%s5442_s21 + $0xa4] sm:$0x1] }
 0x122   : > { %4609 = vmatmul.msk.bf16.gmra.mxu1 %vm759_vm3, %v5110_v55  ;;  %v1478_v13 = vadd.f32 %v1405_v0, %v1054_v27  ;;  %v1260_v24 = vrot.slane %v1258_v62, 4  ;;  %v2146_v0 = vrot.slane %v2144_v16, 5 }
 0x123   : > { %v2274_v30 = vpack.c.b16 %v2254_v17, %v2253_v61  ;;  %v5223_v61 = vld [vmem:[%s5442_s21 + $0xa0] sm:$0xf] }
 0x124   : > { %v2151_v21 = vor.u32 %v2150_v34, %v2146_v0  ;;  %v1265_v17 = vrot.slane %v5223_v61, 5  ;;  %v1134_v34 = vld [vmem:[%s5442_s21 + $0x9c] sm:$0xe] }
 0x125   : > { %v2351_v53 = vpop.f32.mrf.mxu0 }
 0x126   : > { %v1698_v27 = vpop.f32.mrf.mxu3  ;;  %4641 = vmatmul.msk.bf16.gmra.mxu2 %vm759_vm3, %v1328_v15  ;;  %v4796_v15 = vld [vmem:[%s5442_s21 + $0xa4] sm:$0x1] }
 0x127   : > { %v1058_v55 = vpop.f32.mrf.mxu1  ;;  %v1771_v54 = vadd.f32 %v1698_v27, %v1478_v13  ;;  %v1259_v13 = vsel %vm5636_vm7, %v4626_v1, %v1258_v62  ;;  %v2154_v26 = vshll.u32 %v4796_v15, 16  ;;  %v4797_v27 = vld [vmem:[%s5442_s21 + $0xa8] sm:$0xf]  ;;  %v2172_v15 = vshrl.u32 %v4798_v44, 16 }
 0x128   : > { %v1059_v36 = vadd.f32 %v1058_v55, %v5896_v41  ;;  %v1262_v41 = vsel %vm5636_vm7, %v1260_v24, %v1261_v11  ;;  %v2152_v11 = vrot.slane %v2151_v21, 4  ;;  %v2159_v1 = vshrl.u32 %v4797_v27, 16 }
 0x129   : > { %v1408_v4 = vpop.f32.mrf.mxu2  ;;  %v5980_v10 = vadd.f32 %v2351_v53, %v1771_v54  ;;  %v1310_v16 = vunpack.c.l.b16 %v1262_v41  ;;  %v2156_v55 = vrot.slane %v2154_v26, 5  ;;  %v2147_v24 = vsel %vm5461_vm4, %v2142_v14, %v2146_v0  ;;  %v5127_v26 = vld [vmem:[%s5442_s21 + $0x9c] sm:$0xff] }
 0x12a   : > { %v1479_v50 = vadd.f32 %v1408_v4, %v1057_v37  ;;  %v1309_v37 = vunpack.c.l.b16 %v1259_v13  ;;  %v2162_v4 = vshll.u32 %v4797_v27, 16  ;;  %v2161_v0 = vrot.slane %v2159_v1, 4 }
 0x12b   : > { %4753 = vmatmul.msk.bf16.gmra.mxu3 %vm759_vm3, %v5126_v51  ;;  %v2157_v41 = vsel %vm5461_vm4, %v2152_v11, %v2156_v55  ;;  %v4799_v55 = vld [vmem:[%s5442_s21 + $0xb0] sm:$0x1] }
 0x12c   : > { %v1329_v51 = vpack.c.b16 %v1310_v16, %v1309_v37  ;;  %v1267_v37 = vrot.slane %v1265_v17, 4  ;;  %v2164_v16 = vrot.slane %v2162_v4, 5  ;;  %v2256_v14 = vunpack.c.l.b16 %v2157_v41 }
 0x12d   : > { %v2354_v20 = vpop.f32.mrf.mxu0 }
 0x12e   : > { %v1701_v53 = vpop.f32.mrf.mxu3  ;;  %v2165_v1 = vor.u32 %v2164_v16, %v2161_v0 }
 0x12f   : > { %v1061_v40 = vpop.f32.mrf.mxu1  ;;  %v1772_v57 = vadd.f32 %v1701_v53, %v1479_v50  ;;  %v2168_v50 = vshll.u32 %v4798_v44, 16  ;;  %v4627_v53 = vrot.slane %v1134_v34, 9  ;;  %v5112_v34 = vld [vmem:[%s5442_s21 + $0x9c] sm:$0xff] }
 0x130   : > { %4817 = vmatmul.msk.bf16.gmra.mxu0 %vm759_vm3, %v2274_v30  ;;  %v1268_v30 = vrot.slane %v5224_v5, 5 }
 0x131   : > { %v1410_v62 = vpop.f32.mrf.mxu2  ;;  %v5993_v45 = vadd.f32 %v2354_v20, %v1772_v57  ;;  %v2255_v20 = vunpack.c.l.b16 %v2147_v24  ;;  %v1062_v57 = vadd.f32 %v1061_v40, %v5731_v19  ;;  %v2170_v27 = vrot.slane %v2168_v50, 5 }
 0x132   : > { %4610 = vmatmul.msk.bf16.gmra.mxu1 %vm759_vm3, %v5111_v32  ;;  %v1480_v54 = vadd.f32 %v1410_v62, %v1059_v36  ;;  %v2174_v62 = vrot.slane %v2172_v15, 4  ;;  %v2178_v24 = vshll.u32 %v4799_v55, 16 }
 0x133   : > { %v2275_v19 = vpack.c.b16 %v2256_v14, %v2255_v20  ;;  %v4800_v20 = vld [vmem:[%s5442_s21 + $0xb4] sm:$0xf] }
 0x134   : > { %v2175_v40 = vor.u32 %v2174_v62, %v2170_v27  ;;  %v2180_v0 = vrot.slane %v2178_v24, 5  ;;  %v2186_v55 = vshll.u32 %v4800_v20, 16 }
 0x135   : > { %v2356_v13 = vpop.f32.mrf.mxu0 }
 0x136   : > { %v1703_v36 = vpop.f32.mrf.mxu3  ;;  %4642 = vmatmul.msk.bf16.gmra.mxu2 %vm759_vm3, %v1329_v51  ;;  %v1269_v51 = vsel %vm5636_vm7, %v1267_v37, %v1268_v30  ;;  %v2176_v30 = vrot.slane %v2175_v40, 4 }
 0x137   : > { %v1063_v32 = vpop.f32.mrf.mxu1  ;;  %v1773_v21 = vadd.f32 %v1703_v36, %v1480_v54  ;;  %v1266_v54 = vsel %vm5636_vm7, %v4627_v53, %v1265_v17  ;;  %v1312_v41 = vunpack.c.l.b16 %v1269_v51  ;;  %v2166_v36 = vrot.slane %v2165_v1, 4  ;;  %v5226_v1 = vld [vmem:[%s5442_s21 + $0xb0] sm:$0x1] }
 0x138   : > { %v1064_v17 = vadd.f32 %v1063_v32, %v5749_v49  ;;  %v2183_v49 = vshrl.u32 %v4800_v20, 16  ;;  %v2181_v32 = vsel %vm5461_vm4, %v2176_v30, %v2180_v0 }
 0x139   : > { %v1413_v11 = vpop.f32.mrf.mxu2  ;;  %v6006_v44 = vadd.f32 %v2356_v13, %v1773_v21  ;;  %v1311_v13 = vunpack.c.l.b16 %v1266_v54  ;;  %v2171_v62 = vsel %vm5461_vm4, %v2166_v36, %v2170_v27 }
 0x13a   : > { %v1481_v61 = vadd.f32 %v1413_v11, %v1062_v57  ;;  %v5225_v57 = vld [vmem:[%s5442_s21 + $0xac] sm:$0xf]  ;;  %v1135_v11 = vld [vmem:[%s5442_s21 + $0xa8] sm:$0xe] }
 0x13b   : > { %4754 = vmatmul.msk.bf16.gmra.mxu3 %vm759_vm3, %v5127_v26  ;;  %v4801_v26 = vld [vmem:[%s5442_s21 + $0xb8] sm:$0xf]  ;;  %v1330_v16 = vpack.c.b16 %v1312_v41, %v1311_v13  ;;  %v1272_v14 = vrot.slane %v5225_v57, 5  ;;  %v2257_v13 = vunpack.c.l.b16 %v2171_v62  ;;  %v2258_v41 = vunpack.c.l.b16 %v2181_v32  ;;  %v4802_v57 = vld [vmem:[%s5442_s21 + $0xbc] sm:$0x1] }
 0x13c   : > { %v2196_v54 = vshrl.u32 %v4801_v26, 16 }
 0x13d   : > { %v2359_v4 = vpop.f32.mrf.mxu0 }
 0x13e   : > { %v1706_v50 = vpop.f32.mrf.mxu3  ;;  %v2198_v0 = vrot.slane %v2196_v54, 4 }
 0x13f   : > { %v1066_v15 = vpop.f32.mrf.mxu1  ;;  %v1774_v5 = vadd.f32 %v1706_v50, %v1481_v61  ;;  %v2192_v61 = vshll.u32 %v4801_v26, 16  ;;  %v5128_v50 = vld [vmem:[%s5442_s21 + $0xa8] sm:$0xff] }
 0x140   : > { %4818 = vmatmul.msk.bf16.gmra.mxu0 %vm759_vm3, %v2275_v19  ;;  %v1275_v19 = vrot.slane %v5226_v1, 5  ;;  %v1067_v36 = vadd.f32 %v1066_v15, %v5770_v28  ;;  %v2276_v28 = vpack.c.b16 %v2258_v41, %v2257_v13 }
 0x141   : > { %v1415_v21 = vpop.f32.mrf.mxu2  ;;  %v6019_v53 = vadd.f32 %v2359_v4, %v1774_v5  ;;  %v4628_v4 = vrot.slane %v1135_v11, 9  ;;  %v2185_v5 = vrot.slane %v2183_v49, 4  ;;  %v6031_v30 = vrot.slane %v2192_v61, 5  ;;  %v5113_v49 = vld [vmem:[%s5442_s21 + $0xa8] sm:$0xff] }
 0x142   : > { %4611 = vmatmul.msk.bf16.gmra.mxu1 %vm759_vm3, %v5112_v34  ;;  %v1482_v37 = vadd.f32 %v1415_v21, %v1064_v17  ;;  %v1274_v34 = vrot.slane %v1272_v14, 4  ;;  %v2188_v17 = vrot.slane %v2186_v55, 5  ;;  %v2202_v61 = vshll.u32 %v4802_v57, 16 }
 0x143   : > { %v2199_v62 = vor.u32 %v2198_v0, %v6031_v30 }
 0x144   : > { %v2189_v15 = vor.u32 %v2188_v17, %v2185_v5  ;;  %v2204_v5 = vrot.slane %v2202_v61, 5 }
 0x145   : > { %v2361_v51 = vpop.f32.mrf.mxu0 }
 0x146   : > { %v1708_v40 = vpop.f32.mrf.mxu3  ;;  %4643 = vmatmul.msk.bf16.gmra.mxu2 %vm759_vm3, %v1330_v16  ;;  %v1273_v16 = vsel %vm5636_vm7, %v4628_v4, %v1272_v14  ;;  %v4803_v14 = vld [vmem:[%s5442_s21 + $0xc0] sm:$0xf]  ;;  %v5227_v4 = vld [vmem:[%s5442_s21 + $0x10] sm:$0xf] }
 0x147   : > { %v1068_v24 = vpop.f32.mrf.mxu1  ;;  %v1775_v27 = vadd.f32 %v1708_v40, %v1482_v37  ;;  %v1276_v37 = vsel %vm5636_vm7, %v1274_v34, %v1275_v19  ;;  %v1313_v32 = vunpack.c.l.b16 %v1273_v16  ;;  %v4804_v40 = vld [vmem:[%s5442_s21 + $0xc4] sm:$0xf]  ;;  %v2517_v19 = vrot.slane %v5227_v4, 5 }
 0x148   : > { %v1314_v55 = vunpack.c.l.b16 %v1276_v37  ;;  %v1069_v34 = vadd.f32 %v1068_v24, %v5784_v33  ;;  %v2210_v17 = vshll.u32 %v4803_v14, 16  ;;  %v5228_v37 = vld [vmem:[%s5442_s21 + $0xb8] sm:$0xf]  ;;  %v1136_v24 = vld [vmem:[%s5442_s21 + $0xb4] sm:$0xe] }
 0x149   : > { %v1418_v20 = vpop.f32.mrf.mxu2  ;;  %v6033_v21 = vadd.f32 %v2361_v51, %v1775_v27  ;;  %v2190_v27 = vrot.slane %v2189_v15, 4  ;;  %v1279_v57 = vrot.slane %v5228_v37, 5  ;;  %v2519_v15 = vrot.slane %v2517_v19, 4  ;;  %v5129_v37 = vld [vmem:[%s5442_s21 + $0xb4] sm:$0xff] }
 0x14a   : > { %v1483_v26 = vadd.f32 %v1418_v20, %v1067_v36  ;;  %v1331_v41 = vpack.c.b16 %v1314_v55, %v1313_v32  ;;  %v2207_v36 = vshrl.u32 %v4803_v14, 16  ;;  %v2216_v20 = vshll.u32 %v4804_v40, 16 }
 0x14b   : > { %4755 = vmatmul.msk.bf16.gmra.mxu3 %vm759_vm3, %v5128_v50  ;;  %v2200_v50 = vrot.slane %v2199_v62, 4  ;;  %v5230_v62 = vld [vmem:[%s5442_s21 + $0x14] sm:$0x1]  ;;  %v2195_v32 = vsel %vm5461_vm4, %v2190_v27, %v6031_v30 }
 0x14c   : > { %v2209_v14 = vrot.slane %v2207_v36, 4  ;;  %v2259_v27 = vunpack.c.l.b16 %v2195_v32 }
 0x14d   : > { %v2364_v11 = vpop.f32.mrf.mxu0  ;;  %v2205_v55 = vsel %vm5461_vm4, %v2200_v50, %v2204_v5 }
 0x14e   : > { %v1711_v54 = vpop.f32.mrf.mxu3  ;;  %v2260_v50 = vunpack.c.l.b16 %v2205_v55 }
 0x14f   : > { %v1071_v51 = vpop.f32.mrf.mxu1  ;;  %v1776_v1 = vadd.f32 %v1711_v54, %v1483_v26  ;;  %v2220_v26 = vshrl.u32 %v4804_v40, 16  ;;  %v2520_v54 = vrot.slane %v5230_v62, 5  ;;  %v6061_v40 = vrot.slane %v2216_v20, 5 }
 0x150   : > { %4819 = vmatmul.msk.bf16.gmra.mxu0 %vm759_vm3, %v2276_v28  ;;  %v5229_v28 = vld [vmem:[%s5442_s21 + $0xbc] sm:$0x1]  ;;  %v1281_v62 = vrot.slane %v1279_v57, 4  ;;  %v1072_v30 = vadd.f32 %v1071_v51, %v5804_v52 }
 0x151   : > { %v1420_v13 = vpop.f32.mrf.mxu2  ;;  %v6049_v16 = vadd.f32 %v2364_v11, %v1776_v1  ;;  %v1282_v33 = vrot.slane %v5229_v28, 5  ;;  %v2212_v1 = vrot.slane %v2210_v17, 5  ;;  %v2222_v4 = vrot.slane %v2220_v26, 4 }
 0x152   : > { %4612 = vmatmul.msk.bf16.gmra.mxu1 %vm759_vm3, %v5113_v49  ;;  %v1484_v0 = vadd.f32 %v1420_v13, %v1069_v34  ;;  %v4822_v34 = vld [vmem:[%s5442_s21 + $0xc] sm:$0xe]  ;;  %v4629_v28 = vrot.slane %v1136_v24, 9  ;;  %v2521_v17 = vsel %vm5636_vm7, %v2519_v15, %v2520_v54  ;;  %v4982_v15 = vld [vmem:[%s5442_s21 + $0x18] sm:$0xf] }
 0x153   : > { %6913 = vst [vmem:[#allocation5_spill] sm:$0xff] %v6049_v16  ;;  %v4838_v16 = vrot.slane %v4822_v34, 9  ;;  %v2213_v20 = vor.u32 %v2212_v1, %v2209_v14  ;;  %v2629_v24 = vunpack.c.l.b16 %v2521_v17  ;;  %v1283_v51 = vsel %vm5636_vm7, %v1281_v62, %v1282_v33  ;;  %v5114_v14 = vld [vmem:[%s5442_s21 + $0xb4] sm:$0xff]  ;;  %v6084_v1 = vld [vmem:[%s5442_s21 + $0x1c] sm:$0xf] }
 0x154   : > { %v1280_v52 = vsel %vm5636_vm7, %v4629_v28, %v1279_v57  ;;  %v2223_v32 = vor.u32 %v2222_v4, %v6061_v40  ;;  %v1316_v57 = vunpack.c.l.b16 %v1283_v51  ;;  %v3190_v62 = vshrl.u32 %v4982_v15, 16 }
 0x155   : > { %v2366_v49 = vpop.f32.mrf.mxu0  ;;  %v2518_v36 = vsel %vm5636_vm7, %v4838_v16, %v2517_v19  ;;  %v2277_v19 = vpack.c.b16 %v2260_v50, %v2259_v27  ;;  %v2214_v28 = vrot.slane %v2213_v20, 4  ;;  %v3193_v4 = vshll.u32 %v4982_v15, 16 }
 0x156   : > { %v1713_v11 = vpop.f32.mrf.mxu3  ;;  %4644 = vmatmul.msk.bf16.gmra.mxu2 %vm759_vm3, %v1331_v41  ;;  %v4805_v41 = vld [vmem:[%s5442_s21 + $0xc8] sm:$0x1]  ;;  %v2628_v26 = vunpack.c.l.b16 %v2518_v36  ;;  %v2224_v33 = vrot.slane %v2223_v32, 4  ;;  %v3203_v50 = vshrl.u32 %v6084_v1, 16  ;;  %v3192_v20 = vrot.slane %v3190_v62, 4 }
 0x157   : > { %v1073_v61 = vpop.f32.mrf.mxu1  ;;  %v1777_v13 = vadd.f32 %v1713_v11, %v1484_v0  ;;  %v2226_v16 = vshll.u32 %v4805_v41, 16  ;;  %v4984_v32 = vld [vmem:[%s5442_s21 + $0x20] sm:$0x1]  ;;  %v4985_v62 = vld [vmem:[%s5442_s21 + $0x24] sm:$0xf] }
 0x158   : > { %v6077_v55 = vpack.c.b16 %v2629_v24, %v2628_v26  ;;  %v1074_v27 = vadd.f32 %v1073_v61, %v5824_v31  ;;  %v3195_v26 = vrot.slane %v3193_v4, 5  ;;  %v2219_v31 = vsel %vm5461_vm4, %v2214_v28, %v6061_v40  ;;  %v6104_v4 = vld [vmem:[%s5442_s21 + $0x28] sm:$0xf] }
 0x159   : > { %v1423_v5 = vpop.f32.mrf.mxu2  ;;  %v6080_v54 = vadd.f32 %v2366_v49, %v1777_v13  ;;  %v2228_v49 = vrot.slane %v2226_v16, 5  ;;  %v3199_v13 = vshll.u32 %v6084_v1, 16  ;;  %v3209_v28 = vshll.u32 %v4984_v32, 16 }
 0x15a   : > { %v1485_v0 = vadd.f32 %v1423_v5, %v1072_v30  ;;  %v1315_v30 = vunpack.c.l.b16 %v1280_v52  ;;  %v3205_v52 = vrot.slane %v3203_v50, 4 }
 0x15b   : > { %4756 = vmatmul.msk.bf16.gmra.mxu3 %vm759_vm3, %v5129_v37  ;;  %v2229_v61 = vsel %vm5461_vm4, %v2224_v33, %v2228_v49  ;;  %v3201_v24 = vrot.slane %v3199_v13, 5  ;;  %v3211_v50 = vrot.slane %v3209_v28, 5 }
 0x15c   : > { %v1332_v17 = vpack.c.b16 %v1316_v57, %v1315_v30  ;;  %v3196_v30 = vor.u32 %v3195_v26, %v3192_v20  ;;  %v3217_v20 = vshll.u32 %v4985_v62, 16  ;;  %v3223_v26 = vshll.u32 %v6104_v4, 16 }
 0x15d   : > { %v2369_v11 = vpop.f32.mrf.mxu0  ;;  %v3206_v57 = vor.u32 %v3205_v52, %v3201_v24 }
 0x15e   : > { %v1716_v34 = vpop.f32.mrf.mxu3  ;;  %v3197_v49 = vrot.slane %v3196_v30, 4 }
 0x15f   : > { %v1076_v37 = vpop.f32.mrf.mxu1  ;;  %v1778_v5 = vadd.f32 %v1716_v34, %v1485_v0  ;;  %v2262_v34 = vunpack.c.l.b16 %v2229_v61  ;;  %v3207_v13 = vrot.slane %v3206_v57, 4 }
 0x160   : > { %4820 = vmatmul.msk.bf16.gmra.mxu0 %vm759_vm3, %v2277_v19  ;;  %v1077_v40 = vadd.f32 %v1076_v37, %v5847_v2 }
 0x161   : > { %v1425_v41 = vpop.f32.mrf.mxu2  ;;  %v6091_v0 = vadd.f32 %v2369_v11, %v1778_v5  ;;  %v5130_v11 = vld [vmem:[%s5442_s21 + $0xc0] sm:$0xff]  ;;  %v3212_v57 = vsel %vm5461_vm4, %v3207_v13, %v3211_v50  ;;  %v6130_v50 = vld [vmem:[%s5442_s21 + $0x2c] sm:$0x1] }
 0x162   : > { %4613 = vmatmul.msk.bf16.gmra.mxu1 %vm759_vm3, %v5114_v14  ;;  %v1486_v36 = vadd.f32 %v1425_v41, %v1074_v27  ;;  %v2261_v14 = vunpack.c.l.b16 %v2219_v31  ;;  %v5046_v41 = vld [vmem:[%s5442_s21 + $0x18] sm:$0xe]  ;;  %v3227_v31 = vshrl.u32 %v6104_v4, 16  ;;  %v3575_v13 = vunpack.c.l.b16 %v3212_v57 }
 0x164   : > { %v2278_v27 = vpack.c.b16 %v2262_v34, %v2261_v14  ;;  %v5232_v14 = vld [vmem:[%s5442_s21 + $0x20] sm:$0x1] }
 0x165   : > { %v2371_v51 = vpop.f32.mrf.mxu0  ;;  %v2527_v34 = vrot.slane %v5232_v14, 5 }
 0x166   : > { %v1718_v19 = vpop.f32.mrf.mxu3  ;;  %4645 = vmatmul.msk.bf16.gmra.mxu2 %vm759_vm3, %v1332_v17  ;;  %v3214_v17 = vshrl.u32 %v4985_v62, 16 }
 0x167   : > { %v1078_v16 = vpop.f32.mrf.mxu1  ;;  %v1779_v15 = vadd.f32 %v1718_v19, %v1486_v36  ;;  %v3864_v36 = vrot.slane %v6084_v1, 5  ;;  %v5231_v19 = vld [vmem:[%s5442_s21 + $0x1c] sm:$0xf]  ;;  %v3202_v1 = vsel %vm5461_vm4, %v3197_v49, %v3201_v24  ;;  %v3229_v24 = vrot.slane %v3227_v31, 4 }
 0x169   : > { %v1428_v5 = vpop.f32.mrf.mxu2  ;;  %v6109_v2 = vadd.f32 %v2371_v51, %v1779_v15  ;;  %v5062_v51 = vrot.slane %v5046_v41, 9  ;;  %v4823_v15 = vld [vmem:[%s5442_s21 + $0x18] sm:$0xe]  ;;  %v3866_v28 = vrot.slane %v3864_v36, 4 }
 0x16a   : > { %v1487_v33 = vadd.f32 %v1428_v5, %v1077_v40  ;;  %v1079_v40 = vadd.f32 %v1078_v16, %v5867_v43  ;;  %v3867_v5 = vrot.slane %v4984_v32, 5  ;;  %v5131_v41 = vld [vmem:[%s5442_s21 + $0x18] sm:$0xff]  ;;  %v3574_v16 = vunpack.c.l.b16 %v3202_v1 }
 0x16b   : > { %4757 = vmatmul.msk.bf16.gmra.mxu3 %vm759_vm3, %v5130_v11  ;;  %6914 = vst [vmem:[#allocation6_spill] sm:$0xff] %v6109_v2  ;;  %v2524_v11 = vrot.slane %v5231_v19, 5  ;;  %v6124_v19 = vrot.slane %v3223_v26, 5  ;;  %v3865_v2 = vsel %vm5636_vm7, %v5062_v51, %v3864_v36  ;;  %v3233_v36 = vshll.u32 %v6130_v50, 16 }
 0x16c   : > { %v3606_v51 = vpack.c.b16 %v3575_v13, %v3574_v16  ;;  %v5233_v16 = vld [vmem:[%s5442_s21 + $0x28] sm:$0xf] }
 0x16d   : > { %v2374_v37 = vpop.f32.mrf.mxu0  ;;  %v2526_v14 = vrot.slane %v2524_v11, 4  ;;  %v2531_v13 = vrot.slane %v5233_v16, 5 }
 0x16e   : > { %v1721_v61 = vpop.f32.mrf.mxu3 }
 0x16f   : > { %v1081_v52 = vpop.f32.mrf.mxu1  ;;  %v1780_v30 = vadd.f32 %v1721_v61, %v1487_v33  ;;  %v3216_v33 = vrot.slane %v3214_v17, 4  ;;  %v3219_v61 = vrot.slane %v3217_v20, 5  ;;  %v2528_v31 = vsel %vm5636_vm7, %v2526_v14, %v2527_v34  ;;  %v6149_v14 = vld [vmem:[%s5442_s21 + $0x34] sm:$0xf] }
 0x170   : > { %4821 = vmatmul.msk.bf16.gmra.mxu0 %vm759_vm3, %v2278_v27  ;;  %v4839_v27 = vrot.slane %v4823_v15, 9  ;;  %v1082_v15 = vadd.f32 %v1081_v52, %v5747_v48 }
 0x171   : > { %v1430_v62 = vpop.f32.mrf.mxu2  ;;  %v6127_v43 = vadd.f32 %v2374_v37, %v1780_v30  ;;  %v3220_v17 = vor.u32 %v3219_v61, %v3216_v33  ;;  %v3230_v30 = vor.u32 %v3229_v24, %v6124_v19  ;;  %v3235_v61 = vrot.slane %v3233_v36, 5  ;;  %v5047_v24 = vld [vmem:[%s5442_s21 + $0x24] sm:$0xe] }
 0x172   : > { %4854 = vmatmul.msk.bf16.vlgmr.msra.gmra.mxu1 %vm759_vm3, %v6077_v55  ;;  %v1488_v49 = vadd.f32 %v1430_v62, %v1079_v40  ;;  %v3868_v55 = vsel %vm5636_vm7, %v3866_v28, %v3867_v5  ;;  %v2525_v37 = vsel %vm5636_vm7, %v4839_v27, %v2524_v11  ;;  %v3975_v40 = vunpack.c.l.b16 %v3865_v2 }
 0x173   : > { %v3976_v57 = vunpack.c.l.b16 %v3868_v55  ;;  %v2630_v5 = vunpack.c.l.b16 %v2525_v37  ;;  %v2631_v11 = vunpack.c.l.b16 %v2528_v31  ;;  %v3221_v33 = vrot.slane %v3220_v17, 4 }
 0x174   : > { %v3231_v34 = vrot.slane %v3230_v30, 4  ;;  %v3871_v27 = vrot.slane %v6104_v4, 5  ;;  %v5063_v31 = vrot.slane %v5047_v24, 9  ;;  %v4824_v4 = vld [vmem:[%s5442_s21 + $0x24] sm:$0xe] }
 0x175   : > { %v2376_v32 = vpop.f32.mrf.mxu0  ;;  %v2661_v52 = vpack.c.b16 %v2631_v11, %v2630_v5 }
 0x176   : > { %v1723_v20 = vpop.f32.mrf.mxu3  ;;  %4966 = vmatmul.msk.bf16.vlgmr.msra.gmra.mxu2 %vm759_vm3, %v5131_v41  ;;  %v4988_v41 = vld [vmem:[%s5442_s21 + $0x30] sm:$0xf]  ;;  %v3236_v37 = vsel %vm5461_vm4, %v3231_v34, %v3235_v61  ;;  %v5132_v61 = vld [vmem:[%s5442_s21 + $0x24] sm:$0xff] }
 0x177   : > { %v1083_v26 = vpop.f32.mrf.mxu1  ;;  %v1781_v1 = vadd.f32 %v1723_v20, %v1488_v49  ;;  %v4007_v49 = vpack.c.b16 %v3976_v57, %v3975_v40  ;;  %v3226_v20 = vsel %vm5461_vm4, %v3221_v33, %v6124_v19  ;;  %v3238_v30 = vshrl.u32 %v4988_v41, 16  ;;  %v5234_v57 = vld [vmem:[%s5442_s21 + $0x2c] sm:$0x1] }
 0x178   : > { %v3873_v40 = vrot.slane %v3871_v27, 4  ;;  %v3874_v19 = vrot.slane %v6130_v50, 5  ;;  %v3576_v11 = vunpack.c.l.b16 %v3226_v20  ;;  %v2533_v33 = vrot.slane %v2531_v13, 4 }
 0x179   : > { %v1433_v28 = vpop.f32.mrf.mxu2  ;;  %v6151_v48 = vadd.f32 %v2376_v32, %v1781_v1  ;;  %v3241_v32 = vshll.u32 %v4988_v41, 16  ;;  %v3247_v1 = vshll.u32 %v6149_v14, 16  ;;  %v3577_v24 = vunpack.c.l.b16 %v3236_v37 }
 0x17a   : > { %v1489_v62 = vadd.f32 %v1433_v28, %v1082_v15  ;;  %v1084_v15 = vadd.f32 %v1083_v26, %v5768_v12  ;;  %v2534_v28 = vrot.slane %v5234_v57, 5  ;;  %v3872_v41 = vsel %vm5636_vm7, %v5063_v31, %v3871_v27 }
 0x17b   : > { %5030 = vmatmul.msk.bf16.vlgmr.msra.gmra.mxu3 %vm759_vm3, %v3606_v51  ;;  %v3251_v51 = vshrl.u32 %v6149_v14, 16  ;;  %v3240_v12 = vrot.slane %v3238_v30, 4  ;;  %v3243_v26 = vrot.slane %v3241_v32, 5  ;;  %v6172_v50 = vrot.slane %v3247_v1, 5 }
 0x17c   : > { %v2535_v37 = vsel %vm5636_vm7, %v2533_v33, %v2534_v28  ;;  %v3977_v31 = vunpack.c.l.b16 %v3872_v41  ;;  %v5048_v41 = vld [vmem:[%s5442_s21 + $0x30] sm:$0xe] }
 0x17d   : > { %v2379_v2 = vpop.f32.mrf.mxu0  ;;  %v3253_v16 = vrot.slane %v3251_v51, 4  ;;  %v3244_v1 = vor.u32 %v3243_v26, %v3240_v12 }
 0x17e   : > { %v1726_v55 = vpop.f32.mrf.mxu3 }
 0x17f   : > { %v1086_v17 = vpop.f32.mrf.mxu1  ;;  %v1782_v36 = vadd.f32 %v1726_v55, %v1489_v62  ;;  %v4840_v62 = vrot.slane %v4824_v4, 9  ;;  %v6181_v4 = vld [vmem:[%s5442_s21 + $0x38] sm:$0x1]  ;;  %v3254_v51 = vor.u32 %v3253_v16, %v6172_v50  ;;  %v3245_v33 = vrot.slane %v3244_v1, 4 }
 0x180   : > { %5078 = vmatmul.msk.bf16.vlgmr.msra.gmra.mxu0 %vm759_vm3, %v4007_v49 }
 0x181   : > { %v1435_v5 = vpop.f32.mrf.mxu2  ;;  %v6170_v49 = vadd.f32 %v2379_v2, %v1782_v36  ;;  %v2532_v20 = vsel %vm5636_vm7, %v4840_v62, %v2531_v13  ;;  %v3607_v2 = vpack.c.b16 %v3577_v24, %v3576_v11  ;;  %v1087_v13 = vadd.f32 %v1086_v17, %v5787_v39  ;;  %v6189_v62 = vld [vmem:[%s5442_s21 + $0x40] sm:$0xf] }
 0x182   : > { %4855 = vmatmul.msk.bf16.gmra.mxu1 %vm759_vm3, %v2661_v52  ;;  %v1490_v34 = vadd.f32 %v1435_v5, %v1084_v15  ;;  %v3875_v52 = vsel %vm5636_vm7, %v3873_v40, %v3874_v19  ;;  %v2632_v15 = vunpack.c.l.b16 %v2532_v20  ;;  %v2633_v40 = vunpack.c.l.b16 %v2535_v37  ;;  %v4991_v5 = vld [vmem:[%s5442_s21 + $0x3c] sm:$0xf] }
 0x183   : > { %v3978_v32 = vunpack.c.l.b16 %v3875_v52  ;;  %v3257_v19 = vshll.u32 %v6181_v4, 16  ;;  %v3878_v39 = vrot.slane %v6149_v14, 5  ;;  %v3262_v26 = vshrl.u32 %v4991_v5, 16 }
 0x184   : > { %v3265_v16 = vshll.u32 %v4991_v5, 16  ;;  %v3271_v52 = vshll.u32 %v6189_v62, 16  ;;  %v3275_v20 = vshrl.u32 %v6189_v62, 16  ;;  %v3881_v14 = vrot.slane %v6181_v4, 5 }
 0x185   : > { %v2381_v55 = vpop.f32.mrf.mxu0  ;;  %v4008_v11 = vpack.c.b16 %v3978_v32, %v3977_v31  ;;  %v3259_v24 = vrot.slane %v3257_v19, 5  ;;  %v5236_v32 = vld [vmem:[%s5442_s21 + $0x38] sm:$0x1]  ;;  %v3880_v19 = vrot.slane %v3878_v39, 4 }
 0x186   : > { %v1728_v27 = vpop.f32.mrf.mxu3  ;;  %4967 = vmatmul.msk.bf16.gmra.mxu2 %vm759_vm3, %v5132_v61  ;;  %v2662_v61 = vpack.c.b16 %v2633_v40, %v2632_v15  ;;  %v2541_v1 = vrot.slane %v5236_v32, 5  ;;  %v3250_v15 = vsel %vm5461_vm4, %v3245_v33, %v6172_v50  ;;  %v3267_v5 = vrot.slane %v3265_v16, 5  ;;  %v6216_v32 = vld [vmem:[%s5442_s21 + $0x44] sm:$0x1] }
 0x187   : > { %v1088_v30 = vpop.f32.mrf.mxu1  ;;  %v1783_v36 = vadd.f32 %v1728_v27, %v1490_v34  ;;  %v3255_v34 = vrot.slane %v3254_v51, 4  ;;  %v6210_v4 = vrot.slane %v3271_v52, 5  ;;  %v3578_v50 = vunpack.c.l.b16 %v3250_v15 }
 0x189   : > { %v1438_v57 = vpop.f32.mrf.mxu2  ;;  %v6194_v17 = vadd.f32 %v2381_v55, %v1783_v36  ;;  %v4825_v55 = vld [vmem:[%s5442_s21 + $0x30] sm:$0xe]  ;;  %v1089_v36 = vadd.f32 %v1088_v30, %v5812_v6  ;;  %v3260_v40 = vsel %vm5461_vm4, %v3255_v34, %v3259_v24 }
 0x18a   : > { %v1491_v28 = vadd.f32 %v1438_v57, %v1087_v13  ;;  %v5064_v13 = vrot.slane %v5048_v41, 9  ;;  %v3277_v41 = vrot.slane %v3275_v20, 4  ;;  %v4841_v6 = vrot.slane %v4825_v55, 9 }
 0x18b   : > { %5031 = vmatmul.msk.bf16.gmra.mxu3 %vm759_vm3, %v3607_v2  ;;  %v5235_v2 = vld [vmem:[%s5442_s21 + $0x34] sm:$0xf]  ;;  %v3579_v33 = vunpack.c.l.b16 %v3260_v40 }
 0x18c   : > { %v2538_v31 = vrot.slane %v5235_v2, 5  ;;  %v3879_v24 = vsel %vm5636_vm7, %v5064_v13, %v3878_v39  ;;  %v3281_v39 = vshll.u32 %v6216_v32, 16 }
 0x18d   : > { %v2384_v12 = vpop.f32.mrf.mxu0  ;;  %v3608_v55 = vpack.c.b16 %v3579_v33, %v3578_v50  ;;  %v5237_v33 = vld [vmem:[%s5442_s21 + $0x40] sm:$0xf] }
 0x18e   : > { %v1731_v37 = vpop.f32.mrf.mxu3  ;;  %v2540_v30 = vrot.slane %v2538_v31, 4 }
 0x18f   : > { %v1091_v27 = vpop.f32.mrf.mxu1  ;;  %v1784_v51 = vadd.f32 %v1731_v37, %v1491_v28  ;;  %v3264_v28 = vrot.slane %v3262_v26, 4  ;;  %v5133_v37 = vld [vmem:[%s5442_s21 + $0x30] sm:$0xff] }
 0x190   : > { %5079 = vmatmul.msk.bf16.gmra.mxu0 %vm759_vm3, %v4008_v11  ;;  %v2542_v20 = vsel %vm5636_vm7, %v2540_v30, %v2541_v1  ;;  %v6235_v30 = vld [vmem:[%s5442_s21 + $0x4c] sm:$0xf] }
 0x191   : > { %v1440_v57 = vpop.f32.mrf.mxu2  ;;  %v6213_v2 = vadd.f32 %v2384_v12, %v1784_v51  ;;  %v3268_v26 = vor.u32 %v3267_v5, %v3264_v28  ;;  %v2539_v12 = vsel %vm5636_vm7, %v4841_v6, %v2538_v31  ;;  %v3278_v51 = vor.u32 %v3277_v41, %v6210_v4  ;;  %v5049_v41 = vld [vmem:[%s5442_s21 + $0x3c] sm:$0xe] }
 0x192   : > { %4856 = vmatmul.msk.bf16.gmra.mxu1 %vm759_vm3, %v2662_v61  ;;  %v1492_v11 = vadd.f32 %v1440_v57, %v1089_v36  ;;  %v3882_v61 = vsel %vm5636_vm7, %v3880_v19, %v3881_v14  ;;  %v1092_v14 = vadd.f32 %v1091_v27, %v5832_v42  ;;  %v3979_v36 = vunpack.c.l.b16 %v3879_v24 }
 0x193   : > { %v3980_v15 = vunpack.c.l.b16 %v3882_v61  ;;  %v2634_v19 = vunpack.c.l.b16 %v2539_v12  ;;  %v2635_v31 = vunpack.c.l.b16 %v2542_v20  ;;  %v3269_v28 = vrot.slane %v3268_v26, 4 }
 0x194   : > { %v3279_v1 = vrot.slane %v3278_v51, 4  ;;  %v3283_v5 = vrot.slane %v3281_v39, 5  ;;  %v3885_v6 = vrot.slane %v6189_v62, 5  ;;  %v2545_v24 = vrot.slane %v5237_v33, 5  ;;  %v4826_v62 = vld [vmem:[%s5442_s21 + $0x3c] sm:$0xe] }
 0x195   : > { %v2386_v34 = vpop.f32.mrf.mxu0  ;;  %v2663_v50 = vpack.c.b16 %v2635_v31, %v2634_v19  ;;  %v5065_v20 = vrot.slane %v5049_v41, 9 }
 0x196   : > { %v1733_v16 = vpop.f32.mrf.mxu3  ;;  %4968 = vmatmul.msk.bf16.gmra.mxu2 %vm759_vm3, %v5133_v37  ;;  %v4994_v37 = vld [vmem:[%s5442_s21 + $0x48] sm:$0xf]  ;;  %v3284_v12 = vsel %vm5461_vm4, %v3279_v1, %v3283_v5  ;;  %v5134_v5 = vld [vmem:[%s5442_s21 + $0x3c] sm:$0xff] }
 0x197   : > { %v1093_v52 = vpop.f32.mrf.mxu1  ;;  %v1785_v13 = vadd.f32 %v1733_v16, %v1492_v11  ;;  %v4009_v11 = vpack.c.b16 %v3980_v15, %v3979_v36  ;;  %v3274_v16 = vsel %vm5461_vm4, %v3269_v28, %v6210_v4  ;;  %v3286_v51 = vshrl.u32 %v4994_v37, 16  ;;  %v5238_v15 = vld [vmem:[%s5442_s21 + $0x44] sm:$0x1] }
 0x198   : > { %v3887_v36 = vrot.slane %v3885_v6, 4  ;;  %v3888_v4 = vrot.slane %v6216_v32, 5  ;;  %v3580_v31 = vunpack.c.l.b16 %v3274_v16  ;;  %v2547_v28 = vrot.slane %v2545_v24, 4 }
 0x199   : > { %v1443_v40 = vpop.f32.mrf.mxu2  ;;  %v6237_v42 = vadd.f32 %v2386_v34, %v1785_v13  ;;  %v3289_v34 = vshll.u32 %v4994_v37, 16  ;;  %v3295_v13 = vshll.u32 %v6235_v30, 16  ;;  %v3581_v41 = vunpack.c.l.b16 %v3284_v12 }
 0x19a   : > { %v1493_v57 = vadd.f32 %v1443_v40, %v1092_v14  ;;  %v1094_v14 = vadd.f32 %v1093_v52, %v5849_v7  ;;  %v2548_v40 = vrot.slane %v5238_v15, 5  ;;  %v3886_v37 = vsel %vm5636_vm7, %v5065_v20, %v3885_v6 }
 0x19b   : > { %5032 = vmatmul.msk.bf16.gmra.mxu3 %vm759_vm3, %v3608_v55  ;;  %v3299_v55 = vshrl.u32 %v6235_v30, 16  ;;  %v3288_v7 = vrot.slane %v3286_v51, 4  ;;  %v3291_v52 = vrot.slane %v3289_v34, 5  ;;  %v6258_v32 = vrot.slane %v3295_v13, 5 }
 0x19c   : > { %v2549_v12 = vsel %vm5636_vm7, %v2547_v28, %v2548_v40  ;;  %v3981_v20 = vunpack.c.l.b16 %v3886_v37  ;;  %v5050_v37 = vld [vmem:[%s5442_s21 + $0x48] sm:$0xe] }
 0x19d   : > { %v2389_v27 = vpop.f32.mrf.mxu0  ;;  %v3301_v33 = vrot.slane %v3299_v55, 4  ;;  %v3292_v13 = vor.u32 %v3291_v52, %v3288_v7 }
 0x19e   : > { %v1736_v61 = vpop.f32.mrf.mxu3 }
 0x19f   : > { %v1096_v26 = vpop.f32.mrf.mxu1  ;;  %v1786_v39 = vadd.f32 %v1736_v61, %v1493_v57  ;;  %v4842_v57 = vrot.slane %v4826_v62, 9  ;;  %v6267_v62 = vld [vmem:[%s5442_s21 + $0x50] sm:$0x1]  ;;  %v3302_v55 = vor.u32 %v3301_v33, %v6258_v32  ;;  %v3293_v28 = vrot.slane %v3292_v13, 4 }
 0x1a0   : > { %5080 = vmatmul.msk.bf16.gmra.mxu0 %vm759_vm3, %v4009_v11 }
 0x1a1   : > { %v1445_v19 = vpop.f32.mrf.mxu2  ;;  %v6256_v11 = vadd.f32 %v2389_v27, %v1786_v39  ;;  %v2546_v16 = vsel %vm5636_vm7, %v4842_v57, %v2545_v24  ;;  %v3609_v27 = vpack.c.b16 %v3581_v41, %v3580_v31  ;;  %v1097_v24 = vadd.f32 %v1096_v26, %v5870_v56  ;;  %v6275_v57 = vld [vmem:[%s5442_s21 + $0x58] sm:$0xf] }
 0x1a2   : > { %4857 = vmatmul.msk.bf16.gmra.mxu1 %vm759_vm3, %v2663_v50  ;;  %v1494_v1 = vadd.f32 %v1445_v19, %v1094_v14  ;;  %v3889_v50 = vsel %vm5636_vm7, %v3887_v36, %v3888_v4  ;;  %v2636_v14 = vunpack.c.l.b16 %v2546_v16  ;;  %v2637_v36 = vunpack.c.l.b16 %v2549_v12  ;;  %v4997_v19 = vld [vmem:[%s5442_s21 + $0x54] sm:$0xf] }
 0x1a3   : > { %v3982_v34 = vunpack.c.l.b16 %v3889_v50  ;;  %v3305_v4 = vshll.u32 %v6267_v62, 16  ;;  %v3892_v56 = vrot.slane %v6235_v30, 5  ;;  %v3310_v52 = vshrl.u32 %v4997_v19, 16 }
 0x1a4   : > { %v3313_v33 = vshll.u32 %v4997_v19, 16  ;;  %v3319_v50 = vshll.u32 %v6275_v57, 16  ;;  %v3323_v16 = vshrl.u32 %v6275_v57, 16  ;;  %v3895_v30 = vrot.slane %v6267_v62, 5 }
 0x1a5   : > { %v2391_v61 = vpop.f32.mrf.mxu0  ;;  %v4010_v31 = vpack.c.b16 %v3982_v34, %v3981_v20  ;;  %v3307_v41 = vrot.slane %v3305_v4, 5  ;;  %v5240_v34 = vld [vmem:[%s5442_s21 + $0x50] sm:$0x1]  ;;  %v3894_v4 = vrot.slane %v3892_v56, 4 }
 0x1a6   : > { %v1738_v6 = vpop.f32.mrf.mxu3  ;;  %4969 = vmatmul.msk.bf16.gmra.mxu2 %vm759_vm3, %v5134_v5  ;;  %v2664_v5 = vpack.c.b16 %v2637_v36, %v2636_v14  ;;  %v2555_v13 = vrot.slane %v5240_v34, 5  ;;  %v3298_v14 = vsel %vm5461_vm4, %v3293_v28, %v6258_v32  ;;  %v3315_v19 = vrot.slane %v3313_v33, 5  ;;  %v6302_v34 = vld [vmem:[%s5442_s21 + $0x5c] sm:$0x1] }
 0x1a7   : > { %v1098_v51 = vpop.f32.mrf.mxu1  ;;  %v1787_v39 = vadd.f32 %v1738_v6, %v1494_v1  ;;  %v3303_v1 = vrot.slane %v3302_v55, 4  ;;  %v6296_v62 = vrot.slane %v3319_v50, 5  ;;  %v3582_v32 = vunpack.c.l.b16 %v3298_v14 }
 0x1a9   : > { %v1448_v15 = vpop.f32.mrf.mxu2  ;;  %v6280_v26 = vadd.f32 %v2391_v61, %v1787_v39  ;;  %v4827_v61 = vld [vmem:[%s5442_s21 + $0x48] sm:$0xe]  ;;  %v1099_v39 = vadd.f32 %v1098_v51, %v5885_v23  ;;  %v3308_v36 = vsel %vm5461_vm4, %v3303_v1, %v3307_v41 }
 0x1aa   : > { %v1495_v40 = vadd.f32 %v1448_v15, %v1097_v24  ;;  %v5066_v24 = vrot.slane %v5050_v37, 9  ;;  %v3325_v37 = vrot.slane %v3323_v16, 4  ;;  %v4843_v23 = vrot.slane %v4827_v61, 9 }
 0x1ab   : > { %5033 = vmatmul.msk.bf16.gmra.mxu3 %vm759_vm3, %v3609_v27  ;;  %v5239_v27 = vld [vmem:[%s5442_s21 + $0x4c] sm:$0xf]  ;;  %v3583_v28 = vunpack.c.l.b16 %v3308_v36 }
 0x1ac   : > { %v2552_v20 = vrot.slane %v5239_v27, 5  ;;  %v3893_v41 = vsel %vm5636_vm7, %v5066_v24, %v3892_v56  ;;  %v3329_v56 = vshll.u32 %v6302_v34, 16 }
 0x1ad   : > { %v2394_v7 = vpop.f32.mrf.mxu0  ;;  %v3610_v61 = vpack.c.b16 %v3583_v28, %v3582_v32  ;;  %v5241_v28 = vld [vmem:[%s5442_s21 + $0x58] sm:$0xf] }
 0x1ae   : > { %v1741_v12 = vpop.f32.mrf.mxu3  ;;  %v2554_v51 = vrot.slane %v2552_v20, 4 }
 0x1af   : > { %v1101_v6 = vpop.f32.mrf.mxu1  ;;  %v1788_v55 = vadd.f32 %v1741_v12, %v1495_v40  ;;  %v3312_v40 = vrot.slane %v3310_v52, 4  ;;  %v5135_v12 = vld [vmem:[%s5442_s21 + $0x48] sm:$0xff] }
 0x1b0   : > { %5081 = vmatmul.msk.bf16.gmra.mxu0 %vm759_vm3, %v4010_v31  ;;  %v2556_v16 = vsel %vm5636_vm7, %v2554_v51, %v2555_v13  ;;  %v6321_v51 = vld [vmem:[%s5442_s21 + $0x64] sm:$0xf] }
 0x1b1   : > { %v1450_v15 = vpop.f32.mrf.mxu2  ;;  %v6299_v27 = vadd.f32 %v2394_v7, %v1788_v55  ;;  %v3316_v52 = vor.u32 %v3315_v19, %v3312_v40  ;;  %v2553_v7 = vsel %vm5636_vm7, %v4843_v23, %v2552_v20  ;;  %v3326_v55 = vor.u32 %v3325_v37, %v6296_v62  ;;  %v5051_v37 = vld [vmem:[%s5442_s21 + $0x54] sm:$0xe] }
 0x1b2   : > { %4858 = vmatmul.msk.bf16.gmra.mxu1 %vm759_vm3, %v2664_v5  ;;  %v1496_v31 = vadd.f32 %v1450_v15, %v1099_v39  ;;  %v3896_v5 = vsel %vm5636_vm7, %v3894_v4, %v3895_v30  ;;  %v1102_v30 = vadd.f32 %v1101_v6, %v5762_v63  ;;  %v3983_v39 = vunpack.c.l.b16 %v3893_v41 }
 0x1b3   : > { %v3984_v14 = vunpack.c.l.b16 %v3896_v5  ;;  %v2638_v4 = vunpack.c.l.b16 %v2553_v7  ;;  %v2639_v20 = vunpack.c.l.b16 %v2556_v16  ;;  %v3317_v40 = vrot.slane %v3316_v52, 4 }
 0x1b4   : > { %v3327_v13 = vrot.slane %v3326_v55, 4  ;;  %v3331_v19 = vrot.slane %v3329_v56, 5  ;;  %v3899_v23 = vrot.slane %v6275_v57, 5  ;;  %v2559_v41 = vrot.slane %v5241_v28, 5  ;;  %v4828_v57 = vld [vmem:[%s5442_s21 + $0x54] sm:$0xe] }
 0x1b5   : > { %v2396_v1 = vpop.f32.mrf.mxu0  ;;  %v2665_v32 = vpack.c.b16 %v2639_v20, %v2638_v4  ;;  %v5067_v16 = vrot.slane %v5051_v37, 9 }
 0x1b6   : > { %v1743_v33 = vpop.f32.mrf.mxu3  ;;  %4970 = vmatmul.msk.bf16.gmra.mxu2 %vm759_vm3, %v5135_v12  ;;  %v5000_v12 = vld [vmem:[%s5442_s21 + $0x60] sm:$0xf]  ;;  %v3332_v7 = vsel %vm5461_vm4, %v3327_v13, %v3331_v19  ;;  %v5136_v19 = vld [vmem:[%s5442_s21 + $0x54] sm:$0xff] }
 0x1b7   : > { %v1103_v50 = vpop.f32.mrf.mxu1  ;;  %v1789_v24 = vadd.f32 %v1743_v33, %v1496_v31  ;;  %v4011_v31 = vpack.c.b16 %v3984_v14, %v3983_v39  ;;  %v3322_v33 = vsel %vm5461_vm4, %v3317_v40, %v6296_v62  ;;  %v3334_v55 = vshrl.u32 %v5000_v12, 16  ;;  %v5242_v14 = vld [vmem:[%s5442_s21 + $0x5c] sm:$0x1] }
 0x1b8   : > { %v3901_v39 = vrot.slane %v3899_v23, 4  ;;  %v3902_v62 = vrot.slane %v6302_v34, 5  ;;  %v3584_v20 = vunpack.c.l.b16 %v3322_v33  ;;  %v2561_v40 = vrot.slane %v2559_v41, 4 }
 0x1b9   : > { %v1453_v36 = vpop.f32.mrf.mxu2  ;;  %v6323_v63 = vadd.f32 %v2396_v1, %v1789_v24  ;;  %v3337_v1 = vshll.u32 %v5000_v12, 16  ;;  %v3343_v24 = vshll.u32 %v6321_v51, 16  ;;  %v3585_v37 = vunpack.c.l.b16 %v3332_v7 }
 0x1ba   : > { %v1497_v15 = vadd.f32 %v1453_v36, %v1102_v30  ;;  %v1104_v30 = vadd.f32 %v1103_v50, %v5781_v25  ;;  %v2562_v36 = vrot.slane %v5242_v14, 5  ;;  %v3900_v12 = vsel %vm5636_vm7, %v5067_v16, %v3899_v23 }
 0x1bb   : > { %5034 = vmatmul.msk.bf16.gmra.mxu3 %vm759_vm3, %v3610_v61  ;;  %v3347_v61 = vshrl.u32 %v6321_v51, 16  ;;  %v3336_v25 = vrot.slane %v3334_v55, 4  ;;  %v3339_v50 = vrot.slane %v3337_v1, 5  ;;  %v6344_v34 = vrot.slane %v3343_v24, 5 }
 0x1bc   : > { %v2563_v7 = vsel %vm5636_vm7, %v2561_v40, %v2562_v36  ;;  %v3985_v16 = vunpack.c.l.b16 %v3900_v12  ;;  %v5052_v12 = vld [vmem:[%s5442_s21 + $0x60] sm:$0xe] }
 0x1bd   : > { %v2399_v6 = vpop.f32.mrf.mxu0  ;;  %v3349_v28 = vrot.slane %v3347_v61, 4  ;;  %v3340_v24 = vor.u32 %v3339_v50, %v3336_v25 }
 0x1be   : > { %v1746_v5 = vpop.f32.mrf.mxu3 }
 0x1bf   : > { %v1106_v52 = vpop.f32.mrf.mxu1  ;;  %v1790_v56 = vadd.f32 %v1746_v5, %v1497_v15  ;;  %v4844_v15 = vrot.slane %v4828_v57, 9  ;;  %v6353_v57 = vld [vmem:[%s5442_s21 + $0x68] sm:$0x1]  ;;  %v3350_v61 = vor.u32 %v3349_v28, %v6344_v34  ;;  %v3341_v40 = vrot.slane %v3340_v24, 4 }
 0x1c0   : > { %5082 = vmatmul.msk.bf16.gmra.mxu0 %vm759_vm3, %v4011_v31 }
 0x1c1   : > { %v1455_v4 = vpop.f32.mrf.mxu2  ;;  %v6342_v31 = vadd.f32 %v2399_v6, %v1790_v56  ;;  %v2560_v33 = vsel %vm5636_vm7, %v4844_v15, %v2559_v41  ;;  %v3611_v6 = vpack.c.b16 %v3585_v37, %v3584_v20  ;;  %v1107_v41 = vadd.f32 %v1106_v52, %v5802_v60  ;;  %v6361_v15 = vld [vmem:[%s5442_s21 + $0x70] sm:$0xf] }
 0x1c2   : > { %4859 = vmatmul.msk.bf16.gmra.mxu1 %vm759_vm3, %v2665_v32  ;;  %v1498_v13 = vadd.f32 %v1455_v4, %v1104_v30  ;;  %v3903_v32 = vsel %vm5636_vm7, %v3901_v39, %v3902_v62  ;;  %v2640_v30 = vunpack.c.l.b16 %v2560_v33  ;;  %v2641_v39 = vunpack.c.l.b16 %v2563_v7  ;;  %v5003_v4 = vld [vmem:[%s5442_s21 + $0x6c] sm:$0xf] }
 0x1c3   : > { %v3986_v1 = vunpack.c.l.b16 %v3903_v32  ;;  %v3353_v62 = vshll.u32 %v6353_v57, 16  ;;  %v3906_v60 = vrot.slane %v6321_v51, 5  ;;  %v3358_v50 = vshrl.u32 %v5003_v4, 16 }
 0x1c4   : > { %v3361_v28 = vshll.u32 %v5003_v4, 16  ;;  %v3367_v32 = vshll.u32 %v6361_v15, 16  ;;  %v3371_v33 = vshrl.u32 %v6361_v15, 16  ;;  %v3909_v51 = vrot.slane %v6353_v57, 5 }
 0x1c5   : > { %v2401_v5 = vpop.f32.mrf.mxu0  ;;  %v4012_v20 = vpack.c.b16 %v3986_v1, %v3985_v16  ;;  %v3355_v37 = vrot.slane %v3353_v62, 5  ;;  %v5244_v1 = vld [vmem:[%s5442_s21 + $0x68] sm:$0x1]  ;;  %v3908_v62 = vrot.slane %v3906_v60, 4 }
 0x1c6   : > { %v1748_v23 = vpop.f32.mrf.mxu3  ;;  %4971 = vmatmul.msk.bf16.gmra.mxu2 %vm759_vm3, %v5136_v19  ;;  %v2666_v19 = vpack.c.b16 %v2641_v39, %v2640_v30  ;;  %v2569_v24 = vrot.slane %v5244_v1, 5  ;;  %v3346_v30 = vsel %vm5461_vm4, %v3341_v40, %v6344_v34  ;;  %v3363_v4 = vrot.slane %v3361_v28, 5  ;;  %v5005_v40 = vld [vmem:[%s5442_s21 + $0x74] sm:$0x1] }
 0x1c7   : > { %v1108_v55 = vpop.f32.mrf.mxu1  ;;  %v1791_v56 = vadd.f32 %v1748_v23, %v1498_v13  ;;  %v3351_v13 = vrot.slane %v3350_v61, 4  ;;  %v3369_v57 = vrot.slane %v3367_v32, 5  ;;  %v3586_v1 = vunpack.c.l.b16 %v3346_v30 }
 0x1c9   : > { %v1458_v14 = vpop.f32.mrf.mxu2  ;;  %v6366_v52 = vadd.f32 %v2401_v5, %v1791_v56  ;;  %v4829_v5 = vld [vmem:[%s5442_s21 + $0x60] sm:$0xe]  ;;  %v1109_v56 = vadd.f32 %v1108_v55, %v5820_v18  ;;  %v3356_v39 = vsel %vm5461_vm4, %v3351_v13, %v3355_v37 }
 0x1ca   : > { %v1499_v36 = vadd.f32 %v1458_v14, %v1107_v41  ;;  %v5068_v41 = vrot.slane %v5052_v12, 9  ;;  %v3373_v12 = vrot.slane %v3371_v33, 4  ;;  %v3587_v34 = vunpack.c.l.b16 %v3356_v39 }
 0x1cb   : > { %5035 = vmatmul.msk.bf16.gmra.mxu3 %vm759_vm3, %v3611_v6  ;;  %6915 = vst [vmem:[#allocation7_spill] sm:$0xff] %v6366_v52  ;;  %v5243_v6 = vld [vmem:[%s5442_s21 + $0x64] sm:$0xf] }
 0x1cc   : > { %v2566_v16 = vrot.slane %v5243_v6, 5  ;;  %v4845_v6 = vrot.slane %v4829_v5, 9  ;;  %v3907_v13 = vsel %vm5636_vm7, %v5068_v41, %v3906_v60  ;;  %v3374_v33 = vor.u32 %v3373_v12, %v3369_v57  ;;  %v5006_v12 = vld [vmem:[%s5442_s21 + $0x78] sm:$0xf] }
 0x1cd   : > { %v2404_v25 = vpop.f32.mrf.mxu0  ;;  %v3612_v60 = vpack.c.b16 %v3587_v34, %v3586_v1 }
 0x1ce   : > { %v1751_v7 = vpop.f32.mrf.mxu3  ;;  %v2568_v18 = vrot.slane %v2566_v16, 4 }
 0x1cf   : > { %v1111_v23 = vpop.f32.mrf.mxu1  ;;  %v1792_v61 = vadd.f32 %v1751_v7, %v1499_v36  ;;  %v3360_v36 = vrot.slane %v3358_v50, 4 }
 0x1d0   : > { %5083 = vmatmul.msk.bf16.gmra.mxu0 %vm759_vm3, %v4012_v20  ;;  %v5137_v20 = vld [vmem:[%s5442_s21 + $0x60] sm:$0xff]  ;;  %v2570_v32 = vsel %vm5636_vm7, %v2568_v18, %v2569_v24  ;;  %v1112_v41 = vadd.f32 %v1111_v23, %v5839_v58  ;;  %v6401_v23 = vld [vmem:[%s5442_s21 + $0x7c] sm:$0xf] }
 0x1d1   : > { %v1460_v14 = vpop.f32.mrf.mxu2  ;;  %v6383_v55 = vadd.f32 %v2404_v25, %v1792_v61  ;;  %v3364_v37 = vor.u32 %v3363_v4, %v3360_v36  ;;  %v2567_v25 = vsel %vm5636_vm7, %v4845_v6, %v2566_v16  ;;  %v3377_v61 = vshll.u32 %v5005_v40, 16  ;;  %v5053_v36 = vld [vmem:[%s5442_s21 + $0x6c] sm:$0xe] }
 0x1d2   : > { %4860 = vmatmul.msk.bf16.gmra.mxu1 %vm759_vm3, %v2666_v19  ;;  %v1500_v7 = vadd.f32 %v1460_v14, %v1109_v56  ;;  %v3910_v19 = vsel %vm5636_vm7, %v3908_v62, %v3909_v51  ;;  %v3987_v51 = vunpack.c.l.b16 %v3907_v13  ;;  %v2642_v39 = vunpack.c.l.b16 %v2567_v25  ;;  %v4830_v25 = vld [vmem:[%s5442_s21 + $0x6c] sm:$0xe] }
 0x1d3   : > { %v3988_v56 = vunpack.c.l.b16 %v3910_v19  ;;  %v2643_v62 = vunpack.c.l.b16 %v2570_v32  ;;  %v3365_v14 = vrot.slane %v3364_v37, 4  ;;  %v3913_v16 = vrot.slane %v6361_v15, 5  ;;  %v5245_v32 = vld [vmem:[%s5442_s21 + $0x70] sm:$0xf] }
 0x1d4   : > { %v3379_v24 = vrot.slane %v3377_v61, 5  ;;  %v5069_v58 = vrot.slane %v5053_v36, 9  ;;  %v3916_v13 = vrot.slane %v5005_v40, 5  ;;  %v3382_v61 = vshrl.u32 %v5006_v12, 16  ;;  %v5138_v36 = vld [vmem:[%s5442_s21 + $0x6c] sm:$0xff] }
 0x1d5   : > { %v2406_v52 = vpop.f32.mrf.mxu0  ;;  %v2667_v1 = vpack.c.b16 %v2643_v62, %v2642_v39  ;;  %v3370_v34 = vsel %vm5461_vm4, %v3365_v14, %v3369_v57  ;;  %v3915_v15 = vrot.slane %v3913_v16, 4  ;;  %v4846_v62 = vrot.slane %v4830_v25, 9 }
 0x1d6   : > { %v1753_v50 = vpop.f32.mrf.mxu3  ;;  %4972 = vmatmul.msk.bf16.gmra.mxu2 %vm759_vm3, %v5137_v20  ;;  %v3375_v20 = vrot.slane %v3374_v33, 4  ;;  %v2573_v33 = vrot.slane %v5245_v32, 5  ;;  %v3588_v40 = vunpack.c.l.b16 %v3370_v34  ;;  %v6427_v34 = vld [vmem:[%s5442_s21 + $0x80] sm:$0x1] }
 0x1d7   : > { %v1113_v28 = vpop.f32.mrf.mxu1  ;;  %v1793_v5 = vadd.f32 %v1753_v50, %v1500_v7  ;;  %v4013_v7 = vpack.c.b16 %v3988_v56, %v3987_v51  ;;  %v3917_v39 = vsel %vm5636_vm7, %v3915_v15, %v3916_v13 }
 0x1d8   : > { %v3380_v50 = vsel %vm5461_vm4, %v3375_v20, %v3379_v24  ;;  %v1114_v57 = vadd.f32 %v1113_v28, %v5862_v8  ;;  %v5246_v20 = vld [vmem:[%s5442_s21 + $0x74] sm:$0x1]  ;;  %v3384_v8 = vrot.slane %v3382_v61, 4  ;;  %v3990_v13 = vunpack.c.l.b16 %v3917_v39 }
 0x1d9   : > { %v1463_v30 = vpop.f32.mrf.mxu2  ;;  %v6403_v6 = vadd.f32 %v2406_v52, %v1793_v5  ;;  %v3385_v52 = vshll.u32 %v5006_v12, 16  ;;  %v3391_v5 = vshll.u32 %v6401_v23, 16  ;;  %v3589_v56 = vunpack.c.l.b16 %v3380_v50 }
 0x1da   : > { %v1501_v4 = vadd.f32 %v1463_v30, %v1112_v41  ;;  %v3395_v41 = vshrl.u32 %v6401_v23, 16  ;;  %v3914_v30 = vsel %vm5636_vm7, %v5069_v58, %v3913_v16  ;;  %v2576_v24 = vrot.slane %v5246_v20, 5 }
 0x1db   : > { %5036 = vmatmul.msk.bf16.gmra.mxu3 %vm759_vm3, %v3612_v60  ;;  %v3387_v28 = vrot.slane %v3385_v52, 5  ;;  %v3989_v58 = vunpack.c.l.b16 %v3914_v30  ;;  %v3613_v15 = vpack.c.b16 %v3589_v56, %v3588_v40  ;;  %v3401_v52 = vshll.u32 %v6427_v34, 16  ;;  %v6439_v56 = vld [vmem:[%s5442_s21 + $0x88] sm:$0xf] }
 0x1dd   : > { %v2409_v18 = vpop.f32.mrf.mxu0  ;;  %v3388_v61 = vor.u32 %v3387_v28, %v3384_v8  ;;  %v4014_v30 = vpack.c.b16 %v3990_v13, %v3989_v58  ;;  %v4831_v13 = vld [vmem:[%s5442_s21 + $0x78] sm:$0xe] }
 0x1de   : > { %v1756_v19 = vpop.f32.mrf.mxu3 }
 0x1df   : > { %v1116_v37 = vpop.f32.mrf.mxu1  ;;  %v1794_v60 = vadd.f32 %v1756_v19, %v1501_v4  ;;  %v2575_v4 = vrot.slane %v2573_v33, 4  ;;  %v3389_v39 = vrot.slane %v3388_v61, 4 }
 0x1e0   : > { %5084 = vmatmul.msk.bf16.gmra.mxu0 %vm759_vm3, %v4013_v7  ;;  %v6424_v7 = vrot.slane %v3391_v5, 5  ;;  %v1117_v5 = vadd.f32 %v1116_v37, %v5881_v9  ;;  %v3415_v9 = vshll.u32 %v6439_v56, 16  ;;  %v3419_v37 = vshrl.u32 %v6439_v56, 16 }
 0x1e1   : > { %v1465_v51 = vpop.f32.mrf.mxu2  ;;  %v6422_v12 = vadd.f32 %v2409_v18, %v1794_v60  ;;  %v2574_v18 = vsel %vm5636_vm7, %v4846_v62, %v2573_v33  ;;  %v2577_v25 = vsel %vm5636_vm7, %v2575_v4, %v2576_v24 }
 0x1e2   : > { %4861 = vmatmul.msk.bf16.gmra.mxu1 %vm759_vm3, %v2667_v1  ;;  %v1502_v14 = vadd.f32 %v1465_v51, %v1114_v57  ;;  %v3397_v1 = vrot.slane %v3395_v41, 4  ;;  %v5009_v41 = vld [vmem:[%s5442_s21 + $0x84] sm:$0xf]  ;;  %v2644_v40 = vunpack.c.l.b16 %v2574_v18  ;;  %v2645_v51 = vunpack.c.l.b16 %v2577_v25  ;;  %v5247_v18 = vld [vmem:[%s5442_s21 + $0x7c] sm:$0xf] }
 0x1e3   : > { %v3406_v4 = vshrl.u32 %v5009_v41, 16  ;;  %v3409_v20 = vshll.u32 %v5009_v41, 16  ;;  %v2580_v25 = vrot.slane %v5247_v18, 5  ;;  %v3421_v41 = vrot.slane %v3419_v37, 4 }
 0x1e4   : > { %v3398_v60 = vor.u32 %v3397_v1, %v6424_v7  ;;  %v2668_v28 = vpack.c.b16 %v2645_v51, %v2644_v40  ;;  %v3920_v1 = vrot.slane %v6401_v23, 5  ;;  %v3923_v51 = vrot.slane %v6427_v34, 5 }
 0x1e5   : > { %v2411_v16 = vpop.f32.mrf.mxu0 }
 0x1e6   : > { %v1758_v19 = vpop.f32.mrf.mxu3  ;;  %4973 = vmatmul.msk.bf16.gmra.mxu2 %vm759_vm3, %v5138_v36  ;;  %v3399_v62 = vrot.slane %v3398_v60, 4  ;;  %v5054_v36 = vld [vmem:[%s5442_s21 + $0x78] sm:$0xe]  ;;  %v3394_v60 = vsel %vm5461_vm4, %v3389_v39, %v6424_v7  ;;  %v3922_v40 = vrot.slane %v3920_v1, 4  ;;  %v4847_v7 = vrot.slane %v4831_v13, 9 }
 0x1e7   : > { %v1118_v50 = vpop.f32.mrf.mxu1  ;;  %v1795_v32 = vadd.f32 %v1758_v19, %v1502_v14  ;;  %v3403_v14 = vrot.slane %v3401_v52, 5  ;;  %v3411_v52 = vrot.slane %v3409_v20, 5 }
 0x1e8   : > { %v1119_v23 = vadd.f32 %v1118_v50, %v5898_v47  ;;  %v3590_v47 = vunpack.c.l.b16 %v3394_v60  ;;  %v2581_v18 = vsel %vm5636_vm7, %v4847_v7, %v2580_v25 }
 0x1e9   : > { %v1468_v57 = vpop.f32.mrf.mxu2  ;;  %v6445_v24 = vadd.f32 %v2411_v16, %v1795_v32  ;;  %v3404_v16 = vsel %vm5461_vm4, %v3399_v62, %v3403_v14  ;;  %v3408_v32 = vrot.slane %v3406_v4, 4  ;;  %v5139_v62 = vld [vmem:[%s5442_s21 + $0x78] sm:$0xff]  ;;  %v2582_v14 = vrot.slane %v2580_v25, 4 }
 0x1ea   : > { %v1503_v33 = vadd.f32 %v1468_v57, %v1117_v5  ;;  %v6457_v5 = vrot.slane %v3415_v9, 5  ;;  %v3591_v50 = vunpack.c.l.b16 %v3404_v16  ;;  %v3927_v25 = vrot.slane %v6439_v56, 5 }
 0x1eb   : > { %5037 = vmatmul.msk.bf16.gmra.mxu3 %vm759_vm3, %v3613_v15  ;;  %v5070_v15 = vrot.slane %v5054_v36, 9  ;;  %v5248_v36 = vld [vmem:[%s5442_s21 + $0x80] sm:$0x1]  ;;  %v3412_v9 = vor.u32 %v3411_v52, %v3408_v32 }
 0x1ec   : > { %v3422_v37 = vor.u32 %v3421_v41, %v6457_v5 }
 0x1ed   : > { %v2414_v8 = vpop.f32.mrf.mxu0  ;;  %v3921_v20 = vsel %vm5636_vm7, %v5070_v15, %v3920_v1  ;;  %v3413_v32 = vrot.slane %v3412_v9, 4  ;;  %v3929_v9 = vrot.slane %v3927_v25, 4 }
 0x1ee   : > { %v1761_v58 = vpop.f32.mrf.mxu3  ;;  %v3991_v60 = vunpack.c.l.b16 %v3921_v20 }
 0x1ef   : > { %v2740_v19 = vpop.f32.mrf.mxu1  ;;  %v1796_v61 = vadd.f32 %v1761_v58, %v1503_v33  ;;  %v6462_v33 = vld [vmem:[%s5442_s21 + $0x8c] sm:$0x1]  ;;  %v3924_v58 = vsel %vm5636_vm7, %v3922_v40, %v3923_v51  ;;  %v2646_v40 = vunpack.c.l.b16 %v2581_v18  ;;  %v3418_v56 = vsel %vm5461_vm4, %v3413_v32, %v6457_v5 }
 0x1f0   : > { %5085 = vmatmul.msk.bf16.gmra.mxu0 %vm759_vm3, %v4014_v30  ;;  %v2583_v30 = vrot.slane %v5248_v36, 5  ;;  %v3425_v34 = vshll.u32 %v6462_v33, 16  ;;  %v3992_v16 = vunpack.c.l.b16 %v3924_v58  ;;  %v2820_v41 = vadd.f32 %v2740_v19, %v5915_v59  ;;  %v4832_v58 = vld [vmem:[%s5442_s21 + $0x84] sm:$0xe] }
 0x1f1   : > { %v1470_v57 = vpop.f32.mrf.mxu2  ;;  %v6466_v4 = vadd.f32 %v2414_v8, %v1796_v61  ;;  %v3614_v61 = vpack.c.b16 %v3591_v50, %v3590_v47  ;;  %v6486_v47 = vld [vmem:[%s5442_s21 + $0x94] sm:$0xf] }
 0x1f2   : > { %4862 = vmatmul.msk.bf16.gmra.mxu1 %vm759_vm3, %v2668_v28  ;;  %v1504_v39 = vadd.f32 %v1470_v57, %v1119_v23  ;;  %v2584_v1 = vsel %vm5636_vm7, %v2582_v14, %v2583_v30  ;;  %v3423_v23 = vrot.slane %v3422_v37, 4  ;;  %v3427_v52 = vrot.slane %v3425_v34, 5 }
 0x1f3   : > { %v2647_v51 = vunpack.c.l.b16 %v2584_v1  ;;  %v4015_v14 = vpack.c.b16 %v3992_v16, %v3991_v60  ;;  %v3930_v30 = vrot.slane %v6462_v33, 5  ;;  %v3439_v5 = vshll.u32 %v6486_v47, 16 }
 0x1f4   : > { %v3428_v20 = vsel %vm5461_vm4, %v3423_v23, %v3427_v52  ;;  %v3592_v60 = vunpack.c.l.b16 %v3418_v56  ;;  %v6510_v52 = vld [vmem:[%s6905_s3] ss:$0 sm:$0xff] }
 0x1f5   : > { %v2416_v28 = vpop.f32.mrf.mxu0  ;;  %v2669_v19 = vpack.c.b16 %v2647_v51, %v2646_v40  ;;  %v3593_v16 = vunpack.c.l.b16 %v3428_v20  ;;  %v3931_v40 = vsel %vm5636_vm7, %v3929_v9, %v3930_v30  ;;  %v4848_v51 = vrot.slane %v4832_v58, 9  ;;  %v6528_v9 = vld [vmem:[%s5442_s21 + $0x98] sm:$0x1] }
 0x1f6   : > { %v1763_v13 = vpop.f32.mrf.mxu3  ;;  %4974 = vmatmul.msk.bf16.gmra.mxu2 %vm759_vm3, %v5139_v62  ;;  %v5055_v62 = vld [vmem:[%s5442_s21 + $0x84] sm:$0xe] }
 0x1f7   : > { %v2742_v8 = vpop.f32.mrf.mxu1  ;;  %v1797_v15 = vadd.f32 %v1763_v13, %v1504_v39  ;;  %v5012_v39 = vld [vmem:[%s5442_s21 + $0x90] sm:$0xf]  ;;  %v5071_v36 = vrot.slane %v5055_v62, 9  ;;  %v5249_v13 = vld [vmem:[%s5442_s21 + $0x88] sm:$0xf]  ;;  %v3615_v58 = vpack.c.b16 %v3593_v16, %v3592_v60 }
 0x1f8   : > { %v2587_v18 = vrot.slane %v5249_v13, 5  ;;  %v3430_v33 = vshrl.u32 %v5012_v39, 16  ;;  %v3433_v1 = vshll.u32 %v5012_v39, 16  ;;  %v5140_v62 = vld [vmem:[%s5442_s21 + $0x84] sm:$0xff] }
 0x1f9   : > { %v3029_v57 = vpop.f32.mrf.mxu2  ;;  %v6488_v50 = vadd.f32 %v2416_v28, %v1797_v15  ;;  %v6500_v15 = vld [vmem:[%s6904_s2] ss:$0 sm:$0xff]  ;;  %v3928_v32 = vsel %vm5636_vm7, %v5071_v36, %v3927_v25 }
 0x1fa   : > { %v3109_v7 = vadd.f32 %v3029_v57, %v2820_v41  ;;  %v2821_v41 = vadd.f32 %v2742_v8, %v5928_v46  ;;  %v2589_v25 = vrot.slane %v2587_v18, 4  ;;  %v3435_v36 = vrot.slane %v3433_v1, 5 }
 0x1fb   : > { %5038 = vmatmul.msk.bf16.gmra.mxu3 %vm759_vm3, %v3614_v61  ;;  %v3443_v61 = vshrl.u32 %v6486_v47, 16  ;;  %v6520_v46 = vrot.slane %v3439_v5, 5  ;;  %v2588_v20 = vsel %vm5636_vm7, %v4848_v51, %v2587_v18  ;;  %v3993_v13 = vunpack.c.l.b16 %v3928_v32 }
 0x1fc   : > { %v3449_v18 = vshll.u32 %v6528_v9, 16 }
 0x1fd   : > { %v4083_v59 = vpop.f32.mrf.mxu0  ;;  %v3445_v8 = vrot.slane %v3443_v61, 4 }
 0x1fe   : > { %v3686_v37 = vpop.f32.mrf.mxu3 }
 0x1ff   : > { %v2745_v34 = vpop.f32.mrf.mxu1  ;;  %v3766_v28 = vadd.f32 %v3686_v37, %v3109_v7  ;;  %v5250_v7 = vld [vmem:[%s5442_s21 + $0x8c] sm:$0x1] }
 0x200   : > { %5086 = vmatmul.msk.bf16.gmra.mxu0 %vm759_vm3, %v4015_v14  ;;  %v2590_v39 = vrot.slane %v5250_v7, 5  ;;  %v3432_v14 = vrot.slane %v3430_v33, 4  ;;  %v3994_v33 = vunpack.c.l.b16 %v3931_v40  ;;  %v2822_v60 = vadd.f32 %v2745_v34, %v5941_v29  ;;  %v5015_v40 = vld [vmem:[%s5442_s21 + $0x9c] sm:$0xf] }
 0x201   : > { %v4163_v23 = vadd.f32 %v4083_v59, %v3766_v28  ;;  %v3031_v57 = vpop.f32.mrf.mxu2  ;;  %v3451_v29 = vrot.slane %v3449_v18, 5  ;;  %v3934_v34 = vrot.slane %v6486_v47, 5 }
 0x202   : > { %4863 = vmatmul.msk.bf16.gmra.mxu1 %vm759_vm3, %v2669_v19  ;;  %v3110_v56 = vadd.f32 %v3031_v57, %v2821_v41  ;;  %v2591_v28 = vsel %vm5636_vm7, %v2589_v25, %v2590_v39  ;;  %v3446_v41 = vor.u32 %v3445_v8, %v6520_v46  ;;  %v2648_v57 = vunpack.c.l.b16 %v2588_v20 }
 0x203   : > { %v4199_v59 = vmul.f32 %v6500_v15, %v4163_v23  ;;  %v3436_v23 = vor.u32 %v3435_v36, %v3432_v14  ;;  %v2649_v32 = vunpack.c.l.b16 %v2591_v28  ;;  %v4016_v7 = vpack.c.b16 %v3994_v33, %v3993_v13  ;;  %v4833_v28 = vld [vmem:[%s5442_s21 + $0x90] sm:$0xe] }
 0x204   : > { %v3447_v36 = vrot.slane %v3446_v41, 4  ;;  %v3454_v8 = vshrl.u32 %v5015_v40, 16 }
 0x205   : > { %v4235_v19 = vadd.f32 %v6510_v52, %v4199_v59  ;;  %v4085_v30 = vpop.f32.mrf.mxu0  ;;  %v3437_v14 = vrot.slane %v3436_v23, 4  ;;  %v5056_v59 = vld [vmem:[%s5442_s21 + $0x90] sm:$0xe] }
 0x206   : > { %v3688_v37 = vpop.f32.mrf.mxu3  ;;  %4975 = vmatmul.msk.bf16.gmra.mxu2 %vm759_vm3, %v5140_v62 }
 0x207   : > { %v2747_v1 = vpop.f32.mrf.mxu1  ;;  %v4267_v5 = vmax.f32 %v4235_v19, 0.0  ;;  %v3767_v61 = vadd.f32 %v3688_v37, %v3110_v56  ;;  %v6544_v56 = vld [vmem:[%s5442_s21 + $0xa0] sm:$0xf]  ;;  %v3457_v19 = vshll.u32 %v5015_v40, 16  ;;  %v2670_v37 = vpack.c.b16 %v2649_v32, %v2648_v57 }
 0x208   : > { %v3463_v23 = vshll.u32 %v6544_v56, 16  ;;  %v3467_v41 = vshrl.u32 %v6544_v56, 16  ;;  %v3442_v47 = vsel %vm5461_vm4, %v3437_v14, %v6520_v46  ;;  %v3937_v57 = vrot.slane %v6528_v9, 5  ;;  %v5141_v14 = vld [vmem:[%s5442_s21 + $0x90] sm:$0xff] }
 0x209   : > { %v4299_v51 = vmin.f32 %v4267_v5, 6.0  ;;  %v4164_v62 = vadd.f32 %v4085_v30, %v3767_v61  ;;  %v3034_v16 = vpop.f32.mrf.mxu2  ;;  %v5251_v5 = vld [vmem:[%s5442_s21 + $0x94] sm:$0xf]  ;;  %v3459_v32 = vrot.slane %v3457_v19, 5  ;;  %v4849_v46 = vrot.slane %v4833_v28, 9 }
 0x20a   : > { %v3111_v39 = vadd.f32 %v3034_v16, %v2822_v60  ;;  %v2594_v61 = vrot.slane %v5251_v5, 5  ;;  %v3936_v60 = vrot.slane %v3934_v34, 4  ;;  %v3456_v16 = vrot.slane %v3454_v8, 4  ;;  %v6568_v5 = vld [vmem:[%s5442_s21 + $0xa4] sm:$0x1] }
 0x20b   : > { %4331 = vst [vmem:[%s6537_s24] sm:$0xff] %v4299_v51  ;;  %v4200_v25 = vmul.f32 %v6500_v15, %v4164_v62  ;;  %5039 = vmatmul.msk.bf16.gmra.mxu3 %vm759_vm3, %v3615_v58  ;;  %v5072_v58 = vrot.slane %v5056_v59, 9  ;;  %v3452_v62 = vsel %vm5461_vm4, %v3447_v36, %v3451_v29  ;;  %v3469_v36 = vrot.slane %v3467_v41, 4 }
 0x20c   : > { %v2596_v9 = vrot.slane %v2594_v61, 4  ;;  %v3594_v19 = vunpack.c.l.b16 %v3442_v47  ;;  %v3938_v28 = vsel %vm5636_vm7, %v3936_v60, %v3937_v57  ;;  %v3460_v47 = vor.u32 %v3459_v32, %v3456_v16  ;;  %v6585_v16 = vld [vmem:[%s5442_s21 + $0xac] sm:$0xf] }
 0x20d   : > { %v4236_v30 = vadd.f32 %v6510_v52, %v4200_v25  ;;  %v4088_v20 = vpop.f32.mrf.mxu0 }
 0x20e   : > { %v3691_v13 = vpop.f32.mrf.mxu3  ;;  %v3461_v32 = vrot.slane %v3460_v47, 4 }
 0x20f   : > { %v2750_v33 = vpop.f32.mrf.mxu1  ;;  %v4268_v18 = vmax.f32 %v4236_v30, 0.0  ;;  %v3768_v51 = vadd.f32 %v3691_v13, %v3111_v39  ;;  %v2823_v39 = vadd.f32 %v2747_v1, %v5954_v35  ;;  %v5252_v30 = vld [vmem:[%s5442_s21 + $0x98] sm:$0x1]  ;;  %v6563_v13 = vrot.slane %v3463_v23, 5 }
 0x210   : > { %5087 = vmatmul.msk.bf16.gmra.mxu0 %vm759_vm3, %v4016_v7  ;;  %v2597_v7 = vrot.slane %v5252_v30, 5  ;;  %v2595_v23 = vsel %vm5636_vm7, %v4849_v46, %v2594_v61 }
 0x211   : > { %v4300_v40 = vmin.f32 %v4268_v18, 6.0  ;;  %v4165_v25 = vadd.f32 %v4088_v20, %v3768_v51  ;;  %v3036_v59 = vpop.f32.mrf.mxu2  ;;  %v3595_v20 = vunpack.c.l.b16 %v3452_v62  ;;  %v3470_v62 = vor.u32 %v3469_v36, %v6563_v13 }
 0x212   : > { %4864 = vmatmul.msk.bf16.gmra.mxu1 %vm759_vm3, %v2670_v37  ;;  %v3112_v8 = vadd.f32 %v3036_v59, %v2823_v39  ;;  %v3935_v37 = vsel %vm5636_vm7, %v5072_v58, %v3934_v34  ;;  %v2598_v51 = vsel %vm5636_vm7, %v2596_v9, %v2597_v7  ;;  %v3473_v34 = vshll.u32 %v6568_v5, 16  ;;  %v5018_v39 = vld [vmem:[%s5442_s21 + $0xa8] sm:$0xf] }
 0x213   : > { %4332 = vst [vmem:[%s6537_s24 + $0x8] sm:$0xff] %v4300_v40  ;;  %v4201_v29 = vmul.f32 %v6500_v15, %v4165_v25  ;;  %v3616_v57 = vpack.c.b16 %v3595_v20, %v3594_v19  ;;  %v3995_v60 = vunpack.c.l.b16 %v3935_v37  ;;  %v3996_v25 = vunpack.c.l.b16 %v3938_v28  ;;  %v5057_v19 = vld [vmem:[%s5442_s21 + $0x9c] sm:$0xe] }
 0x214   : > { %v2650_v61 = vunpack.c.l.b16 %v2595_v23  ;;  %v2651_v30 = vunpack.c.l.b16 %v2598_v51  ;;  %v3471_v7 = vrot.slane %v3470_v62, 4  ;;  %v3475_v36 = vrot.slane %v3473_v34, 5 }
 0x215   : > { %v4237_v35 = vadd.f32 %v6510_v52, %v4201_v29  ;;  %v4090_v1 = vpop.f32.mrf.mxu0  ;;  %v3478_v20 = vshrl.u32 %v5018_v39, 16  ;;  %v3491_v37 = vshrl.u32 %v6585_v16, 16  ;;  %v3466_v62 = vsel %vm5461_vm4, %v3461_v32, %v6563_v13 }
 0x216   : > { %v3693_v41 = vpop.f32.mrf.mxu3  ;;  %4976 = vmatmul.msk.bf16.gmra.mxu2 %vm759_vm3, %v5141_v14  ;;  %v2824_v14 = vadd.f32 %v2750_v33, %v5967_v3  ;;  %v3941_v3 = vrot.slane %v6544_v56, 5  ;;  %v3487_v33 = vshll.u32 %v6585_v16, 16  ;;  %v3476_v34 = vsel %vm5461_vm4, %v3471_v7, %v3475_v36  ;;  %v5253_v56 = vld [vmem:[%s5442_s21 + $0xa0] sm:$0xf] }
 0x217   : > { %v2752_v18 = vpop.f32.mrf.mxu1  ;;  %v4269_v58 = vmax.f32 %v4237_v35, 0.0  ;;  %v3769_v40 = vadd.f32 %v3693_v41, %v3112_v8  ;;  %v3481_v35 = vshll.u32 %v5018_v39, 16  ;;  %v2671_v41 = vpack.c.b16 %v2651_v30, %v2650_v61 }
 0x218   : > { %v3480_v39 = vrot.slane %v3478_v20, 4  ;;  %v3943_v61 = vrot.slane %v3941_v3, 4  ;;  %v3489_v13 = vrot.slane %v3487_v33, 5  ;;  %v2825_v32 = vadd.f32 %v2752_v18, %v5980_v10 }
 0x219   : > { %v4301_v59 = vmin.f32 %v4269_v58, 6.0  ;;  %v4166_v46 = vadd.f32 %v4090_v1, %v3769_v40  ;;  %v3039_v9 = vpop.f32.mrf.mxu2  ;;  %v4017_v1 = vpack.c.b16 %v3996_v25, %v3995_v60  ;;  %v5073_v58 = vrot.slane %v5057_v19, 9  ;;  %v4834_v40 = vld [vmem:[%s5442_s21 + $0x9c] sm:$0xe] }
 0x21a   : > { %v3113_v8 = vadd.f32 %v3039_v9, %v2824_v14  ;;  %v3493_v14 = vrot.slane %v3491_v37, 4  ;;  %v4850_v36 = vrot.slane %v4834_v40, 9  ;;  %v3596_v19 = vunpack.c.l.b16 %v3466_v62 }
 0x21b   : > { %4333 = vst [vmem:[%s6537_s24 + $0x10] sm:$0xff] %v4301_v59  ;;  %v4202_v29 = vmul.f32 %v6500_v15, %v4166_v46  ;;  %5040 = vmatmul.msk.bf16.gmra.mxu3 %vm759_vm3, %v3616_v57  ;;  %v2601_v57 = vrot.slane %v5253_v56, 5  ;;  %v3483_v59 = vrot.slane %v3481_v35, 5  ;;  %v3944_v46 = vrot.slane %v6568_v5, 5 }
 0x21c   : > { %v3597_v20 = vunpack.c.l.b16 %v3476_v34  ;;  %v3942_v10 = vsel %vm5636_vm7, %v5073_v58, %v3941_v3  ;;  %v3494_v18 = vor.u32 %v3493_v14, %v3489_v13 }
 0x21d   : > { %v4238_v28 = vadd.f32 %v6510_v52, %v4202_v29  ;;  %v4093_v23 = vpop.f32.mrf.mxu0  ;;  %v6607_v29 = vld [vmem:[%s5442_s21 + $0xb0] sm:$0x1]  ;;  %v2603_v35 = vrot.slane %v2601_v57, 4  ;;  %v3484_v37 = vor.u32 %v3483_v59, %v3480_v39  ;;  %v3945_v62 = vsel %vm5636_vm7, %v3943_v61, %v3944_v46 }
 0x21e   : > { %v3696_v51 = vpop.f32.mrf.mxu3  ;;  %v2602_v34 = vsel %vm5636_vm7, %v4850_v36, %v2601_v57  ;;  %v3617_v56 = vpack.c.b16 %v3597_v20, %v3596_v19  ;;  %v3997_v39 = vunpack.c.l.b16 %v3942_v10  ;;  %v3998_v14 = vunpack.c.l.b16 %v3945_v62  ;;  %v5058_v10 = vld [vmem:[%s5442_s21 + $0xa8] sm:$0xe]  ;;  %v5255_v62 = vld [vmem:[%s5442_s21 + $0xac] sm:$0xf] }
 0x21f   : > { %v2755_v47 = vpop.f32.mrf.mxu1  ;;  %v4270_v60 = vmax.f32 %v4238_v28, 0.0  ;;  %v3770_v25 = vadd.f32 %v3696_v51, %v3113_v8  ;;  %v5142_v8 = vld [vmem:[%s5442_s21 + $0x9c] sm:$0xff]  ;;  %v3485_v59 = vrot.slane %v3484_v37, 4  ;;  %v3495_v61 = vrot.slane %v3494_v18, 4 }
 0x220   : > { %5088 = vmatmul.msk.bf16.gmra.mxu0 %vm759_vm3, %v4017_v1  ;;  %v5254_v1 = vld [vmem:[%s5442_s21 + $0xa4] sm:$0x1] }
 0x221   : > { %v4302_v9 = vmin.f32 %v4270_v60, 6.0  ;;  %v4167_v30 = vadd.f32 %v4093_v23, %v3770_v25  ;;  %v3041_v7 = vpop.f32.mrf.mxu2  ;;  %v2604_v28 = vrot.slane %v5254_v1, 5  ;;  %v3497_v23 = vshll.u32 %v6607_v29, 16 }
 0x222   : > { %4865 = vmatmul.msk.bf16.gmra.mxu1 %vm759_vm3, %v2671_v41  ;;  %v3114_v33 = vadd.f32 %v3041_v7, %v2825_v32  ;;  %v2826_v32 = vadd.f32 %v2755_v47, %v5993_v45  ;;  %v3490_v20 = vsel %vm5461_vm4, %v3485_v59, %v3489_v13  ;;  %v4018_v1 = vpack.c.b16 %v3998_v14, %v3997_v39 }
 0x223   : > { %4334 = vst [vmem:[%s6537_s24 + $0x18] sm:$0xff] %v4302_v9  ;;  %v4203_v5 = vmul.f32 %v6500_v15, %v4167_v30  ;;  %v2605_v3 = vsel %vm5636_vm7, %v2603_v35, %v2604_v28  ;;  %v2652_v9 = vunpack.c.l.b16 %v2602_v34  ;;  %v3499_v46 = vrot.slane %v3497_v23, 5  ;;  %v5021_v35 = vld [vmem:[%s5442_s21 + $0xb4] sm:$0xf] }
 0x224   : > { %v2653_v36 = vunpack.c.l.b16 %v2605_v3  ;;  %v3948_v28 = vrot.slane %v6585_v16, 5  ;;  %v2608_v13 = vrot.slane %v5255_v62, 5  ;;  %v3502_v34 = vshrl.u32 %v5021_v35, 16 }
 0x225   : > { %v4239_v41 = vadd.f32 %v6510_v52, %v4203_v5  ;;  %v4095_v51 = vpop.f32.mrf.mxu0  ;;  %v6633_v5 = vld [vmem:[%s5442_s21 + $0xb8] sm:$0xf]  ;;  %v3500_v37 = vsel %vm5461_vm4, %v3495_v61, %v3499_v46  ;;  %v5074_v39 = vrot.slane %v5058_v10, 9  ;;  %v3951_v14 = vrot.slane %v6607_v29, 5 }
 0x226   : > { %v3698_v40 = vpop.f32.mrf.mxu3  ;;  %4977 = vmatmul.msk.bf16.gmra.mxu2 %vm759_vm3, %v5142_v8  ;;  %v3511_v3 = vshll.u32 %v6633_v5, 16  ;;  %v3950_v59 = vrot.slane %v3948_v28, 4 }
 0x227   : > { %v2757_v60 = vpop.f32.mrf.mxu1  ;;  %v4271_v58 = vmax.f32 %v4239_v41, 0.0  ;;  %v3771_v25 = vadd.f32 %v3698_v40, %v3114_v33  ;;  %v2672_v33 = vpack.c.b16 %v2653_v36, %v2652_v9  ;;  %v3598_v41 = vunpack.c.l.b16 %v3490_v20  ;;  %v5256_v36 = vld [vmem:[%s5442_s21 + $0xb0] sm:$0x1] }
 0x228   : > { %v3505_v40 = vshll.u32 %v5021_v35, 16  ;;  %v2827_v46 = vadd.f32 %v2757_v60, %v6006_v44  ;;  %v6651_v29 = vrot.slane %v3511_v3, 5 }
 0x229   : > { %v4303_v57 = vmin.f32 %v4271_v58, 6.0  ;;  %v4168_v30 = vadd.f32 %v4095_v51, %v3771_v25  ;;  %v3044_v7 = vpop.f32.mrf.mxu2  ;;  %v4835_v51 = vld [vmem:[%s5442_s21 + $0xa8] sm:$0xe]  ;;  %v3515_v58 = vshrl.u32 %v6633_v5, 16  ;;  %v3599_v25 = vunpack.c.l.b16 %v3500_v37 }
 0x22a   : > { %v3115_v19 = vadd.f32 %v3044_v7, %v2826_v32  ;;  %v5143_v32 = vld [vmem:[%s5442_s21 + $0xa8] sm:$0xff]  ;;  %v2610_v7 = vrot.slane %v2608_v13, 4  ;;  %v3507_v20 = vrot.slane %v3505_v40, 5  ;;  %v3952_v37 = vsel %vm5636_vm7, %v3950_v59, %v3951_v14 }
 0x22b   : > { %4335 = vst [vmem:[%s6537_s24 + $0x20] sm:$0xff] %v4303_v57  ;;  %v4204_v8 = vmul.f32 %v6500_v15, %v4168_v30  ;;  %5041 = vmatmul.msk.bf16.gmra.mxu3 %vm759_vm3, %v3617_v56  ;;  %v4851_v30 = vrot.slane %v4835_v51, 9  ;;  %v3618_v51 = vpack.c.b16 %v3599_v25, %v3598_v41 }
 0x22d   : > { %v4240_v45 = vadd.f32 %v6510_v52, %v4204_v8  ;;  %v4098_v47 = vpop.f32.mrf.mxu0  ;;  %v2611_v8 = vrot.slane %v5256_v36, 5  ;;  %v2609_v10 = vsel %vm5636_vm7, %v4851_v30, %v2608_v13  ;;  %v4000_v13 = vunpack.c.l.b16 %v3952_v37  ;;  %v6674_v36 = vld [vmem:[%s5442_s21 + $0xc4] sm:$0xf]  ;;  %v4836_v37 = vld [vmem:[%s5442_s21 + $0xb4] sm:$0xe] }
 0x22e   : > { %v3701_v18 = vpop.f32.mrf.mxu3 }
 0x22f   : > { %v2760_v23 = vpop.f32.mrf.mxu1  ;;  %v4272_v16 = vmax.f32 %v4240_v45, 0.0  ;;  %v3772_v56 = vadd.f32 %v3701_v18, %v3115_v19  ;;  %v3504_v19 = vrot.slane %v3502_v34, 4  ;;  %v3517_v45 = vrot.slane %v3515_v58, 4 }
 0x230   : > { %5089 = vmatmul.msk.bf16.gmra.mxu0 %vm759_vm3, %v4018_v1  ;;  %v2612_v34 = vsel %vm5636_vm7, %v2610_v7, %v2611_v8  ;;  %v2828_v25 = vadd.f32 %v2760_v23, %v6019_v53  ;;  %v3955_v53 = vrot.slane %v6633_v5, 5 }
 0x231   : > { %v4304_v9 = vmin.f32 %v4272_v16, 6.0  ;;  %v4169_v61 = vadd.f32 %v4098_v47, %v3772_v56  ;;  %v3046_v57 = vpop.f32.mrf.mxu2  ;;  %v6654_v47 = vld [vmem:[%s5442_s21 + $0xbc] sm:$0x1]  ;;  %v3508_v40 = vor.u32 %v3507_v20, %v3504_v19  ;;  %v5059_v19 = vld [vmem:[%s5442_s21 + $0xb4] sm:$0xe] }
 0x232   : > { %4866 = vmatmul.msk.bf16.gmra.mxu1 %vm759_vm3, %v2672_v33  ;;  %v3116_v1 = vadd.f32 %v3046_v57, %v2827_v46  ;;  %v3949_v33 = vsel %vm5636_vm7, %v5074_v39, %v3948_v28  ;;  %v3518_v28 = vor.u32 %v3517_v45, %v6651_v29  ;;  %v3521_v3 = vshll.u32 %v6654_v47, 16 }
 0x233   : > { %4336 = vst [vmem:[%s6537_s24 + $0x28] sm:$0xff] %v4304_v9  ;;  %v4205_v35 = vmul.f32 %v6500_v15, %v4169_v61  ;;  %v3999_v58 = vunpack.c.l.b16 %v3949_v33  ;;  %v2654_v39 = vunpack.c.l.b16 %v2609_v10  ;;  %v2655_v9 = vunpack.c.l.b16 %v2612_v34  ;;  %v5024_v61 = vld [vmem:[%s5442_s21 + $0xc0] sm:$0xf]  ;;  %v5257_v10 = vld [vmem:[%s5442_s21 + $0xb8] sm:$0xf] }
 0x234   : > { %v3509_v46 = vrot.slane %v3508_v40, 4  ;;  %v3523_v7 = vrot.slane %v3521_v3, 5  ;;  %v3526_v23 = vshrl.u32 %v5024_v61, 16  ;;  %v3529_v20 = vshll.u32 %v5024_v61, 16  ;;  %v5258_v61 = vld [vmem:[%s5442_s21 + $0xbc] sm:$0x1] }
 0x235   : > { %v4241_v44 = vadd.f32 %v6510_v52, %v4205_v35  ;;  %v4100_v60 = vpop.f32.mrf.mxu0  ;;  %v4019_v8 = vpack.c.b16 %v4000_v13, %v3999_v58  ;;  %v2673_v45 = vpack.c.b16 %v2655_v9, %v2654_v39  ;;  %v3539_v34 = vshrl.u32 %v6674_v36, 16 }
 0x236   : > { %v3703_v18 = vpop.f32.mrf.mxu3  ;;  %4978 = vmatmul.msk.bf16.gmra.mxu2 %vm759_vm3, %v5143_v32  ;;  %v3519_v32 = vrot.slane %v3518_v28, 4  ;;  %v3514_v33 = vsel %vm5461_vm4, %v3509_v46, %v6651_v29  ;;  %v3957_v28 = vrot.slane %v3955_v53, 4  ;;  %v3958_v29 = vrot.slane %v6654_v47, 5 }
 0x237   : > { %v2762_v62 = vpop.f32.mrf.mxu1  ;;  %v4273_v16 = vmax.f32 %v4241_v44, 0.0  ;;  %v3773_v56 = vadd.f32 %v3703_v18, %v3116_v1  ;;  %v2615_v18 = vrot.slane %v5257_v10, 5  ;;  %v3528_v3 = vrot.slane %v3526_v23, 4 }
 0x238   : > { %v3531_v58 = vrot.slane %v3529_v20, 5  ;;  %v2618_v46 = vrot.slane %v5258_v61, 5  ;;  %v3959_v20 = vsel %vm5636_vm7, %v3957_v28, %v3958_v29  ;;  %v6916_v28 = vld [vmem:[#allocation5_spill] sm:$0xff] }
 0x239   : > { %v4305_v59 = vmin.f32 %v4273_v16, 6.0  ;;  %v4170_v41 = vadd.f32 %v4100_v60, %v3773_v56  ;;  %v3049_v14 = vpop.f32.mrf.mxu2  ;;  %v3524_v16 = vsel %vm5461_vm4, %v3519_v32, %v3523_v7  ;;  %v5075_v56 = vrot.slane %v5059_v19, 9  ;;  %v6699_v19 = vld [vmem:[%s5442_s21 + $0xc8] sm:$0x1] }
 0x23a   : > { %v3117_v30 = vadd.f32 %v3049_v14, %v2828_v25  ;;  %v4852_v25 = vrot.slane %v4836_v37, 9  ;;  %v5144_v14 = vld [vmem:[%s5442_s21 + $0xb4] sm:$0xff]  ;;  %v2617_v9 = vrot.slane %v2615_v18, 4  ;;  %v3600_v7 = vunpack.c.l.b16 %v3514_v33 }
 0x23b   : > { %4337 = vst [vmem:[%s6537_s24 + $0x30] sm:$0xff] %v4305_v59  ;;  %v4206_v57 = vmul.f32 %v6500_v15, %v4170_v41  ;;  %5042 = vmatmul.msk.bf16.gmra.mxu3 %vm759_vm3, %v3618_v51  ;;  %v3535_v51 = vshll.u32 %v6674_v36, 16  ;;  %v2829_v59 = vadd.f32 %v2762_v62, %v6033_v21  ;;  %v3956_v23 = vsel %vm5636_vm7, %v5075_v56, %v3955_v53 }
 0x23c   : > { %v3532_v33 = vor.u32 %v3531_v58, %v3528_v3  ;;  %v3545_v10 = vshll.u32 %v6699_v19, 16 }
 0x23d   : > { %v4242_v35 = vadd.f32 %v6510_v52, %v4206_v57  ;;  %v4103_v1 = vpop.f32.mrf.mxu0  ;;  %v6694_v57 = vrot.slane %v3535_v51, 5 }
 0x23e   : > { %v3706_v44 = vpop.f32.mrf.mxu3  ;;  %v3533_v58 = vrot.slane %v3532_v33, 4 }
 0x23f   : > { %v2765_v60 = vpop.f32.mrf.mxu1  ;;  %v4274_v5 = vmax.f32 %v4242_v35, 0.0  ;;  %v3774_v40 = vadd.f32 %v3706_v44, %v3117_v30  ;;  %v3541_v30 = vrot.slane %v3539_v34, 4  ;;  %v2616_v35 = vsel %vm5636_vm7, %v4852_v25, %v2615_v18 }
 0x240   : > { %5090 = vmatmul.msk.bf16.gmra.mxu0 %vm759_vm3, %v4019_v8  ;;  %v3601_v8 = vunpack.c.l.b16 %v3524_v16  ;;  %v2619_v44 = vsel %vm5636_vm7, %v2617_v9, %v2618_v46  ;;  %v2656_v18 = vunpack.c.l.b16 %v2616_v35  ;;  %v2830_v29 = vadd.f32 %v2765_v60, %v6916_v28 }
 0x241   : > { %v4306_v13 = vmin.f32 %v4274_v5, 6.0  ;;  %v4171_v39 = vadd.f32 %v4103_v1, %v3774_v40  ;;  %v3051_v41 = vpop.f32.mrf.mxu2  ;;  %v3542_v37 = vor.u32 %v3541_v30, %v6694_v57  ;;  %v4001_v5 = vunpack.c.l.b16 %v3956_v23 }
 0x242   : > { %4867 = vmatmul.msk.bf16.gmra.mxu1 %vm759_vm3, %v2673_v45  ;;  %v3118_v32 = vadd.f32 %v3051_v41, %v2829_v59  ;;  %v3619_v34 = vpack.c.b16 %v3601_v8, %v3600_v7  ;;  %v4002_v40 = vunpack.c.l.b16 %v3959_v20  ;;  %v2657_v3 = vunpack.c.l.b16 %v2619_v44  ;;  %v4837_v20 = vld [vmem:[%s5442_s21 + $0xc0] sm:$0xe] }
 0x243   : > { %4338 = vst [vmem:[%s6537_s24 + $0x38] sm:$0xff] %v4306_v13  ;;  %v4207_v47 = vmul.f32 %v6500_v15, %v4171_v39  ;;  %v3543_v39 = vrot.slane %v3542_v37, 4  ;;  %v3547_v59 = vrot.slane %v3545_v10, 5  ;;  %v3962_v9 = vrot.slane %v6674_v36, 5  ;;  %v5259_v36 = vld [vmem:[%s5442_s21 + $0xc4] sm:$0xf] }
 0x244   : > { %v4020_v61 = vpack.c.b16 %v4002_v40, %v4001_v5  ;;  %v2674_v30 = vpack.c.b16 %v2657_v3, %v2656_v18  ;;  %v2622_v35 = vrot.slane %v5259_v36, 5  ;;  %v3965_v37 = vrot.slane %v6699_v19, 5 }
 0x245   : > { %v4243_v21 = vadd.f32 %v6510_v52, %v4207_v47  ;;  %v4105_v62 = vpop.f32.mrf.mxu0  ;;  %v5027_v47 = vld [vmem:[%s5442_s21 + $0xcc] sm:$0xf]  ;;  %v3964_v33 = vrot.slane %v3962_v9, 4 }
 0x246   : > { %v3708_v1 = vpop.f32.mrf.mxu3  ;;  %4979 = vmatmul.msk.bf16.gmra.mxu2 %vm759_vm3, %v5144_v14  ;;  %v5060_v14 = vld [vmem:[%s5442_s21 + $0xc0] sm:$0xe]  ;;  %v3550_v10 = vshrl.u32 %v5027_v47, 16 }
 0x247   : > { %v2767_v45 = vpop.f32.mrf.mxu1  ;;  %v4275_v53 = vmax.f32 %v4243_v21, 0.0  ;;  %v3775_v51 = vadd.f32 %v3708_v1, %v3118_v32  ;;  %v6722_v32 = vld [vmem:[%s5442_s21 + $0xd0] sm:$0xf]  ;;  %v3538_v21 = vsel %vm5461_vm4, %v3533_v58, %v6694_v57  ;;  %v5076_v23 = vrot.slane %v5060_v14, 9 }
 0x248   : > { %v3559_v57 = vshll.u32 %v6722_v32, 16  ;;  %v2831_v40 = vadd.f32 %v2767_v45, %v6080_v54  ;;  %v3602_v19 = vunpack.c.l.b16 %v3538_v21  ;;  %v3966_v54 = vsel %vm5636_vm7, %v3964_v33, %v3965_v37 }
 0x249   : > { %v4307_v16 = vmin.f32 %v4275_v53, 6.0  ;;  %v4172_v56 = vadd.f32 %v4105_v62, %v3775_v51  ;;  %v3054_v13 = vpop.f32.mrf.mxu2  ;;  %v3548_v62 = vsel %vm5461_vm4, %v3543_v39, %v3547_v59  ;;  %v3553_v53 = vshll.u32 %v5027_v47, 16 }
 0x24a   : > { %v3119_v25 = vadd.f32 %v3054_v13, %v2830_v29  ;;  %v3563_v51 = vshrl.u32 %v6722_v32, 16  ;;  %v3603_v28 = vunpack.c.l.b16 %v3548_v62  ;;  %v2624_v29 = vrot.slane %v2622_v35, 4  ;;  %v5260_v13 = vld [vmem:[%s5442_s21 + $0xc8] sm:$0x1] }
 0x24b   : > { %4339 = vst [vmem:[%s6537_s24 + $0x40] sm:$0xff] %v4307_v16  ;;  %v4208_v41 = vmul.f32 %v6500_v15, %v4172_v56  ;;  %5043 = vmatmul.msk.bf16.gmra.mxu3 %vm759_vm3, %v3619_v34  ;;  %v4853_v16 = vrot.slane %v4837_v20, 9  ;;  %v5145_v56 = vld [vmem:[%s5442_s21 + $0xc0] sm:$0xff]  ;;  %v2625_v3 = vrot.slane %v5260_v13, 5  ;;  %v3963_v59 = vsel %vm5636_vm7, %v5076_v23, %v3962_v9  ;;  %v5061_v13 = vld [vmem:[%s5442_s21 + $0xcc] sm:$0xe] }
 0x24c   : > { %v3552_v45 = vrot.slane %v3550_v10, 4  ;;  %v3565_v14 = vrot.slane %v3563_v51, 4  ;;  %v4003_v20 = vunpack.c.l.b16 %v3963_v59  ;;  %v4004_v36 = vunpack.c.l.b16 %v3966_v54 }
 0x24d   : > { %v4244_v60 = vadd.f32 %v6510_v52, %v4208_v41  ;;  %v4108_v46 = vpop.f32.mrf.mxu0  ;;  %v3555_v41 = vrot.slane %v3553_v53, 5  ;;  %v2626_v21 = vsel %vm5636_vm7, %v2624_v29, %v2625_v3  ;;  %v3969_v3 = vrot.slane %v6722_v32, 5 }
 0x24e   : > { %v3711_v7 = vpop.f32.mrf.mxu3  ;;  %v2659_v51 = vunpack.c.l.b16 %v2626_v21 }
 0x24f   : > { %v2770_v8 = vpop.f32.mrf.mxu1  ;;  %v4276_v1 = vmax.f32 %v4244_v60, 0.0  ;;  %v3776_v44 = vadd.f32 %v3711_v7, %v3119_v25  ;;  %v3561_v25 = vrot.slane %v3559_v57, 5  ;;  %v3620_v7 = vpack.c.b16 %v3603_v28, %v3602_v19 }
 0x250   : > { %5091 = vmatmul.msk.bf16.gmra.mxu0 %vm759_vm3, %v4020_v61  ;;  %v2832_v53 = vadd.f32 %v2770_v8, %v6091_v0 }
 0x251   : > { %v4308_v34 = vmin.f32 %v4276_v1, 6.0  ;;  %v4173_v5 = vadd.f32 %v4108_v46, %v3776_v44  ;;  %v3056_v18 = vpop.f32.mrf.mxu2  ;;  %v2623_v46 = vsel %vm5636_vm7, %v4853_v16, %v2622_v35  ;;  %v3556_v44 = vor.u32 %v3555_v41, %v3552_v45 }
 0x252   : > { %4868 = vmatmul.msk.bf16.gmra.mxu1 %vm759_vm3, %v2674_v30  ;;  %v3120_v39 = vadd.f32 %v3056_v18, %v2831_v40  ;;  %v5029_v30 = vld [vmem:[%s5442_s21 + $0xd4] sm:$0x1]  ;;  %v2658_v1 = vunpack.c.l.b16 %v2623_v46  ;;  %v3566_v33 = vor.u32 %v3565_v14, %v3561_v25  ;;  %v4021_v40 = vpack.c.b16 %v4004_v36, %v4003_v20 }
 0x253   : > { %4340 = vst [vmem:[%s6537_s24 + $0x48] sm:$0xff] %v4308_v34  ;;  %v4209_v58 = vmul.f32 %v6500_v15, %v4173_v5  ;;  %v3569_v37 = vshll.u32 %v5029_v30, 16  ;;  %v3557_v18 = vrot.slane %v3556_v44, 4  ;;  %v5077_v45 = vrot.slane %v5061_v13, 9 }
 0x254   : > { %v3567_v16 = vrot.slane %v3566_v33, 4  ;;  %v2675_v29 = vpack.c.b16 %v2659_v51, %v2658_v1  ;;  %v3972_v41 = vrot.slane %v5029_v30, 5 }
 0x255   : > { %v4245_v61 = vadd.f32 %v6510_v52, %v4209_v58  ;;  %v4110_v60 = vpop.f32.mrf.mxu0  ;;  %v3562_v59 = vsel %vm5461_vm4, %v3557_v18, %v3561_v25  ;;  %v3970_v30 = vsel %vm5636_vm7, %v5077_v45, %v3969_v3 }
 0x256   : > { %v3713_v47 = vpop.f32.mrf.mxu3  ;;  %4980 = vmatmul.msk.bf16.gmra.mxu2 %vm759_vm3, %v5145_v56  ;;  %v3571_v56 = vrot.slane %v3569_v37, 5 }
 0x257   : > { %v2772_v9 = vpop.f32.mrf.mxu1  ;;  %v4277_v62 = vmax.f32 %v4245_v61, 0.0  ;;  %v3777_v23 = vadd.f32 %v3713_v47, %v3120_v39  ;;  %v3971_v47 = vrot.slane %v3969_v3, 4 }
 0x258   : > { %v3572_v54 = vsel %vm5461_vm4, %v3567_v16, %v3571_v56 }
 0x259   : > { %v4309_v10 = vmin.f32 %v4277_v62, 6.0  ;;  %v4174_v35 = vadd.f32 %v4110_v60, %v3777_v23  ;;  %v3059_v57 = vpop.f32.mrf.mxu2  ;;  %v6917_v60 = vld [vmem:[#allocation6_spill] sm:$0xff]  ;;  %v3604_v23 = vunpack.c.l.b16 %v3562_v59  ;;  %v3605_v25 = vunpack.c.l.b16 %v3572_v54 }
 0x25a   : > { %v3121_v5 = vadd.f32 %v3059_v57, %v2832_v53  ;;  %v2833_v32 = vadd.f32 %v2772_v9, %v6917_v60  ;;  %v3973_v9 = vsel %vm5636_vm7, %v3971_v47, %v3972_v41 }
 0x25b   : > { %4341 = vst [vmem:[%s6537_s24 + $0x50] sm:$0xff] %v4309_v10  ;;  %v4210_v34 = vmul.f32 %v6500_v15, %v4174_v35  ;;  %5044 = vmatmul.msk.bf16.gmra.mxu3 %vm759_vm3, %v3620_v7  ;;  %v5146_v7 = vld [vmem:[%s5442_s21 + $0xcc] sm:$0xff]  ;;  %v3621_v37 = vpack.c.b16 %v3605_v25, %v3604_v23  ;;  %v4005_v10 = vunpack.c.l.b16 %v3970_v30  ;;  %v4006_v35 = vunpack.c.l.b16 %v3973_v9  ;;  %s5283_s21 = scalar_lea.hbm %s6906_s4, 512 }
 0x25c   : > { %p5285_p2 = scmp.lt.s32.totalorder %s5283_s21, %s5279_s12 }
 0x25d   : > { %v4246_v19 = vadd.f32 %v6510_v52, %v4210_v34  ;;  %v4113_v28 = vpop.f32.mrf.mxu0 }
 0x25e   : > { %v3716_v0 = vpop.f32.mrf.mxu3  ;;  %p5286_p3 = por %p5285_p2, %p5284_p1 }
 0x25f   : > { %v2775_v8 = vpop.f32.mrf.mxu1  ;;  %v4278_v58 = vmax.f32 %v4246_v19, 0.0  ;;  %v3778_v39 = vadd.f32 %v3716_v0, %v3121_v5 }
 0x260   : > { %5092 = vmatmul.msk.bf16.gmra.mxu0 %vm759_vm3, %v4021_v40  ;;  %v2834_v51 = vadd.f32 %v2775_v8, %v6127_v43  ;;  %v4022_v40 = vpack.c.b16 %v4006_v35, %v4005_v10  ;;  %p5287_p5 = pnand %p5286_p3, %p5282_p0 }
 0x261   : > { %v4310_v14 = vmin.f32 %v4278_v58, 6.0  ;;  %v4175_v61 = vadd.f32 %v4113_v28, %v3778_v39  ;;  %v3061_v46 = vpop.f32.mrf.mxu2 }
 0x262   : > { %4869 = vmatmul.msk.bf16.gmra.mxu1 %vm759_vm3, %v2675_v29  ;;  %v3122_v62 = vadd.f32 %v3061_v46, %v2833_v32 }
 0x263   : > { %4342 = vst [vmem:[%s6537_s24 + $0x58] sm:$0xff] %v4310_v14  ;;  %v4211_v21 = vmul.f32 %v6500_v15, %v4175_v61 }
 0x265   : > { %v4247_v38 = vadd.f32 %v6510_v52, %v4211_v21  ;;  %v4115_v20 = vpop.f32.mrf.mxu0 }
 0x266   : > { %v3718_v36 = vpop.f32.mrf.mxu3  ;;  %4981 = vmatmul.msk.bf16.gmra.mxu2 %vm759_vm3, %v5146_v7 }
 0x267   : > { %v2777_v1 = vpop.f32.mrf.mxu1  ;;  %v4279_v44 = vmax.f32 %v4247_v38, 0.0  ;;  %v3779_v33 = vadd.f32 %v3718_v36, %v3122_v62 }
 0x268   : > { %v2835_v3 = vadd.f32 %v2777_v1, %v6151_v48 }
 0x269   : > { %v4311_v53 = vmin.f32 %v4279_v44, 6.0  ;;  %v4176_v57 = vadd.f32 %v4115_v20, %v3779_v33  ;;  %v3064_v34 = vpop.f32.mrf.mxu2 }
 0x26a   : > { %v3123_v22 = vadd.f32 %v3064_v34, %v2834_v51 }
 0x26b   : > { %4343 = vst [vmem:[%s6537_s24 + $0x60] sm:$0xff] %v4311_v53  ;;  %v4212_v5 = vmul.f32 %v6500_v15, %v4176_v57  ;;  %5045 = vmatmul.msk.bf16.gmra.mxu3 %vm759_vm3, %v3621_v37 }
 0x26d   : > { %v4248_v18 = vadd.f32 %v6510_v52, %v4212_v5  ;;  %v4118_v16 = vpop.f32.mrf.mxu0 }
 0x26e   : > { %v3721_v56 = vpop.f32.mrf.mxu3 }
 0x26f   : > { %v2780_v19 = vpop.f32.mrf.mxu1  ;;  %v4280_v28 = vmax.f32 %v4248_v18, 0.0  ;;  %v3780_v29 = vadd.f32 %v3721_v56, %v3123_v22  ;;  %v6804_v22 = vld [vmem:[%s6905_s3] ss:$0 sm:$0xff] }
 0x270   : > { %5093 = vmatmul.msk.bf16.gmra.mxu0 %vm759_vm3, %v4022_v40  ;;  %v2836_v32 = vadd.f32 %v2780_v19, %v6170_v49 }
 0x271   : > { %v4312_v13 = vmin.f32 %v4280_v28, 6.0  ;;  %v4177_v43 = vadd.f32 %v4118_v16, %v3780_v29  ;;  %v3066_v0 = vpop.f32.mrf.mxu2 }
 0x272   : > { %v3124_v58 = vadd.f32 %v3066_v0, %v2835_v3 }
 0x273   : > { %4344 = vst [vmem:[%s6537_s24 + $0x68] sm:$0xff] %v4312_v13  ;;  %v4213_v8 = vmul.f32 %v6500_v15, %v4177_v43 }
 0x275   : > { %v4249_v39 = vadd.f32 %v6510_v52, %v4213_v8  ;;  %v4120_v59 = vpop.f32.mrf.mxu0 }
 0x276   : > { %v3723_v54 = vpop.f32.mrf.mxu3 }
 0x277   : > { %v2782_v45 = vpop.f32.mrf.mxu1  ;;  %v4281_v41 = vmax.f32 %v4249_v39, 0.0  ;;  %v3781_v14 = vadd.f32 %v3723_v54, %v3124_v58 }
 0x278   : > { %v2837_v9 = vadd.f32 %v2782_v45, %v6194_v17  ;;  %v6798_v17 = vld [vmem:[%s6904_s2] ss:$0 sm:$0xff] }
 0x279   : > { %v4313_v61 = vmin.f32 %v4281_v41, 6.0  ;;  %v4178_v60 = vadd.f32 %v4120_v59, %v3781_v14  ;;  %v3069_v46 = vpop.f32.mrf.mxu2 }
 0x27a   : > { %v3125_v47 = vadd.f32 %v3069_v46, %v2836_v32 }
 0x27b   : > { %4345 = vst [vmem:[%s6537_s24 + $0x70] sm:$0xff] %v4313_v61  ;;  %v4214_v48 = vmul.f32 %v6500_v15, %v4178_v60 }
 0x27d   : > { %v4250_v7 = vadd.f32 %v6510_v52, %v4214_v48  ;;  %v4123_v21 = vpop.f32.mrf.mxu0 }
 0x27e   : > { %v3726_v62 = vpop.f32.mrf.mxu3 }
 0x27f   : > { %v2785_v23 = vpop.f32.mrf.mxu1  ;;  %v4282_v25 = vmax.f32 %v4250_v7, 0.0  ;;  %v3782_v38 = vadd.f32 %v3726_v62, %v3125_v47 }
 0x280   : > { %v2838_v34 = vadd.f32 %v2785_v23, %v6213_v2 }
 0x281   : > { %v4314_v20 = vmin.f32 %v4282_v25, 6.0  ;;  %v4179_v30 = vadd.f32 %v4123_v21, %v3782_v38  ;;  %v3071_v36 = vpop.f32.mrf.mxu2 }
 0x282   : > { %v3126_v1 = vadd.f32 %v3071_v36, %v2837_v9 }
 0x283   : > { %4346 = vst [vmem:[%s6537_s24 + $0x78] sm:$0xff] %v4314_v20  ;;  %v4215_v49 = vmul.f32 %v6500_v15, %v4179_v30 }
 0x285   : > { %v4251_v44 = vadd.f32 %v6510_v52, %v4215_v49  ;;  %v4125_v33 = vpop.f32.mrf.mxu0 }
 0x286   : > { %v3728_v37 = vpop.f32.mrf.mxu3 }
 0x287   : > { %v2787_v10 = vpop.f32.mrf.mxu1  ;;  %v4283_v35 = vmax.f32 %v4251_v44, 0.0  ;;  %v3783_v53 = vadd.f32 %v3728_v37, %v3126_v1 }
 0x288   : > { %v2839_v13 = vadd.f32 %v2787_v10, %v6237_v42 }
 0x289   : > { %v4315_v57 = vmin.f32 %v4283_v35, 6.0  ;;  %v4180_v51 = vadd.f32 %v4125_v33, %v3783_v53  ;;  %v3074_v5 = vpop.f32.mrf.mxu2 }
 0x28a   : > { %v3127_v52 = vadd.f32 %v3074_v5, %v2838_v34 }
 0x28b   : > { %4347 = vst [vmem:[%s6537_s24 + $0x80] sm:$0xff] %v4315_v57  ;;  %v4216_v15 = vmul.f32 %v6798_v17, %v4180_v51 }
 0x28d   : > { %v4252_v40 = vadd.f32 %v6804_v22, %v4216_v15  ;;  %v4128_v18 = vpop.f32.mrf.mxu0 }
 0x28e   : > { %v3731_v2 = vpop.f32.mrf.mxu3 }
 0x28f   : > { %v2790_v16 = vpop.f32.mrf.mxu1  ;;  %v4284_v56 = vmax.f32 %v4252_v40, 0.0  ;;  %v3784_v19 = vadd.f32 %v3731_v2, %v3127_v52 }
 0x290   : > { %v2840_v61 = vadd.f32 %v2790_v16, %v6256_v11 }
 0x291   : > { %v4316_v28 = vmin.f32 %v4284_v56, 6.0  ;;  %v4181_v29 = vadd.f32 %v4128_v18, %v3784_v19  ;;  %v3076_v43 = vpop.f32.mrf.mxu2 }
 0x292   : > { %v3128_v0 = vadd.f32 %v3076_v43, %v2839_v13 }
 0x293   : > { %4348 = vst [vmem:[%s6537_s24 + $0x88] sm:$0xff] %v4316_v28  ;;  %v4217_v3 = vmul.f32 %v6798_v17, %v4181_v29 }
 0x295   : > { %v4253_v8 = vadd.f32 %v6804_v22, %v4217_v3  ;;  %v4130_v58 = vpop.f32.mrf.mxu0 }
 0x296   : > { %v3733_v39 = vpop.f32.mrf.mxu3 }
 0x297   : > { %v2792_v59 = vpop.f32.mrf.mxu1  ;;  %v4285_v54 = vmax.f32 %v4253_v8, 0.0  ;;  %v3785_v45 = vadd.f32 %v3733_v39, %v3128_v0 }
 0x298   : > { %v2841_v38 = vadd.f32 %v2792_v59, %v6280_v26 }
 0x299   : > { %v4317_v41 = vmin.f32 %v4285_v54, 6.0  ;;  %v4182_v14 = vadd.f32 %v4130_v58, %v3785_v45  ;;  %v3079_v60 = vpop.f32.mrf.mxu2 }
 0x29a   : > { %v3129_v32 = vadd.f32 %v3079_v60, %v2840_v61 }
 0x29b   : > { %4349 = vst [vmem:[%s6537_s24 + $0x90] sm:$0xff] %v4317_v41  ;;  %v4218_v42 = vmul.f32 %v6798_v17, %v4182_v14 }
 0x29d   : > { %v4254_v46 = vadd.f32 %v6804_v22, %v4218_v42  ;;  %v4133_v48 = vpop.f32.mrf.mxu0 }
 0x29e   : > { %v3736_v47 = vpop.f32.mrf.mxu3 }
 0x29f   : > { %v2795_v7 = vpop.f32.mrf.mxu1  ;;  %v4286_v21 = vmax.f32 %v4254_v46, 0.0  ;;  %v3786_v62 = vadd.f32 %v3736_v47, %v3129_v32 }
 0x2a0   : > { %v2842_v35 = vadd.f32 %v2795_v7, %v6299_v27 }
 0x2a1   : > { %v4318_v23 = vmin.f32 %v4286_v21, 6.0  ;;  %v4183_v25 = vadd.f32 %v4133_v48, %v3786_v62  ;;  %v3081_v20 = vpop.f32.mrf.mxu2  ;;  %v6918_v48 = vld [vmem:[#allocation7_spill] sm:$0xff] }
 0x2a2   : > { %v3130_v30 = vadd.f32 %v3081_v20, %v2841_v38 }
 0x2a3   : > { %4350 = vst [vmem:[%s6537_s24 + $0x98] sm:$0xff] %v4318_v23  ;;  %v4219_v11 = vmul.f32 %v6798_v17, %v4183_v25 }
 0x2a5   : > { %v4255_v9 = vadd.f32 %v6804_v22, %v4219_v11  ;;  %v4135_v36 = vpop.f32.mrf.mxu0 }
 0x2a6   : > { %v3738_v49 = vpop.f32.mrf.mxu3 }
 0x2a7   : > { %v2797_v1 = vpop.f32.mrf.mxu1  ;;  %v4287_v44 = vmax.f32 %v4255_v9, 0.0  ;;  %v3787_v33 = vadd.f32 %v3738_v49, %v3130_v30 }
 0x2a8   : > { %v2843_v16 = vadd.f32 %v2797_v1, %v6323_v63 }
 0x2a9   : > { %v4319_v37 = vmin.f32 %v4287_v44, 6.0  ;;  %v4184_v10 = vadd.f32 %v4135_v36, %v3787_v33  ;;  %v3084_v53 = vpop.f32.mrf.mxu2 }
 0x2aa   : > { %v3131_v57 = vadd.f32 %v3084_v53, %v2842_v35 }
 0x2ab   : > { %4351 = vst [vmem:[%s6537_s24 + $0xa0] sm:$0xff] %v4319_v37  ;;  %v4220_v26 = vmul.f32 %v6798_v17, %v4184_v10 }
 0x2ad   : > { %v4256_v51 = vadd.f32 %v6804_v22, %v4220_v26  ;;  %v4138_v34 = vpop.f32.mrf.mxu0 }
 0x2ae   : > { %v3741_v5 = vpop.f32.mrf.mxu3 }
 0x2af   : > { %v2800_v15 = vpop.f32.mrf.mxu1  ;;  %v4288_v52 = vmax.f32 %v4256_v51, 0.0  ;;  %v3788_v40 = vadd.f32 %v3741_v5, %v3131_v57 }
 0x2b0   : > { %v2844_v39 = vadd.f32 %v2800_v15, %v6342_v31 }
 0x2b1   : > { %v4320_v18 = vmin.f32 %v4288_v52, 6.0  ;;  %v4185_v2 = vadd.f32 %v4138_v34, %v3788_v40  ;;  %v3086_v56 = vpop.f32.mrf.mxu2 }
 0x2b2   : > { %v3132_v19 = vadd.f32 %v3086_v56, %v2843_v16 }
 0x2b3   : > { %4352 = vst [vmem:[%s6537_s24 + $0xa8] sm:$0xff] %v4320_v18  ;;  %v4221_v27 = vmul.f32 %v6798_v17, %v4185_v2 }
 0x2b5   : > { %v4257_v28 = vadd.f32 %v6804_v22, %v4221_v27  ;;  %v4140_v29 = vpop.f32.mrf.mxu0 }
 0x2b6   : > { %v3743_v13 = vpop.f32.mrf.mxu3 }
 0x2b7   : > { %v2802_v43 = vpop.f32.mrf.mxu1  ;;  %v4289_v3 = vmax.f32 %v4257_v28, 0.0  ;;  %v3789_v0 = vadd.f32 %v3743_v13, %v3132_v19 }
 0x2b8   : > { %v2845_v47 = vadd.f32 %v2802_v43, %v6918_v48 }
 0x2b9   : > { %v4321_v8 = vmin.f32 %v4289_v3, 6.0  ;;  %v4186_v58 = vadd.f32 %v4140_v29, %v3789_v0  ;;  %v3089_v59 = vpop.f32.mrf.mxu2 }
 0x2ba   : > { %v3133_v54 = vadd.f32 %v3089_v59, %v2844_v39 }
 0x2bb   : > { %4353 = vst [vmem:[%s6537_s24 + $0xb0] sm:$0xff] %v4321_v8  ;;  %v4222_v63 = vmul.f32 %v6798_v17, %v4186_v58 }
 0x2bd   : > { %v4258_v45 = vadd.f32 %v6804_v22, %v4222_v63  ;;  %v4143_v41 = vpop.f32.mrf.mxu0 }
 0x2be   : > { %v3746_v14 = vpop.f32.mrf.mxu3 }
 0x2bf   : > { %v2805_v61 = vpop.f32.mrf.mxu1  ;;  %v4290_v60 = vmax.f32 %v4258_v45, 0.0  ;;  %v3790_v42 = vadd.f32 %v3746_v14, %v3133_v54 }
 0x2c0   : > { %v2846_v36 = vadd.f32 %v2805_v61, %v6383_v55 }
 0x2c1   : > { %v4322_v32 = vmin.f32 %v4290_v60, 6.0  ;;  %v4187_v46 = vadd.f32 %v4143_v41, %v3790_v42  ;;  %v3091_v7 = vpop.f32.mrf.mxu2 }
 0x2c2   : > { %v3134_v21 = vadd.f32 %v3091_v7, %v2845_v47 }
 0x2c3   : > { %4354 = vst [vmem:[%s6537_s24 + $0xb8] sm:$0xff] %v4322_v32  ;;  %v4223_v31 = vmul.f32 %v6798_v17, %v4187_v46 }
 0x2c5   : > { %v4259_v62 = vadd.f32 %v6804_v22, %v4223_v31  ;;  %v4145_v23 = vpop.f32.mrf.mxu0 }
 0x2c6   : > { %v3748_v25 = vpop.f32.mrf.mxu3 }
 0x2c7   : > { %v2807_v38 = vpop.f32.mrf.mxu1  ;;  %v4291_v20 = vmax.f32 %v4259_v62, 0.0  ;;  %v3791_v11 = vadd.f32 %v3748_v25, %v3134_v21 }
 0x2c8   : > { %v2847_v34 = vadd.f32 %v2807_v38, %v6403_v6 }
 0x2c9   : > { %v4323_v30 = vmin.f32 %v4291_v20, 6.0  ;;  %v4188_v9 = vadd.f32 %v4145_v23, %v3791_v11  ;;  %v3094_v49 = vpop.f32.mrf.mxu2 }
 0x2ca   : > { %v3135_v44 = vadd.f32 %v3094_v49, %v2846_v36 }
 0x2cb   : > { %4355 = vst [vmem:[%s6537_s24 + $0xc0] sm:$0xff] %v4323_v30  ;;  %v4224_v1 = vmul.f32 %v6798_v17, %v4188_v9 }
 0x2cd   : > { %v4260_v33 = vadd.f32 %v6804_v22, %v4224_v1  ;;  %v4148_v37 = vpop.f32.mrf.mxu0 }
 0x2ce   : > { %v3751_v10 = vpop.f32.mrf.mxu3 }
 0x2cf   : > { %v4292_v35 = vmax.f32 %v4260_v33, 0.0  ;;  %v3792_v53 = vadd.f32 %v3751_v10, %v3135_v44  ;;  %v2810_v26 = vpop.f32.mrf.mxu1 }
 0x2d0   : > { %v2848_v19 = vadd.f32 %v2810_v26, %v6422_v12 }
 0x2d1   : > { %v4324_v57 = vmin.f32 %v4292_v35, 6.0  ;;  %v4189_v51 = vadd.f32 %v4148_v37, %v3792_v53  ;;  %v3096_v5 = vpop.f32.mrf.mxu2 }
 0x2d2   : > { %v3136_v15 = vadd.f32 %v3096_v5, %v2847_v34 }
 0x2d3   : > { %4356 = vst [vmem:[%s6537_s24 + $0xc8] sm:$0xff] %v4324_v57  ;;  %v4225_v55 = vmul.f32 %v6798_v17, %v4189_v51 }
 0x2d5   : > { %v4261_v52 = vadd.f32 %v6804_v22, %v4225_v55  ;;  %v4150_v40 = vpop.f32.mrf.mxu0 }
 0x2d6   : > { %v3753_v18 = vpop.f32.mrf.mxu3 }
 0x2d7   : > { %v4293_v2 = vmax.f32 %v4261_v52, 0.0  ;;  %v3793_v16 = vadd.f32 %v3753_v18, %v3136_v15  ;;  %v2812_v29 = vpop.f32.mrf.mxu1 }
 0x2d8   : > { %v2849_v63 = vadd.f32 %v2812_v29, %v6445_v24 }
 0x2d9   : > { %v4325_v56 = vmin.f32 %v4293_v2, 6.0  ;;  %v4190_v27 = vadd.f32 %v4150_v40, %v3793_v16  ;;  %v3099_v28 = vpop.f32.mrf.mxu2 }
 0x2da   : > { %v3137_v13 = vadd.f32 %v3099_v28, %v2848_v19 }
 0x2db   : > { %4357 = vst [vmem:[%s6537_s24 + $0xd0] sm:$0xff] %v4325_v56  ;;  %v4226_v6 = vmul.f32 %v6798_v17, %v4190_v27 }
 0x2dd   : > { %v4262_v43 = vadd.f32 %v6804_v22, %v4226_v6  ;;  %v4153_v3 = vpop.f32.mrf.mxu0 }
 0x2de   : > { %v3756_v0 = vpop.f32.mrf.mxu3 }
 0x2df   : > { %v4294_v8 = vmax.f32 %v4262_v43, 0.0  ;;  %v3794_v58 = vadd.f32 %v3756_v0, %v3137_v13  ;;  %v2815_v41 = vpop.f32.mrf.mxu1 }
 0x2e0   : > { %v2850_v47 = vadd.f32 %v2815_v41, %v6466_v4 }
 0x2e1   : > { %v4326_v39 = vmin.f32 %v4294_v8, 6.0  ;;  %v4191_v59 = vadd.f32 %v4153_v3, %v3794_v58  ;;  %v3101_v54 = vpop.f32.mrf.mxu2 }
 0x2e2   : > { %v3138_v45 = vadd.f32 %v3101_v54, %v2849_v63 }
 0x2e3   : > { %4358 = vst [vmem:[%s6537_s24 + $0xd8] sm:$0xff] %v4326_v39  ;;  %v4227_v12 = vmul.f32 %v6798_v17, %v4191_v59 }
 0x2e5   : > { %v4263_v14 = vadd.f32 %v6804_v22, %v4227_v12  ;;  %v4155_v61 = vpop.f32.mrf.mxu0 }
 0x2e6   : > { %v3758_v60 = vpop.f32.mrf.mxu3 }
 0x2e7   : > { %v4295_v42 = vmax.f32 %v4263_v14, 0.0  ;;  %v3795_v32 = vadd.f32 %v3758_v60, %v3138_v45  ;;  %v2817_v62 = vpop.f32.mrf.mxu1 }
 0x2e8   : > { %v2851_v9 = vadd.f32 %v2817_v62, %v6488_v50 }
 0x2e9   : > { %v4327_v46 = vmin.f32 %v4295_v42, 6.0  ;;  %v4192_v48 = vadd.f32 %v4155_v61, %v3795_v32  ;;  %v3104_v7 = vpop.f32.mrf.mxu2 }
 0x2ea   : > { %v3139_v31 = vadd.f32 %v3104_v7, %v2850_v47 }
 0x2eb   : > { %4359 = vst [vmem:[%s6537_s24 + $0xe0] sm:$0xff] %v4327_v46  ;;  %v4228_v24 = vmul.f32 %v6798_v17, %v4192_v48 }
 0x2ed   : > { %v4264_v21 = vadd.f32 %v6804_v22, %v4228_v24  ;;  %v4158_v23 = vpop.f32.mrf.mxu0 }
 0x2ee   : > { %v3761_v25 = vpop.f32.mrf.mxu3 }
 0x2ef   : > { %v4296_v38 = vmax.f32 %v4264_v21, 0.0  ;;  %v3796_v20 = vadd.f32 %v3761_v25, %v3139_v31 }
 0x2f1   : > { %v4328_v11 = vmin.f32 %v4296_v38, 6.0  ;;  %v4193_v30 = vadd.f32 %v4158_v23, %v3796_v20  ;;  %v3106_v36 = vpop.f32.mrf.mxu2 }
 0x2f2   : > { %v3140_v49 = vadd.f32 %v3106_v36, %v2851_v9 }
 0x2f3   : > { %4360 = vst [vmem:[%s6537_s24 + $0xe8] sm:$0xff] %v4328_v11  ;;  %v4229_v4 = vmul.f32 %v6798_v17, %v4193_v30 }
 0x2f5   : > { %v4265_v1 = vadd.f32 %v6804_v22, %v4229_v4  ;;  %v4160_v10 = vpop.f32.mrf.mxu0 }
 0x2f6   : > { %v3763_v44 = vpop.f32.mrf.mxu3 }
 0x2f7   : > { %v4297_v33 = vmax.f32 %v4265_v1, 0.0  ;;  %v3797_v37 = vadd.f32 %v3763_v44, %v3140_v49 }
 0x2f9   : > { %v4329_v35 = vmin.f32 %v4297_v33, 6.0  ;;  %v4194_v53 = vadd.f32 %v4160_v10, %v3797_v37 }
 0x2fb   : > { %4361 = vst [vmem:[%s6537_s24 + $0xf0] sm:$0xff] %v4329_v35  ;;  %v4230_v50 = vmul.f32 %v6798_v17, %v4194_v53 }
 0x2fd   : > { %v4266_v26 = vadd.f32 %v6804_v22, %v4230_v50 }
 0x2ff   : > { %v4298_v57 = vmax.f32 %v4266_v26, 0.0 }
 0x301   : > { %v4330_v51 = vmin.f32 %v4298_v57, 6.0 }
 0x303   : > { %4362 = vst [vmem:[%s6537_s24 + $0xf8] sm:$0xff] %v4330_v51 }
 0x304   : > { %5290 = shalt.err (!%p5287_p5)
}
 0x305   : > { %s5343_s14 = smov 128   ;;  %s5344_s24 = smov 8  }
 0x306   : > { %5152 = dma.vmem_to_hbm [thread:$0]  (%p5410_p4), %s4380_s9, 4096, %s4382_s10, %s4364_s18, %s5343_s14, %s5343_s14, %s5344_s24  }
 0x307 PF: > { %p5158_p6 = scmp.ge.s32.totalorder %s5341_s20, 2  ;;  %s4396_s30 = sand.u32 1, %s5321_s15  }
 0x308   : > { %s4397_s5 = scalar_lea.sflag [#allocation3], %s4396_s30 }
 0x309   : > { %p5155_p7 = pnand %p5158_p6, %p5417_p8 }
 0x30b   : > { %p5156_p9 = pneg %p5155_p7 }
 0x30d   : > { %5316 = dma.done.wait (%p5156_p9), %s4397_s5, 4096  }
 0x30e   : > { %5318 = vsyncadd (%p5156_p9), %s4397_s5, 4294963200  ;;  %s17_s20 = sadd.s32 1, %s5341_s20   ;;  %s6919_s15 = smov %s5325_s16 }
 0x30f   : > { %p14_p10 = scmp.ge.s32.totalorder %s17_s20, 4   ;;  %s6920_s16 = smov %s5329_s17 }
 0x310   : > { %s6921_s17 = smov %s5423_s28  ;;  %s6922_s18 = smov %s5337_s19 }
 0x311   : > { %s6923_s19 = smov %s6925_s23  ;;  %16 = sbr.rel (!%p14_p10) target bundleno = 4 (0x4), region = 83 }
 0x316   :  { %4403 = vsyncpa [#allocation3], 1 }
 0x317   :  { %4405 = vsyncpa [#allocation3 + $0x1], 1 }

</bundles_post_ra>
